<compile_context>
chip_gen: v5e
topology: v5e:2x2
jax: 0.10.0
libtpu: 0.0.40
codegen_flags: <defaults>
</compile_context>

<pallas_src>
import functools

import jax
import jax.numpy as jnp
from jax.experimental import pallas as pl
from jax.experimental.pallas import tpu as pltpu


def conv_gn_silu_kernel(xp_ref, w_ref, params_ref, gmap_ref, gmap_t_ref, o_ref,
                        *, H, W, Cin, Cout, groups, eps):
    """One batch-block per grid step.

    xp_ref:     (B_BLK, H+2, W+2, Cin)   zero-padded NHWC input tile
    w_ref:      (3*Cin, 3*Cout)          conv weight, [dy*Cin+ci, dx*Cout+co]
    params_ref: (3, W*Cout)              rows: bias, gamma, beta (per-channel, W-tiled, f32)
    gmap_ref:   (W*Cout, groups)         one-hot (dense-channel -> group) map (f32)
    gmap_t_ref: (groups, W*Cout)         transpose of the above (f32)
    o_ref:      (B_BLK, H, W*Cout)       lane-dense output tile
    """
    B = xp_ref.shape[0]
    Wp = W + 2
    WC = W * Cout
    M = B * H * Wp

    # ---- LHS assembly: dy taps folded into the contraction dim K = 3*Cin ----
    xp = xp_ref[...]                                              # (B, H+2, Wp, Cin)
    lhs = jnp.concatenate([xp[:, dy:dy + H, :, :] for dy in range(3)],
                          axis=-1)                                # (B, H, Wp, 3*Cin)
    lhs = lhs.reshape(M, 3 * Cin)

    # ---- single MXU matmul; dx taps live in the output (N) dim ----
    acc = jnp.dot(lhs, w_ref[...],
                  preferred_element_type=jnp.float32)             # (M, 3*Cout) f32

    # ---- combine the three dx taps with static window slices ----
    r4 = acc.reshape(B, H, Wp, 3 * Cout)
    conv = (r4[:, :, 0:W, 0:Cout]
            + r4[:, :, 1:W + 1, Cout:2 * Cout]
            + r4[:, :, 2:W + 2, 2 * Cout:3 * Cout])               # (B, H, W, Cout)

    # ---- go lane-dense for the whole elementwise tail ----
    conv = conv.reshape(B, H, WC)                                 # (B, H, W*Cout)

    bias = params_ref[0:1, :]                                     # (1, WC)
    gamma = params_ref[1:2, :]
    beta = params_ref[2:3, :]
    conv = conv + bias                                            # conv bias

    # ---- GroupNorm: per-image per-group stats via tiny one-hot matmuls ----
    sum_wc = jnp.sum(conv, axis=1)                                # (B, WC)
    sq_wc = jnp.sum(conv * conv, axis=1)                          # (B, WC)
    cnt = jnp.float32(H * W * (Cout // groups))

    gmap = gmap_ref[...]                                          # (WC, G)
    gmap_t = gmap_t_ref[...]                                      # (G, WC)

    mean_g = jnp.dot(sum_wc, gmap, preferred_element_type=jnp.float32) / cnt
    ex2_g = jnp.dot(sq_wc, gmap, preferred_element_type=jnp.float32) / cnt
    var_g = jnp.maximum(ex2_g - mean_g * mean_g, 0.0)             # f32; guard E[x^2]-m^2
    inv_g = jax.lax.rsqrt(var_g + eps)                            # (B, G)

    mean_wc = jnp.dot(mean_g, gmap_t, preferred_element_type=jnp.float32)  # (B, WC)
    inv_wc = jnp.dot(inv_g, gmap_t, preferred_element_type=jnp.float32)    # (B, WC)

    scale_wc = gamma * inv_wc                                     # fused per-channel affine
    shift_wc = beta - mean_wc * scale_wc

    y = conv * scale_wc[:, None, :] + shift_wc[:, None, :]

    # ---- SiLU ----
    y = y * jax.nn.sigmoid(y)

    o_ref[...] = y.astype(o_ref.dtype)                            # lane-dense store


def _pick_batch_block(N, per_image_bytes, vmem_budget=8 * 1024 * 1024):
    """Largest divisor of N that keeps >=2 grid steps (v7x megacore) and fits VMEM."""
    if N <= 1:
        return 1
    best = 1
    for b in range(1, N // 2 + 1):
        if N % b == 0 and b * per_image_bytes <= vmem_budget:
            best = b
    return best


@functools.partial(jax.jit, static_argnames=("groups", "eps"))
def conv_block_forward(x_nchw, w_oihw, b, gamma, beta, *, groups=8, eps=1e-5):
    N, Cin, H, W = x_nchw.shape
    Cout = w_oihw.shape[0]
    assert Cout % groups == 0
    WC = W * Cout

    # NCHW -> NHWC + halo pad; under jit these fuse on the XLA side.
    x_nhwc = jnp.transpose(x_nchw, (0, 2, 3, 1))
    xp = jnp.pad(x_nhwc, ((0, 0), (1, 1), (1, 1), (0, 0)))

    # (Cout, Cin, 3, 3) -> (dy*Cin + ci, dx*Cout + co): dy folded into K, dx into N.
    w_pack = jnp.transpose(w_oihw, (2, 1, 3, 0)).reshape(3 * Cin, 3 * Cout)

    # bias / gamma / beta pre-tiled to the lane-dense (W*Cout) layout.
    params = jnp.stack([jnp.tile(b.astype(jnp.float32), W),
                        jnp.tile(gamma.astype(jnp.float32), W),
                        jnp.tile(beta.astype(jnp.float32), W)], axis=0)   # (3, WC)

    # one-hot (dense channel index -> group) map and its transpose.
    cpg = Cout // groups
    ch = jnp.arange(WC) % Cout
    gmap = (ch[:, None] // cpg == jnp.arange(groups)[None, :]).astype(jnp.float32)
    gmap_t = jnp.transpose(gmap)

    # Rough per-image VMEM working set (double-buffered I/O + f32 intermediates).
    itemsize = jnp.dtype(x_nchw.dtype).itemsize
    per_img = ((H + 2) * (W + 2) * Cin * itemsize * 2
               + H * (W + 2) * 3 * Cout * 4
               + 4 * H * W * Cout * 4
               + H * W * Cout * itemsize * 2)
    b_blk = _pick_batch_block(N, per_img)

    kern = functools.partial(conv_gn_silu_kernel, H=H, W=W, Cin=Cin,
                             Cout=Cout, groups=groups, eps=eps)

    out_dense = pl.pallas_call(
        kern,
        out_shape=jax.ShapeDtypeStruct((N, H, WC), x_nchw.dtype),
        grid_spec=pltpu.PrefetchScalarGridSpec(
            num_scalar_prefetch=0,
            grid=(N // b_blk,),
            in_specs=[
                pl.BlockSpec((b_blk, H + 2, W + 2, Cin), lambda n: (n, 0, 0, 0)),
                pl.BlockSpec((3 * Cin, 3 * Cout), lambda n: (0, 0)),
                pl.BlockSpec((3, WC), lambda n: (0, 0)),
                pl.BlockSpec((WC, groups), lambda n: (0, 0)),
                pl.BlockSpec((groups, WC), lambda n: (0, 0)),
            ],
            out_specs=pl.BlockSpec((b_blk, H, WC), lambda n: (n, 0, 0)),
        ),
        compiler_params=pltpu.CompilerParams(
            dimension_semantics=("parallel",),
            vmem_limit_bytes=48 * 1024 * 1024,
        ),
    )(xp, w_pack, params, gmap, gmap_t)

    # Lane-dense (N, H, W*Cout) -> NCHW; fuses with downstream consumers under jit.
    out_nhwc = out_dense.reshape(N, H, W, Cout)
    return jnp.transpose(out_nhwc, (0, 3, 1, 2))


def reference_forward(x, w_oihw, b, gamma, beta, *, groups=8, eps=1e-5):
    """Pure-JAX reference with PyTorch semantics (NCHW)."""
    y = jax.lax.conv_general_dilated(
        x, w_oihw, window_strides=(1, 1), padding="SAME",
        dimension_numbers=("NCHW", "OIHW", "NCHW"))
    y = y + b.reshape(1, -1, 1, 1)
    N, C, H, W = y.shape
    yg = y.reshape(N, groups, C // groups, H, W)
    mean = jnp.mean(yg, axis=(2, 3, 4), keepdims=True)
    var = jnp.mean((yg - mean) ** 2, axis=(2, 3, 4), keepdims=True)
    yg = (yg - mean) * jax.lax.rsqrt(var + eps)
    y = yg.reshape(N, C, H, W) * gamma.reshape(1, -1, 1, 1) + beta.reshape(1, -1, 1, 1)
    return y * jax.nn.sigmoid(y)


if __name__ == "__main__":
    # Small shapes consistent with the module: groups=8 => out_channels % 8 == 0
    N, Cin, Cout, H, W = 2, 4, 16, 16, 16
    groups = 8

    key = jax.random.PRNGKey(0)
    kx, kw, kb, kg, kbe = jax.random.split(key, 5)

    x = jax.random.normal(kx, (N, Cin, H, W), dtype=jnp.float32)
    w = jax.random.normal(kw, (Cout, Cin, 3, 3), dtype=jnp.float32) * 0.1
    b = jax.random.normal(kb, (Cout,), dtype=jnp.float32) * 0.1
    gamma = 1.0 + 0.1 * jax.random.normal(kg, (Cout,), dtype=jnp.float32)
    beta = 0.1 * jax.random.normal(kbe, (Cout,), dtype=jnp.float32)

    out = conv_block_forward(x, w, b, gamma, beta, groups=groups)
    out = jax.block_until_ready(out)

    ref = reference_forward(x, w, b, gamma, beta, groups=groups)
    assert out.shape == (N, Cout, H, W)
    assert jnp.allclose(out, ref, atol=1e-4, rtol=1e-4), (
        float(jnp.max(jnp.abs(out - ref))))

    print("KERNEL_OK")
</pallas_src>

<mosaic_0001>
module attributes {stable_mosaic.version = 11 : i64} {
  func.func @conv_gn_silu_kernel(%arg0: i32, %arg1: memref<1x18x18x4xf32, #tpu.memory_space<vmem>>, %arg2: memref<12x48xf32, #tpu.memory_space<vmem>>, %arg3: memref<3x256xf32, #tpu.memory_space<vmem>>, %arg4: memref<256x8xf32, #tpu.memory_space<vmem>>, %arg5: memref<8x256xf32, #tpu.memory_space<vmem>>, %arg6: memref<1x16x256xf32, #tpu.memory_space<vmem>>) attributes {dimension_semantics = [#tpu.dimension_semantics<parallel>], iteration_bounds = array<i64: 2>, scalar_prefetch = 0 : i64, scratch_operands = 0 : i64, tpu.core_type = #tpu.core_type<tc>, window_params = [{transform_indices = @transform_0, window_bounds = array<i64: 1, 18, 18, 4>}, {pipeline_mode = #tpu.pipeline_mode<synchronous>, transform_indices = @transform_1, window_bounds = array<i64: 12, 48>}, {pipeline_mode = #tpu.pipeline_mode<synchronous>, transform_indices = @transform_2, window_bounds = array<i64: 3, 256>}, {pipeline_mode = #tpu.pipeline_mode<synchronous>, transform_indices = @transform_3, window_bounds = array<i64: 256, 8>}, {pipeline_mode = #tpu.pipeline_mode<synchronous>, transform_indices = @transform_4, window_bounds = array<i64: 8, 256>}, {transform_indices = @transform_5, window_bounds = array<i64: 1, 16, 256>}]} {
    %c0 = arith.constant 0 : index
    %c0_0 = arith.constant 0 : index
    %c0_1 = arith.constant 0 : index
    %c0_2 = arith.constant 0 : index
    %0 = vector.load %arg1[%c0, %c0_0, %c0_1, %c0_2] : memref<1x18x18x4xf32, #tpu.memory_space<vmem>>, vector<1x18x18x4xf32>
    %1 = vector.extract_strided_slice %0 {offsets = [0, 0, 0, 0], sizes = [1, 16, 18, 4], strides = [1, 1, 1, 1]} : vector<1x18x18x4xf32> to vector<1x16x18x4xf32>
    %2 = vector.extract_strided_slice %0 {offsets = [0, 1, 0, 0], sizes = [1, 16, 18, 4], strides = [1, 1, 1, 1]} : vector<1x18x18x4xf32> to vector<1x16x18x4xf32>
    %3 = vector.extract_strided_slice %0 {offsets = [0, 2, 0, 0], sizes = [1, 16, 18, 4], strides = [1, 1, 1, 1]} : vector<1x18x18x4xf32> to vector<1x16x18x4xf32>
    %4 = tpu.concatenate %1, %2, %3 in 3 : vector<1x16x18x4xf32>, vector<1x16x18x4xf32>, vector<1x16x18x4xf32> -> vector<1x16x18x12xf32>
    %5 = vector.shape_cast %4 : vector<1x16x18x12xf32> to vector<288x12xf32>
    %c0_3 = arith.constant 0 : index
    %c0_4 = arith.constant 0 : index
    %6 = vector.load %arg2[%c0_3, %c0_4] : memref<12x48xf32, #tpu.memory_space<vmem>>, vector<12x48xf32>
    %cst = arith.constant dense<0.000000e+00> : vector<288x48xf32>
    %7 = tpu.matmul %5, %6, %cst {dimension_numbers = #tpu.dot_dimension_numbers<[1], [0], [0], [1], [0, 0, 1, 1], [], []>} : vector<288x12xf32>, vector<12x48xf32>, vector<288x48xf32> -> vector<288x48xf32>
    %8 = vector.shape_cast %7 : vector<288x48xf32> to vector<1x16x18x48xf32>
    %9 = vector.extract_strided_slice %8 {offsets = [0, 0, 0, 0], sizes = [1, 16, 16, 16], strides = [1, 1, 1, 1]} : vector<1x16x18x48xf32> to vector<1x16x16x16xf32>
    %10 = vector.extract_strided_slice %8 {offsets = [0, 0, 1, 16], sizes = [1, 16, 16, 16], strides = [1, 1, 1, 1]} : vector<1x16x18x48xf32> to vector<1x16x16x16xf32>
    %11 = arith.addf %9, %10 : vector<1x16x16x16xf32>
    %12 = vector.extract_strided_slice %8 {offsets = [0, 0, 2, 32], sizes = [1, 16, 16, 16], strides = [1, 1, 1, 1]} : vector<1x16x18x48xf32> to vector<1x16x16x16xf32>
    %13 = arith.addf %11, %12 : vector<1x16x16x16xf32>
    %14 = vector.shape_cast %13 : vector<1x16x16x16xf32> to vector<1x16x256xf32>
    %c0_5 = arith.constant 0 : index
    %c0_6 = arith.constant 0 : index
    %15 = vector.load %arg3[%c0_5, %c0_6] : memref<3x256xf32, #tpu.memory_space<vmem>>, vector<1x256xf32>
    %c1 = arith.constant 1 : index
    %c0_7 = arith.constant 0 : index
    %16 = vector.load %arg3[%c1, %c0_7] : memref<3x256xf32, #tpu.memory_space<vmem>>, vector<1x256xf32>
    %c2 = arith.constant 2 : index
    %c0_8 = arith.constant 0 : index
    %17 = vector.load %arg3[%c2, %c0_8] : memref<3x256xf32, #tpu.memory_space<vmem>>, vector<1x256xf32>
    %18 = vector.shape_cast %15 : vector<1x256xf32> to vector<1x1x256xf32>
    %19 = vector.broadcast %18 : vector<1x1x256xf32> to vector<1x16x256xf32>
    %20 = arith.addf %14, %19 : vector<1x16x256xf32>
    %cst_9 = arith.constant dense<0.000000e+00> : vector<1x256xf32>
    %21 = vector.multi_reduction <add>, %20, %cst_9 [1] : vector<1x16x256xf32> to vector<1x256xf32>
    %22 = arith.mulf %20, %20 : vector<1x16x256xf32>
    %cst_10 = arith.constant dense<0.000000e+00> : vector<1x256xf32>
    %23 = vector.multi_reduction <add>, %22, %cst_10 [1] : vector<1x16x256xf32> to vector<1x256xf32>
    %c0_11 = arith.constant 0 : index
    %c0_12 = arith.constant 0 : index
    %24 = vector.load %arg4[%c0_11, %c0_12] : memref<256x8xf32, #tpu.memory_space<vmem>>, vector<256x8xf32>
    %c0_13 = arith.constant 0 : index
    %c0_14 = arith.constant 0 : index
    %25 = vector.load %arg5[%c0_13, %c0_14] : memref<8x256xf32, #tpu.memory_space<vmem>>, vector<8x256xf32>
    %cst_15 = arith.constant dense<0.000000e+00> : vector<1x8xf32>
    %26 = tpu.matmul %21, %24, %cst_15 {dimension_numbers = #tpu.dot_dimension_numbers<[1], [0], [0], [1], [0, 0, 1, 1], [], []>} : vector<1x256xf32>, vector<256x8xf32>, vector<1x8xf32> -> vector<1x8xf32>
    %cst_16 = arith.constant 5.120000e+02 : f32
    %27 = vector.broadcast %cst_16 : f32 to vector<1x8xf32>
    %28 = arith.divf %26, %27 : vector<1x8xf32>
    %cst_17 = arith.constant dense<0.000000e+00> : vector<1x8xf32>
    %29 = tpu.matmul %23, %24, %cst_17 {dimension_numbers = #tpu.dot_dimension_numbers<[1], [0], [0], [1], [0, 0, 1, 1], [], []>} : vector<1x256xf32>, vector<256x8xf32>, vector<1x8xf32> -> vector<1x8xf32>
    %cst_18 = arith.constant 5.120000e+02 : f32
    %30 = vector.broadcast %cst_18 : f32 to vector<1x8xf32>
    %31 = arith.divf %29, %30 : vector<1x8xf32>
    %32 = arith.mulf %28, %28 : vector<1x8xf32>
    %33 = arith.subf %31, %32 : vector<1x8xf32>
    %cst_19 = arith.constant 0.000000e+00 : f32
    %34 = vector.broadcast %cst_19 : f32 to vector<1x8xf32>
    %35 = arith.maximumf %33, %34 : vector<1x8xf32>
    %cst_20 = arith.constant 9.99999974E-6 : f32
    %36 = vector.broadcast %cst_20 : f32 to vector<1x8xf32>
    %37 = arith.addf %35, %36 : vector<1x8xf32>
    %38 = math.rsqrt %37 : vector<1x8xf32>
    %cst_21 = arith.constant dense<0.000000e+00> : vector<1x256xf32>
    %39 = tpu.matmul %28, %25, %cst_21 {dimension_numbers = #tpu.dot_dimension_numbers<[1], [0], [0], [1], [0, 0, 1, 1], [], []>} : vector<1x8xf32>, vector<8x256xf32>, vector<1x256xf32> -> vector<1x256xf32>
    %cst_22 = arith.constant dense<0.000000e+00> : vector<1x256xf32>
    %40 = tpu.matmul %38, %25, %cst_22 {dimension_numbers = #tpu.dot_dimension_numbers<[1], [0], [0], [1], [0, 0, 1, 1], [], []>} : vector<1x8xf32>, vector<8x256xf32>, vector<1x256xf32> -> vector<1x256xf32>
    %41 = arith.mulf %16, %40 : vector<1x256xf32>
    %42 = arith.mulf %39, %41 : vector<1x256xf32>
    %43 = arith.subf %17, %42 : vector<1x256xf32>
    %44 = vector.shape_cast %41 : vector<1x256xf32> to vector<1x1x256xf32>
    %45 = vector.broadcast %44 : vector<1x1x256xf32> to vector<1x16x256xf32>
    %46 = arith.mulf %20, %45 : vector<1x16x256xf32>
    %47 = vector.shape_cast %43 : vector<1x256xf32> to vector<1x1x256xf32>
    %48 = vector.broadcast %47 : vector<1x1x256xf32> to vector<1x16x256xf32>
    %49 = arith.addf %46, %48 : vector<1x16x256xf32>
    %50 = arith.negf %49 : vector<1x16x256xf32>
    %51 = math.exp %50 : vector<1x16x256xf32>
    %cst_23 = arith.constant 1.000000e+00 : f32
    %52 = vector.broadcast %cst_23 : f32 to vector<1x16x256xf32>
    %53 = arith.addf %52, %51 : vector<1x16x256xf32>
    %54 = arith.divf %52, %53 : vector<1x16x256xf32>
    %55 = arith.mulf %49, %54 : vector<1x16x256xf32>
    %c0_24 = arith.constant 0 : index
    %c0_25 = arith.constant 0 : index
    %c0_26 = arith.constant 0 : index
    %56 = vector.load %arg6[%c0_24, %c0_25, %c0_26] : memref<1x16x256xf32, #tpu.memory_space<vmem>>, vector<1x16x256xf32>
    tpu.vector_store %arg6[%c0_24, %c0_25, %c0_26], %55 {strides = array<i32>} : memref<1x16x256xf32, #tpu.memory_space<vmem>>, vector<1x16x256xf32>,
    return
  }
  func.func @transform_0(%arg0: i32) -> (i32, i32, i32, i32) {
    %c0_i32 = arith.constant 0 : i32
    %c0_i32_0 = arith.constant 0 : i32
    %c0_i32_1 = arith.constant 0 : i32
    %c0_i32_2 = arith.constant 0 : i32
    return %arg0, %c0_i32, %c0_i32_0, %c0_i32_1 : i32, i32, i32, i32
  }
  func.func @transform_1(%arg0: i32) -> (i32, i32) {
    %c0_i32 = arith.constant 0 : i32
    %c0_i32_0 = arith.constant 0 : i32
    %c0_i32_1 = arith.constant 0 : i32
    return %c0_i32, %c0_i32_0 : i32, i32
  }
  func.func @transform_2(%arg0: i32) -> (i32, i32) {
    %c0_i32 = arith.constant 0 : i32
    %c0_i32_0 = arith.constant 0 : i32
    %c0_i32_1 = arith.constant 0 : i32
    return %c0_i32, %c0_i32_0 : i32, i32
  }
  func.func @transform_3(%arg0: i32) -> (i32, i32) {
    %c0_i32 = arith.constant 0 : i32
    %c0_i32_0 = arith.constant 0 : i32
    %c0_i32_1 = arith.constant 0 : i32
    return %c0_i32, %c0_i32_0 : i32, i32
  }
  func.func @transform_4(%arg0: i32) -> (i32, i32) {
    %c0_i32 = arith.constant 0 : i32
    %c0_i32_0 = arith.constant 0 : i32
    %c0_i32_1 = arith.constant 0 : i32
    return %c0_i32, %c0_i32_0 : i32, i32
  }
  func.func @transform_5(%arg0: i32) -> (i32, i32, i32) {
    %c0_i32 = arith.constant 0 : i32
    %c0_i32_0 = arith.constant 0 : i32
    %c0_i32_1 = arith.constant 0 : i32
    return %arg0, %c0_i32, %c0_i32_0 : i32, i32, i32
  }
}

</mosaic_0001>

<bundles_post_ra>
// kernel: tile.26
= control target key start
LH: loop header
LB: loop body
LE: loop exit
PB: predicated region body
PF: predicated region fallthrough
CT: control target
= control target key end

     0   :  { %s28_s0 = inlined_call_operand.vmem [shape: f32[16], index: 0, kind: input, shape index: {}]   ;;  %s29_s1 = inlined_call_operand.vmem [shape: f32[16,16], index: 1, kind: output, shape index: {}]  }
   0x1   :  { %v4_v0 = vld [vmem:[%s28_s0] ss:$0 sm:$0xff] }
   0x2   :  { %5 = vst [vmem:[%s29_s1] sm:$0xff] %v4_v0 }
   0x3   :  { %8 = vst [vmem:[%s29_s1 + $0x8] sm:$0xff] %v4_v0 }

// kernel: tile.29
= control target key start
LH: loop header
LB: loop body
LE: loop exit
PB: predicated region body
PF: predicated region fallthrough
CT: control target
= control target key end

     0   :  { %s7_s6 = smov 3  ;;  %s21_s9 = smov 3  ;;  %vm4_vm0 = vcmask 130048   ;;  %vm11_vm1 = vcmask 1048448   ;;  %vm18_vm2 = vcmask 917248   ;;  %vm25_vm3 = vcmask 786048   ;;  %s129_s0 = inlined_call_operand.vmem [shape: f32[16,16], index: 0, kind: input, shape index: {}]   ;;  %s130_s1 = inlined_call_operand.vmem [shape: f32[1,256], index: 1, kind: output, shape index: {}]  }
   0x1   :  { %v67_v0 = vld [vmem:[%s129_s0 + $0x7] ss:$8 sm:%s7_s6]   ;;  %s82_s10 = smov 112   ;;  %v69_v1 = vld [vmem:[%s129_s0 + $0x5] ss:$8 sm:%s21_s9]   ;;  %s83_s13 = smov 80  }
   0x2   :  { %9 = vrot.lane.b32.xlu0 %v67_v0, %s82_s10  ;;  %23 = vrot.lane.b32.xlu1 %v69_v1, %s83_s13  ;;  %s14_s14 = smov 3  ;;  %s28_s15 = smov 3  ;;  %vm32_vm4 = vcmask 654848   ;;  %vm39_vm5 = vcmask 523648   ;;  %vm46_vm6 = vcmask 392448   ;;  %vm53_vm7 = vcmask 261248  }
   0x3   :  { %s35_s16 = smov 3  ;;  %v68_v3 = vld [vmem:[%s129_s0 + $0x6] ss:$8 sm:%s14_s14]   ;;  %s84_s21 = smov 48   ;;  %v70_v4 = vld [vmem:[%s129_s0 + $0x4] ss:$8 sm:%s28_s15]  }
   0x4   :  { %v71_v2 = vld [vmem:[%s129_s0 + $0x3] ss:$8 sm:%s35_s16]   ;;  %s42_s24 = smov 3  ;;  %s85_s25 = smov 96  }
   0x5   :  { %37 = vrot.lane.b32.xlu2 %v71_v2, %s84_s21  ;;  %s86_s26 = smov 64   ;;  %s49_s27 = smov 3  ;;  %v72_v5 = vld [vmem:[%s129_s0 + $0x2] ss:$8 sm:%s42_s24]  }
   0x6   :  { %v73_v6 = vld [vmem:[%s129_s0 + $0x1] ss:$8 sm:%s49_s27]   ;;  %s87_s3 = smov 32   ;;  %s88_s4 = smov 16  }
   0x7   :  { %s2_s5 = smov 3 }
   0x8   :  { %v3_v7 = vld [vmem:[%s129_s0] ss:$8 sm:%s2_s5]  }
   0x9   :  { %5 = vst.msk [vmem:[#allocation0] ss:$8 sm:$0x3] %vm4_vm0, %v3_v7  }
   0xa   :  { %16 = vrot.lane.b32.xlu0 %v68_v3, %s85_s25  ;;  %30 = vrot.lane.b32.xlu1 %v70_v4, %s86_s26 }
   0xd   :  { %44 = vrot.lane.b32.xlu2 %v72_v5, %s87_s3 }
  0x12   :  { %51 = vrot.lane.b32.xlu0 %v73_v6, %s88_s4 }
  0x5f   :  { %v38_v8 = vpop.permute.xlu2 %37  }
  0x67   :  { %v45_v9 = vpop.permute.xlu2 %44  }
  0x74   :  { %v10_v10 = vpop.permute.xlu0 %9   ;;  %v24_v11 = vpop.permute.xlu1 %23  }
  0x75   :  { %12 = vst.msk [vmem:[#allocation0] ss:$8 sm:$0x3] %vm11_vm1, %v10_v10  }
  0x7c   :  { %v17_v12 = vpop.permute.xlu0 %16   ;;  %v31_v13 = vpop.permute.xlu1 %30  }
  0x7d   :  { %19 = vst.msk [vmem:[#allocation0] ss:$8 sm:$0x3] %vm18_vm2, %v17_v12  }
  0x7e   :  { %26 = vst.msk [vmem:[#allocation0] ss:$8 sm:$0x3] %vm25_vm3, %v24_v11  }
  0x7f   :  { %33 = vst.msk [vmem:[#allocation0] ss:$8 sm:$0x3] %vm32_vm4, %v31_v13  }
  0x80   :  { %40 = vst.msk [vmem:[#allocation0] ss:$8 sm:$0x3] %vm39_vm5, %v38_v8  }
  0x81   :  { %47 = vst.msk [vmem:[#allocation0] ss:$8 sm:$0x3] %vm46_vm6, %v45_v9  }
  0x84   :  { %v52_v14 = vpop.permute.xlu0 %51  }
  0x85   :  { %54 = vst.msk [vmem:[#allocation0] ss:$8 sm:$0x3] %vm53_vm7, %v52_v14  }
  0x8c   :  { %v57_v15 = vld [vmem:[#allocation0] sm:$0x1]  ;;  %v62_v16 = vld [vmem:[#allocation0 + $0x8] sm:$0x1] }
  0x8d   :  { %60 = vst [vmem:[%s130_s1] sm:$0x1] %v57_v15 }
  0x8e   :  { %74 = vst [vmem:[%s130_s1 + $0x1] sm:$0x1] %v62_v16 }

// kernel: conv_block_forward.1
= control target key start
LH: loop header
LB: loop body
LE: loop exit
PB: predicated region body
PF: predicated region fallthrough
CT: control target
= control target key end

     0   :  { %s4574_s18 = smov 0   ;;  %s7788_s0 = inlined_call_operand.vmem [shape: f32[2,18,18,4], index: 0, kind: input, shape index: {}]   ;;  %s7789_s1 = inlined_call_operand.vmem [shape: f32[12,48], index: 1, kind: input, shape index: {}]   ;;  %s7790_s2 = inlined_call_operand.vmem [shape: f32[3,256], index: 2, kind: input, shape index: {}]   ;;  %s7791_s3 = inlined_call_operand.vmem [shape: f32[256,8], index: 3, kind: input, shape index: {}]   ;;  %s7792_s4 = inlined_call_operand.vmem [shape: f32[8,256], index: 4, kind: input, shape index: {}]   ;;  %s7793_s5 = inlined_call_operand.vmem [shape: f32[2,16,256], index: 5, kind: output, shape index: {}]  }
   0x1 LB: > { %s4398_s19 = sadd.s32 4294967295, %s4531_s18   ;;  %p4402_p0 = scmp.ge.s32.totalorder %s4531_s18, 1  ;;  %s4531_s18 = sphi %s4574_s18, %s15_s18  }
   0x2   : > { %p187_p1 = scmp.lt.s32.totalorder %s4531_s18, 3 }
   0x4   : > { %p188_p2 = pnand %p4402_p0, %p187_p1 }
   0x6   : > { %191 = sbr.rel (%p188_p2) target bundleno = 1729 (0x6c1), region = 40 }
   0xb   : > { %p215_p3 = scmp.lt.s32.totalorder %s4398_s19, 1  ;;  %s4533_s24 = smov 4   ;;  %vm1122_vm0 = vcmask 1043456   ;;  %vm618_vm1 = vcmask 31744   ;;  %vm667_vm2 = vcmask 64512   ;;  %vm1049_vm3 = vcmask 97280  }
   0xc   : > { %s4534_s25 = smov 8   ;;  %vm1491_vm4 = vcmask 1040384   ;;  %vm1492_vm5 = vcmask 1042434   ;;  %vm1494_vm6 = vcmask 1044484   ;;  %vm1496_vm8 = vcmask 1046534   ;;  %s4535_s30 = smov 112  }
   0xd   : > { %s8510_s19 = smov (!%p215_p3, %s4398_s19), 1  ;;  %vm1493_vm7 = vmor %vm1491_vm4, %vm1492_vm5  ;;  %s4536_s6 = smov 96   ;;  %vm2923_vm11 = vcmask 1047556   ;;  %vm3923_vm12 = vcmask 130048   ;;  %vm3926_vm13 = vcmask 261120   ;;  %vm3929_vm14 = vcmask 392192  }
   0xe   : > { %s4478_s20 = smul.u32 432, %s8510_s19  ;;  %vm1495_vm9 = vmor %vm1493_vm7, %vm1494_vm6  ;;  %s4538_s7 = smov 16   ;;  %vm3932_vm15 = vcmask 523264  }
   0xf   : > { %vm5244_vm10 = vmor %vm1495_vm9, %vm1496_vm8  ;;  %s4539_s8 = smov 32   ;;  %s4540_s9 = smov 48  }
  0x10   : > { %s4588_s23 = scalar_lea.vmem %s7788_s0, %s4478_s20  ;;  %s4541_s10 = smov 64  }
  0x11   : > { %v4591_v0 = vld [vmem:[%s4588_s23 + $0x38] sm:$0xff]  ;;  %v4594_v1 = vld [vmem:[%s4588_s23 + $0x28] sm:$0x3]  ;;  %v4606_v3 = vld [vmem:[%s4588_s23 + $0x40] sm:$0x3]  ;;  %s4542_s11 = smov 80  }
  0x12   : > { %v4597_v2 = vld [vmem:[%s4588_s23 + $0x18] sm:$0xff]  ;;  %335 = vrot.lane.b32.xlu2 %v4591_v0, %s4533_s24  ;;  %331 = vrot.lane.b32.xlu1 %v4594_v1, %s4533_s24  ;;  %v4609_v4 = vld [vmem:[%s4588_s23 + $0x30] sm:$0xff]  ;;  %s4471_s17 = sshll.u32 %s8510_s19, 5 }
  0x13   : > { %327 = vrot.lane.b32.xlu0 %v4597_v2, %s4533_s24  ;;  %v4612_v5 = vld [vmem:[%s4588_s23 + $0x20] sm:$0xff]  ;;  %v4621_v6 = vld [vmem:[%s4588_s23 + $0x58] sm:$0x3]  ;;  %v4624_v7 = vld [vmem:[%s4588_s23 + $0x50] sm:$0xff]  ;;  %s224_s21 = scalar_lea.vmem %s7793_s5, %s4471_s17 }
  0x14   : > { %v4627_v8 = vld [vmem:[%s4588_s23 + $0x48] sm:$0xff]  ;;  %v4636_v9 = vld [vmem:[%s4588_s23 + $0x70] sm:$0x3]  ;;  %v4642_v11 = vld [vmem:[%s4588_s23 + $0x60] sm:$0xff] }
  0x15   : > { %7990 = vst [vmem:[#allocation2_spill] sm:$0xff] %v4636_v9  ;;  %v4639_v10 = vld [vmem:[%s4588_s23 + $0x68] sm:$0xff]  ;;  %v4654_v13 = vld [vmem:[%s4588_s23 + $0x80] sm:$0xff]  ;;  %v4657_v14 = vld [vmem:[%s4588_s23 + $0x78] sm:$0xff] }
  0x16   : > { %v4651_v12 = vld [vmem:[%s4588_s23 + $0x88] sm:$0x3]  ;;  %7992 = vst [vmem:[#allocation4_spill] sm:$0xff] %v4654_v13  ;;  %v4666_v15 = vld [vmem:[%s4588_s23 + $0xa0] sm:$0x3]  ;;  %v4669_v16 = vld [vmem:[%s4588_s23 + $0x98] sm:$0xff] }
  0x17   : > { %7991 = vst [vmem:[#allocation3_spill] sm:$0xff] %v4651_v12  ;;  %v4672_v17 = vld [vmem:[%s4588_s23 + $0x90] sm:$0xff]  ;;  %v4681_v18 = vld [vmem:[%s4588_s23 + $0xb8] sm:$0x3]  ;;  %v4687_v20 = vld [vmem:[%s4588_s23 + $0xa8] sm:$0xff] }
  0x18   : > { %7993 = vst [vmem:[#allocation5_spill] sm:$0xff] %v4657_v14  ;;  %v4684_v19 = vld [vmem:[%s4588_s23 + $0xb0] sm:$0xff]  ;;  %v4699_v22 = vld [vmem:[%s4588_s23 + $0xc8] sm:$0xff]  ;;  %v4702_v23 = vld [vmem:[%s4588_s23 + $0xc0] sm:$0xff] }
  0x19   : > { %7994 = vst [vmem:[#allocation6_spill] sm:$0xff] %v4666_v15  ;;  %v4696_v21 = vld [vmem:[%s4588_s23 + $0xd0] sm:$0x3]  ;;  %v4711_v24 = vld [vmem:[%s4588_s23 + $0xe8] sm:$0x3]  ;;  %v4714_v25 = vld [vmem:[%s4588_s23 + $0xe0] sm:$0xff] }
  0x1a   : > { %337 = vrot.lane.b32.xlu2 %v4606_v3, %s4533_s24  ;;  %333 = vrot.lane.b32.xlu1 %v4609_v4, %s4533_s24  ;;  %7995 = vst [vmem:[#allocation7_spill] sm:$0xff] %v4669_v16  ;;  %v4717_v26 = vld [vmem:[%s4588_s23 + $0xd8] sm:$0xff]  ;;  %v4726_v27 = vld [vmem:[%s4588_s23 + $0x100] sm:$0x3] }
  0x1b   : > { %329 = vrot.lane.b32.xlu0 %v4612_v5, %s4533_s24  ;;  %7996 = vst [vmem:[#allocation8_spill] sm:$0xff] %v4681_v18  ;;  %v4729_v28 = vld [vmem:[%s4588_s23 + $0xf8] sm:$0xff]  ;;  %v4732_v29 = vld [vmem:[%s4588_s23 + $0xf0] sm:$0xff]  ;;  %v4747_v32 = vld [vmem:[%s4588_s23 + $0x108] sm:$0xff] }
  0x1c   : > { %7997 = vst [vmem:[#allocation9_spill] sm:$0xff] %v4696_v21  ;;  %v4741_v30 = vld [vmem:[%s4588_s23 + $0x118] sm:$0x3]  ;;  %v4744_v31 = vld [vmem:[%s4588_s23 + $0x110] sm:$0xff]  ;;  %v4759_v34 = vld [vmem:[%s4588_s23 + $0x128] sm:$0xff] }
  0x1d   : > { %7998 = vst [vmem:[#allocation10_spill] sm:$0xff] %v4699_v22  ;;  %v4756_v33 = vld [vmem:[%s4588_s23 + $0x130] sm:$0x3]  ;;  %v4762_v35 = vld [vmem:[%s4588_s23 + $0x120] sm:$0xff]  ;;  %v4771_v36 = vld [vmem:[%s4588_s23 + $0x148] sm:$0x3] }
  0x1e   : > { %7999 = vst [vmem:[#allocation11_spill] sm:$0xff] %v4711_v24  ;;  %v4774_v37 = vld [vmem:[%s4588_s23 + $0x140] sm:$0xff]  ;;  %v4777_v38 = vld [vmem:[%s4588_s23 + $0x138] sm:$0xff]  ;;  %v4794_v42 = vld [vmem:[%s4588_s23 + $0x150] sm:$0xff] }
  0x1f   : > { %8000 = vst [vmem:[#allocation12_spill] sm:$0xff] %v4714_v25  ;;  %v4788_v40 = vld [vmem:[%s4588_s23 + $0x160] sm:$0x3]  ;;  %v4791_v41 = vld [vmem:[%s4588_s23 + $0x158] sm:$0xff]  ;;  %v4808_v45 = vld [vmem:[%s4588_s23 + $0x170] sm:$0xff] }
  0x20   : > { %8001 = vst [vmem:[#allocation13_spill] sm:$0xff] %v4726_v27  ;;  %v4805_v44 = vld [vmem:[%s4588_s23 + $0x178] sm:$0x3]  ;;  %v4811_v46 = vld [vmem:[%s4588_s23 + $0x168] sm:$0xff]  ;;  %v4826_v50 = vld [vmem:[%s4588_s23 + $0x190] sm:$0x3] }
  0x21   : > { %8002 = vst [vmem:[#allocation14_spill] sm:$0xff] %v4729_v28  ;;  %v4829_v51 = vld [vmem:[%s4588_s23 + $0x188] sm:$0xff]  ;;  %v4832_v52 = vld [vmem:[%s4588_s23 + $0x180] sm:$0xff] }
  0x22   : > { %343 = vrot.lane.b32.xlu2 %v4621_v6, %s4533_s24  ;;  %341 = vrot.lane.b32.xlu1 %v4624_v7, %s4533_s24  ;;  %8003 = vst [vmem:[#allocation15_spill] sm:$0xff] %v4732_v29 }
  0x23   : > { %339 = vrot.lane.b32.xlu0 %v4627_v8, %s4533_s24  ;;  %8004 = vst [vmem:[#allocation16_spill] sm:$0xff] %v4741_v30 }
  0x24   : > { %8005 = vst [vmem:[#allocation17_spill] sm:$0xff] %v4744_v31 }
  0x25   : > { %8006 = vst [vmem:[#allocation18_spill] sm:$0xff] %v4747_v32 }
  0x26   : > { %8007 = vst [vmem:[#allocation19_spill] sm:$0xff] %v4756_v33 }
  0x27   : > { %8008 = vst [vmem:[#allocation20_spill] sm:$0xff] %v4759_v34 }
  0x28   : > { %8009 = vst [vmem:[#allocation21_spill] sm:$0xff] %v4774_v37 }
  0x29   : > { %8010 = vst [vmem:[#allocation22_spill] sm:$0xff] %v4777_v38 }
  0x2a   : > { %349 = vrot.lane.b32.xlu2 %v4636_v9, %s4533_s24  ;;  %347 = vrot.lane.b32.xlu1 %v4639_v10, %s4533_s24 }
  0x2b   : > { %345 = vrot.lane.b32.xlu0 %v4642_v11, %s4533_s24 }
  0x32   : > { %355 = vrot.lane.b32.xlu2 %v4651_v12, %s4533_s24  ;;  %353 = vrot.lane.b32.xlu1 %v4654_v13, %s4533_s24 }
  0x33   : > { %351 = vrot.lane.b32.xlu0 %v4657_v14, %s4533_s24 }
  0x3a   : > { %361 = vrot.lane.b32.xlu2 %v4666_v15, %s4533_s24  ;;  %359 = vrot.lane.b32.xlu1 %v4669_v16, %s4533_s24 }
  0x3b   : > { %357 = vrot.lane.b32.xlu0 %v4672_v17, %s4533_s24 }
  0x42   : > { %367 = vrot.lane.b32.xlu2 %v4681_v18, %s4533_s24  ;;  %365 = vrot.lane.b32.xlu1 %v4684_v19, %s4533_s24 }
  0x43   : > { %363 = vrot.lane.b32.xlu0 %v4687_v20, %s4533_s24 }
  0x4a   : > { %373 = vrot.lane.b32.xlu2 %v4696_v21, %s4533_s24  ;;  %371 = vrot.lane.b32.xlu1 %v4699_v22, %s4533_s24 }
  0x4b   : > { %369 = vrot.lane.b32.xlu0 %v4702_v23, %s4533_s24 }
  0x52   : > { %379 = vrot.lane.b32.xlu2 %v4711_v24, %s4533_s24  ;;  %377 = vrot.lane.b32.xlu1 %v4714_v25, %s4533_s24 }
  0x53   : > { %375 = vrot.lane.b32.xlu0 %v4717_v26, %s4533_s24 }
  0x5a   : > { %385 = vrot.lane.b32.xlu2 %v4726_v27, %s4533_s24  ;;  %383 = vrot.lane.b32.xlu1 %v4729_v28, %s4533_s24 }
  0x5b   : > { %381 = vrot.lane.b32.xlu0 %v4732_v29, %s4533_s24 }
  0x62   : > { %391 = vrot.lane.b32.xlu2 %v4741_v30, %s4533_s24  ;;  %389 = vrot.lane.b32.xlu1 %v4744_v31, %s4533_s24 }
  0x63   : > { %387 = vrot.lane.b32.xlu0 %v4747_v32, %s4533_s24 }
  0x6a   : > { %397 = vrot.lane.b32.xlu2 %v4756_v33, %s4533_s24  ;;  %395 = vrot.lane.b32.xlu1 %v4759_v34, %s4533_s24 }
  0x6b   : > { %393 = vrot.lane.b32.xlu0 %v4762_v35, %s4533_s24 }
  0x6c   : > { %v4779_v39 = vpop.permute.xlu2 %335 }
  0x72   : > { %403 = vrot.lane.b32.xlu2 %v4771_v36, %s4533_s24  ;;  %401 = vrot.lane.b32.xlu1 %v4774_v37, %s4533_s24 }
  0x73   : > { %399 = vrot.lane.b32.xlu0 %v4777_v38, %s4533_s24 }
  0x74   : > { %v4800_v43 = vpop.permute.xlu2 %337 }
  0x7a   : > { %409 = vrot.lane.b32.xlu2 %v4788_v40, %s4533_s24  ;;  %407 = vrot.lane.b32.xlu1 %v4791_v41, %s4533_s24 }
  0x7b   : > { %405 = vrot.lane.b32.xlu0 %v4794_v42, %s4533_s24 }
  0x7c   : > { %v4821_v48 = vpop.permute.xlu2 %343 }
  0x82   : > { %415 = vrot.lane.b32.xlu2 %v4805_v44, %s4533_s24  ;;  %413 = vrot.lane.b32.xlu1 %v4808_v45, %s4533_s24 }
  0x83   : > { %411 = vrot.lane.b32.xlu0 %v4811_v46, %s4533_s24 }
  0x84   : > { %v4819_v47 = vpop.permute.xlu1 %331  ;;  %v4844_v55 = vpop.permute.xlu2 %349 }
  0x85   : > { %v4823_v49 = vpop.permute.xlu0 %327 }
  0x8a   : > { %421 = vrot.lane.b32.xlu2 %v4826_v50, %s4533_s24  ;;  %419 = vrot.lane.b32.xlu1 %v4829_v51, %s4533_s24 }
  0x8b   : > { %417 = vrot.lane.b32.xlu0 %v4832_v52, %s4533_s24 }
  0x8c   : > { %v4840_v53 = vpop.permute.xlu1 %333  ;;  %v4856_v58 = vpop.permute.xlu2 %355 }
  0x8d   : > { %v4842_v54 = vpop.permute.xlu0 %329  ;;  %8011 = vst [vmem:[#allocation23_spill] sm:$0xff] %v4856_v58 }
  0x92   : > { %478 = vrot.lane.b32.xlu2 %v4606_v3, %s4534_s25  ;;  %476 = vrot.lane.b32.xlu1 %v4591_v0, %s4534_s25 }
  0x93   : > { %474 = vrot.lane.b32.xlu0 %v4609_v4, %s4534_s25 }
  0x94   : > { %v4852_v56 = vpop.permute.xlu1 %341  ;;  %v4872_v61 = vpop.permute.xlu2 %361 }
  0x95   : > { %v4854_v57 = vpop.permute.xlu0 %339  ;;  %8012 = vst [vmem:[#allocation24_spill] sm:$0xff] %v4872_v61 }
  0x9a   : > { %484 = vrot.lane.b32.xlu2 %v4621_v6, %s4534_s25  ;;  %482 = vrot.lane.b32.xlu1 %v4624_v7, %s4534_s25 }
  0x9b   : > { %480 = vrot.lane.b32.xlu0 %v4627_v8, %s4534_s25 }
  0x9c   : > { %v4864_v59 = vpop.permute.xlu1 %347  ;;  %v4888_v58 = vpop.permute.xlu2 %367 }
  0x9d   : > { %v4866_v60 = vpop.permute.xlu0 %345  ;;  %8013 = vst [vmem:[#allocation25_spill] sm:$0xff] %v4888_v58 }
  0xa2   : > { %490 = vrot.lane.b32.xlu2 %v4636_v9, %s4534_s25  ;;  %488 = vrot.lane.b32.xlu1 %v4639_v10, %s4534_s25 }
  0xa3   : > { %486 = vrot.lane.b32.xlu0 %v4642_v11, %s4534_s25 }
  0xa4   : > { %v4876_v62 = vpop.permute.xlu1 %353 }
  0xa5   : > { %v4878_v63 = vpop.permute.xlu0 %351 }
  0xaa   : > { %496 = vrot.lane.b32.xlu2 %v4651_v12, %s4534_s25  ;;  %494 = vrot.lane.b32.xlu1 %v4654_v13, %s4534_s25 }
  0xab   : > { %492 = vrot.lane.b32.xlu0 %v4657_v14, %s4534_s25  ;;  %v4902_v14 = vpop.permute.xlu2 %373 }
  0xac   : > { %v4886_v9 = vpop.permute.xlu1 %359  ;;  %8014 = vst [vmem:[#allocation26_spill] sm:$0xff] %v4902_v14 }
  0xad   : > { %v4890_v61 = vpop.permute.xlu0 %357 }
  0xb2   : > { %502 = vrot.lane.b32.xlu2 %v4666_v15, %s4534_s25  ;;  %500 = vrot.lane.b32.xlu1 %v4669_v16, %s4534_s25 }
  0xb3   : > { %498 = vrot.lane.b32.xlu0 %v4672_v17, %s4534_s25  ;;  %v4914_v16 = vpop.permute.xlu2 %379 }
  0xb4   : > { %v4898_v12 = vpop.permute.xlu1 %365  ;;  %8015 = vst [vmem:[#allocation27_spill] sm:$0xff] %v4914_v16 }
  0xb5   : > { %v4900_v13 = vpop.permute.xlu0 %363 }
  0xba   : > { %508 = vrot.lane.b32.xlu2 %v4681_v18, %s4534_s25  ;;  %506 = vrot.lane.b32.xlu1 %v4684_v19, %s4534_s25 }
  0xbb   : > { %504 = vrot.lane.b32.xlu0 %v4687_v20, %s4534_s25  ;;  %v4930_v16 = vpop.permute.xlu2 %385 }
  0xbc   : > { %v4910_v15 = vpop.permute.xlu1 %371  ;;  %8016 = vst [vmem:[#allocation28_spill] sm:$0xff] %v4930_v16 }
  0xbd   : > { %v4912_v58 = vpop.permute.xlu0 %369 }
  0xc2   : > { %514 = vrot.lane.b32.xlu2 %v4696_v21, %s4534_s25  ;;  %512 = vrot.lane.b32.xlu1 %v4699_v22, %s4534_s25 }
  0xc3   : > { %510 = vrot.lane.b32.xlu0 %v4702_v23, %s4534_s25 }
  0xc4   : > { %v4922_v18 = vpop.permute.xlu1 %377 }
  0xc5   : > { %v4924_v14 = vpop.permute.xlu0 %375 }
  0xca   : > { %520 = vrot.lane.b32.xlu2 %v4711_v24, %s4534_s25  ;;  %518 = vrot.lane.b32.xlu1 %v4714_v25, %s4534_s25  ;;  %v4946_v25 = vpop.permute.xlu2 %391 }
  0xcb   : > { %516 = vrot.lane.b32.xlu0 %v4717_v26, %s4534_s25 }
  0xcc   : > { %v4934_v21 = vpop.permute.xlu1 %383 }
  0xcd   : > { %v4936_v22 = vpop.permute.xlu0 %381 }
  0xd2   : > { %526 = vrot.lane.b32.xlu2 %v4726_v27, %s4534_s25  ;;  %524 = vrot.lane.b32.xlu1 %v4729_v28, %s4534_s25 }
  0xd3   : > { %522 = vrot.lane.b32.xlu0 %v4732_v29, %s4534_s25  ;;  %v4960_v29 = vpop.permute.xlu2 %397 }
  0xd4   : > { %v4944_v24 = vpop.permute.xlu1 %389 }
  0xd5   : > { %v4948_v16 = vpop.permute.xlu0 %387 }
  0xda   : > { %532 = vrot.lane.b32.xlu2 %v4741_v30, %s4534_s25  ;;  %530 = vrot.lane.b32.xlu1 %v4744_v31, %s4534_s25 }
  0xdb   : > { %528 = vrot.lane.b32.xlu0 %v4747_v32, %s4534_s25  ;;  %v4972_v32 = vpop.permute.xlu2 %403 }
  0xdc   : > { %v4956_v27 = vpop.permute.xlu1 %395  ;;  %8017 = vst [vmem:[#allocation29_spill] sm:$0xff] %v4972_v32 }
  0xdd   : > { %v4958_v28 = vpop.permute.xlu0 %393 }
  0xe2   : > { %538 = vrot.lane.b32.xlu2 %v4756_v33, %s4534_s25  ;;  %536 = vrot.lane.b32.xlu1 %v4759_v34, %s4534_s25 }
  0xe3   : > { %534 = vrot.lane.b32.xlu0 %v4762_v35, %s4534_s25  ;;  %v4988_v32 = vpop.permute.xlu2 %409 }
  0xe4   : > { %v4968_v30 = vpop.permute.xlu1 %401  ;;  %8020 = vst [vmem:[#allocation32_spill] sm:$0xff] %v4988_v32  ;;  %v225_v32 = vld [vmem:[%s4588_s23] sm:$0xff] }
  0xe5   : > { %v4970_v31 = vpop.permute.xlu0 %399 }
  0xea   : > { %544 = vrot.lane.b32.xlu2 %v4771_v36, %s4534_s25  ;;  %542 = vrot.lane.b32.xlu1 %v4774_v37, %s4534_s25 }
  0xeb   : > { %540 = vrot.lane.b32.xlu0 %v4777_v38, %s4534_s25 }
  0xec   : > { %v4980_v33 = vpop.permute.xlu1 %407 }
  0xed   : > { %8018 = vst [vmem:[#allocation30_spill] sm:$0xff] %v4980_v33  ;;  %v4982_v34 = vpop.permute.xlu0 %405  ;;  %v861_v33 = vld [vmem:[%s7789_s1 + $0x8] sm:$0xf] }
  0xee   : > { %8019 = vst [vmem:[#allocation31_spill] sm:$0xff] %v4982_v34  ;;  %4406 = vmatpush.msk.msra.mxu0 %vm1122_vm0, %v861_v33  ;;  %4472 = vmatpush.msk.msra.mxu1 %vm1122_vm0, %v861_v33  ;;  %v276_v34 = vld [vmem:[%s4588_s23 + $0x198] sm:$0xff] }
  0xef   : > { %4473 = vmatpush.msk.msra.mxu2 %vm1122_vm0, %v861_v33  ;;  %4474 = vmatpush.msk.msra.mxu3 %vm1122_vm0, %v861_v33  ;;  %v226_v33 = vld [vmem:[%s4588_s23 + $0x8] sm:$0xff]  ;;  %vm3935_vm0 = vcmask 654336  }
  0xf2   : > { %550 = vrot.lane.b32.xlu2 %v4788_v40, %s4534_s25  ;;  %548 = vrot.lane.b32.xlu1 %v4791_v41, %s4534_s25  ;;  %v860_v40 = vld [vmem:[%s7789_s1] sm:$0xff] }
  0xf3   : > { %546 = vrot.lane.b32.xlu0 %v4794_v42, %s4534_s25  ;;  %1141 = vmatpush.msra.mxu0 %v860_v40  ;;  %v5010_v42 = vpop.permute.xlu2 %415 }
  0xf4   : > { %v4992_v36 = vpop.permute.xlu1 %413  ;;  %4475 = vmatpush.msra.mxu1 %v860_v40  ;;  %4476 = vmatpush.msra.mxu2 %v860_v40  ;;  %8024 = vst [vmem:[#allocation36_spill] sm:$0xff] %v5010_v42 }
  0xf5   : > { %8021 = vst [vmem:[#allocation33_spill] sm:$0xff] %v4992_v36  ;;  %v4994_v37 = vpop.permute.xlu0 %411  ;;  %4477 = vmatpush.msra.mxu3 %v860_v40 }
  0xf6   : > { %8022 = vst [vmem:[#allocation34_spill] sm:$0xff] %v4994_v37 }
  0xfa   : > { %556 = vrot.lane.b32.xlu2 %v4805_v44, %s4534_s25  ;;  %554 = vrot.lane.b32.xlu1 %v4808_v45, %s4534_s25  ;;  %v620_v44 = vsel %vm618_vm1, %v226_v33, %v4842_v54  ;;  %v278_v54 = vld [vmem:[%s4588_s23 + $0x1a8] sm:$0x3]  ;;  %v277_v33 = vld [vmem:[%s4588_s23 + $0x1a0] sm:$0xff] }
  0xfb   : > { %552 = vrot.lane.b32.xlu0 %v4811_v46, %s4534_s25  ;;  %v619_v46 = vsel %vm618_vm1, %v225_v32, %v4823_v49  ;;  %v623_v49 = vsel %vm618_vm1, %v4612_v5, %v4779_v39 }
  0xfc   : > { %v5008_v41 = vpop.permute.xlu1 %419 }
  0xfd   : > { %8023 = vst [vmem:[#allocation35_spill] sm:$0xff] %v5008_v41  ;;  %v5012_v36 = vpop.permute.xlu0 %417 }
  0xfe   : > { %8025 = vst [vmem:[#allocation37_spill] sm:$0xff] %v5012_v36 }
 0x102   : > { %562 = vrot.lane.b32.xlu2 %v4826_v50, %s4534_s25  ;;  %560 = vrot.lane.b32.xlu1 %v4829_v51, %s4534_s25 }
 0x103   : > { %558 = vrot.lane.b32.xlu0 %v4832_v52, %s4534_s25  ;;  %v5028_v52 = vpop.permute.xlu2 %421 }
 0x104   : > { %v477_v45 = vpop.permute.xlu1 %476 }
 0x105   : > { %v669_v40 = vsel %vm667_vm2, %v620_v44, %v477_v45  ;;  %v475_v50 = vpop.permute.xlu0 %474 }
 0x106   : > { %v767_v41 = vrot.slane %v669_v40, 2  ;;  %v768_v36 = vrot.slane %v669_v40, 4  ;;  %v769_v51 = vrot.slane %v669_v40, 6  ;;  %870 = vst [vmem:[#allocation1 + $0x20] ss:$4 sm:$0xff] %v669_v40  ;;  %v668_v42 = vsel %vm667_vm2, %v619_v46, %v475_v50 }
 0x107   : > { %v764_v37 = vrot.slane %v668_v42, 2  ;;  %862 = vst [vmem:[#allocation1] ss:$4 sm:$0xff] %v668_v42  ;;  %v765_v38 = vrot.slane %v668_v42, 4  ;;  %v766_v32 = vrot.slane %v668_v42, 6 }
 0x108   : > { %872 = vst [vmem:[#allocation1 + $0x21] ss:$4 sm:$0xff] %v767_v41  ;;  %v227_v46 = vld [vmem:[%s4588_s23 + $0x10] sm:$0x3] }
 0x109   : > { %874 = vst [vmem:[#allocation1 + $0x22] ss:$4 sm:$0xff] %v768_v36  ;;  %v622_v36 = vsel %vm618_vm1, %v4597_v2, %v4840_v53  ;;  %v621_v5 = vsel %vm618_vm1, %v227_v46, %v4819_v47  ;;  %v626_v47 = vsel %vm618_vm1, %v4591_v0, %v4852_v56 }
 0x10a   : > { %876 = vst [vmem:[#allocation1 + $0x23] ss:$4 sm:$0xff] %v769_v51  ;;  %568 = vrot.lane.b32.xlu2 %v278_v54, %s4534_s25  ;;  %566 = vrot.lane.b32.xlu1 %v277_v33, %s4534_s25 }
 0x10b   : > { %864 = vst [vmem:[#allocation1 + $0x1] ss:$4 sm:$0xff] %v764_v37  ;;  %564 = vrot.lane.b32.xlu0 %v276_v34, %s4534_s25  ;;  %v479_v34 = vpop.permute.xlu2 %478 }
 0x10c   : > { %866 = vst [vmem:[#allocation1 + $0x2] ss:$4 sm:$0xff] %v765_v38  ;;  %v483_v44 = vpop.permute.xlu1 %482  ;;  %v670_v39 = vsel %vm667_vm2, %v621_v5, %v479_v34 }
 0x10d   : > { %868 = vst [vmem:[#allocation1 + $0x3] ss:$4 sm:$0xff] %v766_v32  ;;  %v672_v41 = vsel %vm667_vm2, %v623_v49, %v483_v44  ;;  %v481_v45 = vpop.permute.xlu0 %480  ;;  %v625_v44 = vsel %vm618_vm1, %v4609_v4, %v4854_v57  ;;  %v628_v57 = vsel %vm618_vm1, %v4627_v8, %v4866_v60 }
 0x10e   : > { %v774_v42 = vrot.slane %v672_v41, 4  ;;  %v773_v40 = vrot.slane %v672_v41, 2  ;;  %v671_v37 = vsel %vm667_vm2, %v622_v36, %v481_v45  ;;  %v624_v45 = vsel %vm618_vm1, %v4594_v1, %v4800_v43 }
 0x10f   : > { %v770_v38 = vrot.slane %v671_v37, 2  ;;  %v771_v54 = vrot.slane %v671_v37, 4  ;;  %v772_v2 = vrot.slane %v671_v37, 6  ;;  %v775_v46 = vrot.slane %v672_v41, 6 }
 0x111   : > { %v878_v50 = vld.sshfl [vmem:[#allocation1 + $0x20] sm:$0xff pattern:$0x73625140] }
 0x112   : > { %884 = vst [vmem:[#allocation1 + $0x21] ss:$4 sm:$0xff] %v672_v41  ;;  %v627_v41 = vsel %vm618_vm1, %v4606_v3, %v4821_v48 }
 0x113   : > { %886 = vst [vmem:[#allocation1 + $0x23] ss:$4 sm:$0xff] %v774_v42  ;;  %v485_v32 = vpop.permute.xlu2 %484 }
 0x114   : > { %v877_v51 = vld.sshfl [vmem:[#allocation1] sm:$0xff pattern:$0x73625140]  ;;  %885 = vst [vmem:[#allocation1 + $0x22] ss:$4 sm:$0xff] %v773_v40  ;;  %v489_v53 = vpop.permute.xlu1 %488  ;;  %v673_v42 = vsel %vm667_vm2, %v624_v45, %v485_v32 }
 0x115   : > { %879 = vst [vmem:[#allocation1] ss:$4 sm:$0xff] %v670_v39  ;;  %4407 = vmatmul.msk.f32.vlgmr.msra.gmra.mxu0 %vm1049_vm3, %v877_v51  ;;  %v487_v33 = vpop.permute.xlu0 %486  ;;  %v675_v49 = vsel %vm667_vm2, %v626_v47, %v489_v53 }
 0x116   : > { %880 = vst [vmem:[#allocation1 + $0x1] ss:$4 sm:$0xff] %v671_v37  ;;  %v674_v36 = vsel %vm667_vm2, %v625_v44, %v487_v33  ;;  %v779_v56 = vrot.slane %v675_v49, 2 }
 0x117   : > { %881 = vst [vmem:[#allocation1 + $0x2] ss:$4 sm:$0xff] %v770_v38  ;;  %v776_v37 = vrot.slane %v674_v36, 2  ;;  %v777_v34 = vrot.slane %v674_v36, 4  ;;  %v778_v4 = vrot.slane %v674_v36, 6  ;;  %v780_v38 = vrot.slane %v675_v49, 4 }
 0x118   : > { %882 = vst [vmem:[#allocation1 + $0x3] ss:$4 sm:$0xff] %v771_v54  ;;  %v781_v54 = vrot.slane %v675_v49, 6 }
 0x119   : > { %883 = vst [vmem:[#allocation1 + $0x20] ss:$4 sm:$0xff] %v772_v2  ;;  %v629_v2 = vsel %vm618_vm1, %v4624_v7, %v4864_v59  ;;  %v631_v7 = vsel %vm618_vm1, %v4642_v11, %v4878_v63 }
 0x11b   : > { %v491_v43 = vpop.permute.xlu2 %490 }
 0x11c   : > { %v676_v5 = vsel %vm667_vm2, %v627_v41, %v491_v43  ;;  %v495_v51 = vpop.permute.xlu1 %494 }
 0x11d   : > { %4408 = vmatmul.msk.f32.gmra.mxu0 %vm1049_vm3, %v878_v50  ;;  %v493_v1 = vpop.permute.xlu0 %492  ;;  %v678_v3 = vsel %vm667_vm2, %v629_v2, %v495_v51  ;;  %v8029_v2 = vld [vmem:[#allocation4_spill] sm:$0xff] }
 0x11e   : > { %v677_v50 = vsel %vm667_vm2, %v628_v57, %v493_v1  ;;  %v785_v59 = vrot.slane %v678_v3, 2  ;;  %v787_v45 = vrot.slane %v678_v3, 6 }
 0x11f   : > { %v887_v0 = vld.sshfl [vmem:[#allocation1] sm:$0xff pattern:$0x73625140]  ;;  %v782_v60 = vrot.slane %v677_v50, 2  ;;  %v783_v48 = vrot.slane %v677_v50, 4  ;;  %v784_v53 = vrot.slane %v677_v50, 6 }
 0x120   : > { %890 = vst [vmem:[#allocation1 + $0x1] ss:$4 sm:$0xff] %v673_v42  ;;  %v888_v40 = vld.sshfl [vmem:[#allocation1 + $0x20] sm:$0xff pattern:$0x73625140] }
 0x121   : > { %889 = vst [vmem:[#allocation1] ss:$4 sm:$0xff] %v775_v46 }
 0x122   : > { %895 = vst [vmem:[#allocation1 + $0x22] ss:$4 sm:$0xff] %v675_v49  ;;  %v786_v49 = vrot.slane %v678_v3, 4 }
 0x123   : > { %896 = vst [vmem:[#allocation1 + $0x23] ss:$4 sm:$0xff] %v779_v56  ;;  %v497_v32 = vpop.permute.xlu2 %496 }
 0x124   : > { %891 = vst [vmem:[#allocation1 + $0x2] ss:$4 sm:$0xff] %v674_v36  ;;  %v630_v36 = vsel %vm618_vm1, %v4621_v6, %v4844_v55  ;;  %v501_v63 = vpop.permute.xlu1 %500 }
 0x125   : > { %892 = vst [vmem:[#allocation1 + $0x3] ss:$4 sm:$0xff] %v776_v37  ;;  %4409 = vmatmul.msk.f32.gmra.mxu0 %vm1049_vm3, %v887_v0  ;;  %v499_v47 = vpop.permute.xlu0 %498  ;;  %v679_v46 = vsel %vm667_vm2, %v630_v36, %v497_v32  ;;  %v8026_v37 = vld [vmem:[#allocation5_spill] sm:$0xff]  ;;  %v8030_v32 = vld [vmem:[#allocation24_spill] sm:$0xff] }
 0x126   : > { %893 = vst [vmem:[#allocation1 + $0x20] ss:$4 sm:$0xff] %v777_v34  ;;  %v680_v33 = vsel %vm667_vm2, %v631_v7, %v499_v47  ;;  %v634_v34 = vsel %vm618_vm1, %v8026_v37, %v4890_v61  ;;  %v8033_v37 = vld [vmem:[#allocation25_spill] sm:$0xff] }
 0x127   : > { %894 = vst [vmem:[#allocation1 + $0x21] ss:$4 sm:$0xff] %v778_v4  ;;  %v788_v42 = vrot.slane %v680_v33, 2  ;;  %v789_v56 = vrot.slane %v680_v33, 4  ;;  %v790_v11 = vrot.slane %v680_v33, 6 }
 0x12b   : > { %v503_v57 = vpop.permute.xlu2 %502 }
 0x12c   : > { %v897_v39 = vld.sshfl [vmem:[#allocation1] sm:$0xff pattern:$0x73625140] }
 0x12d   : > { %901 = vst [vmem:[#allocation1 + $0x2] ss:$4 sm:$0xff] %v676_v5  ;;  %4410 = vmatmul.msk.f32.gmra.mxu0 %vm1049_vm3, %v888_v40  ;;  %v632_v40 = vsel %vm618_vm1, %v4639_v10, %v4876_v62  ;;  %v505_v55 = vpop.permute.xlu0 %504  ;;  %v8027_v10 = vld [vmem:[#allocation23_spill] sm:$0xff]  ;;  %v8028_v62 = vld [vmem:[#allocation2_spill] sm:$0xff] }
 0x12e   : > { %v898_v8 = vld.sshfl [vmem:[#allocation1 + $0x20] sm:$0xff pattern:$0x73625140]  ;;  %899 = vst [vmem:[#allocation1] ss:$4 sm:$0xff] %v780_v38  ;;  %v681_v6 = vsel %vm667_vm2, %v632_v40, %v501_v63  ;;  %v683_v43 = vsel %vm667_vm2, %v634_v34, %v505_v55  ;;  %v633_v5 = vsel %vm618_vm1, %v8028_v62, %v8027_v10  ;;  %v8034_v34 = vld [vmem:[#allocation6_spill] sm:$0xff] }
 0x12f   : > { %900 = vst [vmem:[#allocation1 + $0x1] ss:$4 sm:$0xff] %v781_v54  ;;  %v791_v1 = vrot.slane %v681_v6, 2  ;;  %v792_v41 = vrot.slane %v681_v6, 4  ;;  %v794_v38 = vrot.slane %v683_v43, 2  ;;  %v795_v51 = vrot.slane %v683_v43, 4  ;;  %v507_v54 = vpop.permute.xlu1 %506 }
 0x130   : > { %906 = vst [vmem:[#allocation1 + $0x23] ss:$4 sm:$0xff] %v678_v3 }
 0x131   : > { %902 = vst [vmem:[#allocation1 + $0x3] ss:$4 sm:$0xff] %v677_v50  ;;  %v793_v50 = vrot.slane %v681_v6, 6 }
 0x132   : > { %903 = vst [vmem:[#allocation1 + $0x20] ss:$4 sm:$0xff] %v782_v60 }
 0x133   : > { %904 = vst [vmem:[#allocation1 + $0x21] ss:$4 sm:$0xff] %v783_v48  ;;  %v637_v48 = vsel %vm618_vm1, %v4672_v17, %v4900_v13  ;;  %v509_v7 = vpop.permute.xlu2 %508 }
 0x134   : > { %905 = vst [vmem:[#allocation1 + $0x22] ss:$4 sm:$0xff] %v784_v53 }
 0x135   : > { %4411 = vmatmul.msk.f32.gmra.mxu0 %vm1049_vm3, %v897_v39  ;;  %v682_v39 = vsel %vm667_vm2, %v633_v5, %v503_v57  ;;  %v511_v3 = vpop.permute.xlu0 %510  ;;  %v641_v5 = vsel %vm618_vm1, %v4684_v19, %v4910_v15  ;;  %v8035_v19 = vld [vmem:[#allocation26_spill] sm:$0xff] }
 0x137   : > { %v513_v17 = vpop.permute.xlu1 %512 }
 0x138   : > { %v907_v44 = vld.sshfl [vmem:[#allocation1] sm:$0xff pattern:$0x73625140] }
 0x139   : > { %909 = vst [vmem:[#allocation1] ss:$4 sm:$0xff] %v785_v59 }
 0x13a   : > { %910 = vst [vmem:[#allocation1 + $0x1] ss:$4 sm:$0xff] %v786_v49  ;;  %v8031_v49 = vld [vmem:[#allocation3_spill] sm:$0xff] }
 0x13b   : > { %v908_v0 = vld.sshfl [vmem:[#allocation1 + $0x20] sm:$0xff pattern:$0x73625140]  ;;  %911 = vst [vmem:[#allocation1 + $0x2] ss:$4 sm:$0xff] %v787_v45  ;;  %v515_v40 = vpop.permute.xlu2 %514 }
 0x13c   : > { %912 = vst [vmem:[#allocation1 + $0x3] ss:$4 sm:$0xff] %v679_v46  ;;  %v8032_v46 = vld [vmem:[#allocation7_spill] sm:$0xff] }
 0x13d   : > { %913 = vst [vmem:[#allocation1 + $0x20] ss:$4 sm:$0xff] %v680_v33  ;;  %4412 = vmatmul.msk.f32.gmra.mxu0 %vm1049_vm3, %v898_v8  ;;  %v635_v8 = vsel %vm618_vm1, %v8029_v2, %v4886_v9  ;;  %v686_v33 = vsel %vm667_vm2, %v637_v48, %v511_v3  ;;  %v796_v9 = vrot.slane %v683_v43, 6  ;;  %v517_v57 = vpop.permute.xlu0 %516  ;;  %v8036_v3 = vld [vmem:[#allocation8_spill] sm:$0xff] }
 0x13e   : > { %914 = vst [vmem:[#allocation1 + $0x21] ss:$4 sm:$0xff] %v788_v42  ;;  %v684_v60 = vsel %vm667_vm2, %v635_v8, %v507_v54  ;;  %v800_v13 = vrot.slane %v686_v33, 2  ;;  %v802_v55 = vrot.slane %v686_v33, 6  ;;  %v642_v48 = vsel %vm618_vm1, %v8036_v3, %v8035_v19 }
 0x13f   : > { %915 = vst [vmem:[#allocation1 + $0x22] ss:$4 sm:$0xff] %v789_v56  ;;  %v797_v47 = vrot.slane %v684_v60, 2  ;;  %v798_v59 = vrot.slane %v684_v60, 4  ;;  %v799_v45 = vrot.slane %v684_v60, 6  ;;  %v519_v62 = vpop.permute.xlu1 %518 }
 0x140   : > { %916 = vst [vmem:[#allocation1 + $0x23] ss:$4 sm:$0xff] %v790_v11 }
 0x143   : > { %v917_v4 = vld.sshfl [vmem:[#allocation1] sm:$0xff pattern:$0x73625140]  ;;  %v521_v54 = vpop.permute.xlu2 %520 }
 0x144   : > { %919 = vst [vmem:[#allocation1] ss:$4 sm:$0xff] %v681_v6  ;;  %v801_v6 = vrot.slane %v686_v33, 4 }
 0x145   : > { %920 = vst [vmem:[#allocation1 + $0x1] ss:$4 sm:$0xff] %v791_v1  ;;  %4413 = vmatmul.msk.f32.gmra.mxu0 %vm1049_vm3, %v907_v44  ;;  %v636_v44 = vsel %vm618_vm1, %v8031_v49, %v8030_v32  ;;  %v639_v1 = vsel %vm618_vm1, %v8034_v34, %v8033_v37  ;;  %v523_v15 = vpop.permute.xlu0 %522 }
 0x146   : > { %921 = vst [vmem:[#allocation1 + $0x2] ss:$4 sm:$0xff] %v792_v41  ;;  %v685_v36 = vsel %vm667_vm2, %v636_v44, %v509_v7 }
 0x147   : > { %922 = vst [vmem:[#allocation1 + $0x3] ss:$4 sm:$0xff] %v793_v50  ;;  %v918_v61 = vld.sshfl [vmem:[#allocation1 + $0x20] sm:$0xff pattern:$0x73625140]  ;;  %v640_v50 = vsel %vm618_vm1, %v4687_v20, %v4912_v58 }
 0x148   : > { %923 = vst [vmem:[#allocation1 + $0x20] ss:$4 sm:$0xff] %v682_v39  ;;  %v689_v10 = vsel %vm667_vm2, %v640_v50, %v517_v57  ;;  %v690_v39 = vsel %vm667_vm2, %v641_v5, %v519_v62 }
 0x149   : > { %924 = vst [vmem:[#allocation1 + $0x21] ss:$4 sm:$0xff] %v683_v43  ;;  %v808_v20 = vrot.slane %v689_v10, 6  ;;  %v809_v58 = vrot.slane %v690_v39, 2  ;;  %v810_v2 = vrot.slane %v690_v39, 4 }
 0x14a   : > { %925 = vst [vmem:[#allocation1 + $0x22] ss:$4 sm:$0xff] %v794_v38 }
 0x14b   : > { %926 = vst [vmem:[#allocation1 + $0x23] ss:$4 sm:$0xff] %v795_v51  ;;  %v807_v51 = vrot.slane %v689_v10, 4 }
 0x14d   : > { %4414 = vmatmul.msk.f32.gmra.mxu0 %vm1049_vm3, %v908_v0  ;;  %v638_v0 = vsel %vm618_vm1, %v8032_v46, %v4898_v12  ;;  %v688_v12 = vsel %vm667_vm2, %v639_v1, %v515_v40  ;;  %v527_v46 = vpop.permute.xlu2 %526  ;;  %v8039_v40 = vld [vmem:[#allocation9_spill] sm:$0xff] }
 0x14e   : > { %v927_v53 = vld.sshfl [vmem:[#allocation1] sm:$0xff pattern:$0x73625140]  ;;  %v687_v56 = vsel %vm667_vm2, %v638_v0, %v513_v17 }
 0x14f   : > { %930 = vst [vmem:[#allocation1 + $0x1] ss:$4 sm:$0xff] %v684_v60  ;;  %v803_v63 = vrot.slane %v687_v56, 2  ;;  %v804_v43 = vrot.slane %v687_v56, 4  ;;  %v805_v41 = vrot.slane %v687_v56, 6  ;;  %v811_v60 = vrot.slane %v690_v39, 6 }
 0x150   : > { %931 = vst [vmem:[#allocation1 + $0x2] ss:$4 sm:$0xff] %v797_v47  ;;  %v691_v47 = vsel %vm667_vm2, %v642_v48, %v521_v54 }
 0x151   : > { %932 = vst [vmem:[#allocation1 + $0x3] ss:$4 sm:$0xff] %v798_v59  ;;  %v525_v59 = vpop.permute.xlu1 %524 }
 0x152   : > { %v928_v42 = vld.sshfl [vmem:[#allocation1 + $0x20] sm:$0xff pattern:$0x73625140]  ;;  %929 = vst [vmem:[#allocation1] ss:$4 sm:$0xff] %v796_v9 }
 0x153   : > { %934 = vst [vmem:[#allocation1 + $0x21] ss:$4 sm:$0xff] %v685_v36 }
 0x154   : > { %933 = vst [vmem:[#allocation1 + $0x20] ss:$4 sm:$0xff] %v799_v45 }
 0x155   : > { %935 = vst [vmem:[#allocation1 + $0x22] ss:$4 sm:$0xff] %v686_v33  ;;  %4415 = vmatmul.msk.f32.gmra.mxu0 %vm1049_vm3, %v917_v4  ;;  %v8037_v33 = vld [vmem:[#allocation10_spill] sm:$0xff]  ;;  %v533_v50 = vpop.permute.xlu2 %532 }
 0x156   : > { %936 = vst [vmem:[#allocation1 + $0x23] ss:$4 sm:$0xff] %v800_v13  ;;  %v644_v9 = vsel %vm618_vm1, %v8037_v33, %v4922_v18  ;;  %v646_v18 = vsel %vm618_vm1, %v4717_v26, %v4936_v22 }
 0x157   : > { %v693_v44 = vsel %vm667_vm2, %v644_v9, %v525_v59 }
 0x158   : > { %v815_v36 = vrot.slane %v693_v44, 2  ;;  %v816_v13 = vrot.slane %v693_v44, 4  ;;  %v817_v17 = vrot.slane %v693_v44, 6 }
 0x159   : > { %v5117_v11 = vld.sshfl [vmem:[#allocation1] sm:$0xff pattern:$0x73625140]  ;;  %v531_v0 = vpop.permute.xlu1 %530 }
 0x15a   : > { %941 = vst [vmem:[#allocation1 + $0x2] ss:$4 sm:$0xff] %v687_v56 }
 0x15b   : > { %942 = vst [vmem:[#allocation1 + $0x3] ss:$4 sm:$0xff] %v803_v63  ;;  %v8038_v63 = vld [vmem:[#allocation27_spill] sm:$0xff] }
 0x15c   : > { %939 = vst [vmem:[#allocation1] ss:$4 sm:$0xff] %v801_v6  ;;  %v645_v6 = vsel %vm618_vm1, %v8039_v40, %v8038_v63 }
 0x15d   : > { %v5123_v4 = vld.sshfl [vmem:[#allocation1 + $0x20] sm:$0xff pattern:$0x73625140]  ;;  %940 = vst [vmem:[#allocation1 + $0x1] ss:$4 sm:$0xff] %v802_v55  ;;  %4416 = vmatmul.msk.f32.gmra.mxu0 %vm1049_vm3, %v918_v61  ;;  %v806_v61 = vrot.slane %v689_v10, 2 }
 0x15e   : > { %945 = vst [vmem:[#allocation1 + $0x22] ss:$4 sm:$0xff] %v688_v12  ;;  %v8040_v55 = vld [vmem:[#allocation12_spill] sm:$0xff] }
 0x15f   : > { %943 = vst [vmem:[#allocation1 + $0x20] ss:$4 sm:$0xff] %v804_v43  ;;  %v647_v37 = vsel %vm618_vm1, %v8040_v55, %v4934_v21 }
 0x160   : > { %944 = vst [vmem:[#allocation1 + $0x21] ss:$4 sm:$0xff] %v805_v41  ;;  %v696_v1 = vsel %vm667_vm2, %v647_v37, %v531_v0 }
 0x161   : > { %946 = vst [vmem:[#allocation1 + $0x23] ss:$4 sm:$0xff] %v689_v10  ;;  %v821_v43 = vrot.slane %v696_v1, 2  ;;  %v822_v57 = vrot.slane %v696_v1, 4  ;;  %v8041_v10 = vld [vmem:[#allocation15_spill] sm:$0xff]  ;;  %v537_v5 = vpop.permute.xlu1 %536  ;;  %v823_v54 = vrot.slane %v696_v1, 6 }
 0x162   : > { %v649_v62 = vsel %vm618_vm1, %v8041_v10, %v4948_v16 }
 0x164   : > { %v947_v38 = vld.sshfl [vmem:[#allocation1] sm:$0xff pattern:$0x73625140] }
 0x165   : > { %952 = vst [vmem:[#allocation1 + $0x3] ss:$4 sm:$0xff] %v690_v39  ;;  %4421 = vmatmul.msk.f32.vlgmr.msra.gmra.mxu1 %vm1049_vm3, %v947_v38  ;;  %4417 = vmatmul.msk.f32.gmra.mxu0 %vm1049_vm3, %v927_v53  ;;  %v643_v53 = vsel %vm618_vm1, %v4702_v23, %v4924_v14  ;;  %v8042_v38 = vld [vmem:[#allocation28_spill] sm:$0xff]  ;;  %v8043_v39 = vld [vmem:[#allocation11_spill] sm:$0xff] }
 0x166   : > { %949 = vst [vmem:[#allocation1] ss:$4 sm:$0xff] %v806_v61  ;;  %v692_v7 = vsel %vm667_vm2, %v643_v53, %v523_v15  ;;  %v8045_v53 = vld [vmem:[#allocation13_spill] sm:$0xff] }
 0x167   : > { %950 = vst [vmem:[#allocation1 + $0x1] ss:$4 sm:$0xff] %v807_v51  ;;  %v812_v49 = vrot.slane %v692_v7, 2  ;;  %v813_v14 = vrot.slane %v692_v7, 4  ;;  %v814_v23 = vrot.slane %v692_v7, 6  ;;  %v8044_v51 = vld [vmem:[#allocation14_spill] sm:$0xff] }
 0x168   : > { %v948_v8 = vld.sshfl [vmem:[#allocation1 + $0x20] sm:$0xff pattern:$0x73625140]  ;;  %951 = vst [vmem:[#allocation1 + $0x2] ss:$4 sm:$0xff] %v808_v20  ;;  %v650_v20 = vsel %vm618_vm1, %v8044_v51, %v4944_v24  ;;  %v539_v24 = vpop.permute.xlu2 %538 }
 0x169   : > { %953 = vst [vmem:[#allocation1 + $0x20] ss:$4 sm:$0xff] %v809_v58  ;;  %v699_v16 = vsel %vm667_vm2, %v650_v20, %v537_v5 }
 0x16a   : > { %954 = vst [vmem:[#allocation1 + $0x21] ss:$4 sm:$0xff] %v810_v2  ;;  %v827_v15 = vrot.slane %v699_v16, 2  ;;  %v828_v9 = vrot.slane %v699_v16, 4 }
 0x16b   : > { %955 = vst [vmem:[#allocation1 + $0x22] ss:$4 sm:$0xff] %v811_v60 }
 0x16c   : > { %956 = vst [vmem:[#allocation1 + $0x23] ss:$4 sm:$0xff] %v691_v47  ;;  %v651_v47 = vsel %vm618_vm1, %v8045_v53, %v4946_v25 }
 0x16d   : > { %4422 = vmatmul.msk.f32.gmra.mxu1 %vm1049_vm3, %v948_v8  ;;  %4418 = vmatmul.msk.f32.gmra.mxu0 %vm1049_vm3, %v928_v42  ;;  %v529_v42 = vpop.permute.xlu0 %528  ;;  %v700_v33 = vsel %vm667_vm2, %v651_v47, %v539_v24 }
 0x16e   : > { %v695_v56 = vsel %vm667_vm2, %v646_v18, %v529_v42 }
 0x16f   : > { %v957_v32 = vld.sshfl [vmem:[#allocation1] sm:$0xff pattern:$0x73625140]  ;;  %v818_v22 = vrot.slane %v695_v56, 2  ;;  %v819_v26 = vrot.slane %v695_v56, 4  ;;  %v820_v21 = vrot.slane %v695_v56, 6 }
 0x170   : > { %959 = vst [vmem:[#allocation1] ss:$4 sm:$0xff] %v692_v7  ;;  %v8046_v7 = vld [vmem:[#allocation18_spill] sm:$0xff] }
 0x171   : > { %960 = vst [vmem:[#allocation1 + $0x1] ss:$4 sm:$0xff] %v812_v49  ;;  %v652_v59 = vsel %vm618_vm1, %v8046_v7, %v4958_v28  ;;  %v829_v49 = vrot.slane %v699_v16, 6 }
 0x172   : > { %961 = vst [vmem:[#allocation1 + $0x2] ss:$4 sm:$0xff] %v813_v14 }
 0x173   : > { %v958_v45 = vld.sshfl [vmem:[#allocation1 + $0x20] sm:$0xff pattern:$0x73625140]  ;;  %962 = vst [vmem:[#allocation1 + $0x3] ss:$4 sm:$0xff] %v814_v23 }
 0x174   : > { %963 = vst [vmem:[#allocation1 + $0x20] ss:$4 sm:$0xff] %v693_v44  ;;  %v543_v44 = vpop.permute.xlu1 %542  ;;  %v8047_v23 = vld [vmem:[#allocation17_spill] sm:$0xff] }
 0x175   : > { %964 = vst [vmem:[#allocation1 + $0x21] ss:$4 sm:$0xff] %v815_v36  ;;  %4423 = vmatmul.msk.f32.gmra.mxu1 %vm1049_vm3, %v957_v32  ;;  %4419 = vmatmul.msk.f32.gmra.mxu0 %vm1049_vm3, %v5117_v11  ;;  %v694_v11 = vsel %vm667_vm2, %v645_v6, %v527_v46  ;;  %v535_v41 = vpop.permute.xlu0 %534  ;;  %v653_v25 = vsel %vm618_vm1, %v8047_v23, %v4956_v27  ;;  %v545_v46 = vpop.permute.xlu2 %544  ;;  %v8048_v6 = vld [vmem:[#allocation16_spill] sm:$0xff] }
 0x176   : > { %965 = vst [vmem:[#allocation1 + $0x22] ss:$4 sm:$0xff] %v816_v13  ;;  %v698_v61 = vsel %vm667_vm2, %v649_v62, %v535_v41  ;;  %v702_v28 = vsel %vm667_vm2, %v653_v25, %v543_v44  ;;  %v655_v27 = vsel %vm618_vm1, %v4762_v35, %v4970_v31  ;;  %v654_v55 = vsel %vm618_vm1, %v8048_v6, %v4960_v29  ;;  %v8051_v41 = vld [vmem:[#allocation22_spill] sm:$0xff] }
 0x177   : > { %966 = vst [vmem:[#allocation1 + $0x23] ss:$4 sm:$0xff] %v817_v17  ;;  %v824_v8 = vrot.slane %v698_v61, 2  ;;  %v825_v19 = vrot.slane %v698_v61, 4  ;;  %v826_v3 = vrot.slane %v698_v61, 6  ;;  %v833_v18 = vrot.slane %v702_v28, 2 }
 0x178   : > { %v834_v0 = vrot.slane %v702_v28, 4  ;;  %v835_v63 = vrot.slane %v702_v28, 6  ;;  %v703_v37 = vsel %vm667_vm2, %v654_v55, %v545_v46 }
 0x17a   : > { %v967_v34 = vld.sshfl [vmem:[#allocation1] sm:$0xff pattern:$0x73625140] }
 0x17b   : > { %969 = vst [vmem:[#allocation1] ss:$4 sm:$0xff] %v694_v11 }
 0x17c   : > { %970 = vst [vmem:[#allocation1 + $0x1] ss:$4 sm:$0xff] %v695_v56  ;;  %v549_v31 = vpop.permute.xlu1 %548 }
 0x17d   : > { %971 = vst [vmem:[#allocation1 + $0x2] ss:$4 sm:$0xff] %v818_v22  ;;  %4424 = vmatmul.msk.f32.gmra.mxu1 %vm1049_vm3, %v958_v45  ;;  %4420 = vmatmul.msk.f32.gmra.mxu0 %vm1049_vm3, %v5123_v4  ;;  %v648_v4 = vsel %vm618_vm1, %v8043_v39, %v8042_v38  ;;  %v541_v48 = vpop.permute.xlu0 %540  ;;  %v8049_v22 = vld [vmem:[#allocation20_spill] sm:$0xff]  ;;  %v551_v10 = vpop.permute.xlu2 %550  ;;  %v8052_v39 = vld [vmem:[#allocation29_spill] sm:$0xff] }
 0x17e   : > { %v968_v12 = vld.sshfl [vmem:[#allocation1 + $0x20] sm:$0xff pattern:$0x73625140]  ;;  %972 = vst [vmem:[#allocation1 + $0x3] ss:$4 sm:$0xff] %v819_v26  ;;  %v697_v58 = vsel %vm667_vm2, %v648_v4, %v533_v50  ;;  %v701_v14 = vsel %vm667_vm2, %v652_v59, %v541_v48  ;;  %v656_v29 = vsel %vm618_vm1, %v8049_v22, %v4968_v30  ;;  %v8053_v30 = vld [vmem:[#allocation19_spill] sm:$0xff] }
 0x17f   : > { %974 = vst [vmem:[#allocation1 + $0x21] ss:$4 sm:$0xff] %v696_v1  ;;  %v830_v36 = vrot.slane %v701_v14, 2  ;;  %v831_v13 = vrot.slane %v701_v14, 4  ;;  %v832_v17 = vrot.slane %v701_v14, 6  ;;  %v705_v26 = vsel %vm667_vm2, %v656_v29, %v549_v31  ;;  %v8066_v22 = vld [vmem:[#allocation33_spill] sm:$0xff] }
 0x180   : > { %975 = vst [vmem:[#allocation1 + $0x22] ss:$4 sm:$0xff] %v821_v43  ;;  %v840_v62 = vrot.slane %v705_v26, 4  ;;  %v841_v5 = vrot.slane %v705_v26, 6  ;;  %v657_v4 = vsel %vm618_vm1, %v8053_v30, %v8052_v39 }
 0x181   : > { %976 = vst [vmem:[#allocation1 + $0x23] ss:$4 sm:$0xff] %v822_v57  ;;  %v839_v57 = vrot.slane %v705_v26, 2  ;;  %v706_v51 = vsel %vm667_vm2, %v657_v4, %v551_v10 }
 0x182   : > { %973 = vst [vmem:[#allocation1 + $0x20] ss:$4 sm:$0xff] %v820_v21  ;;  %v8050_v21 = vld [vmem:[#allocation31_spill] sm:$0xff] }
 0x183   : > { %v658_v50 = vsel %vm618_vm1, %v8051_v41, %v8050_v21 }
 0x185   : > { %v977_v2 = vld.sshfl [vmem:[#allocation1] sm:$0xff pattern:$0x73625140]  ;;  %4425 = vmatmul.msk.f32.gmra.mxu1 %vm1049_vm3, %v967_v34  ;;  %v547_v42 = vpop.permute.xlu0 %546 }
 0x186   : > { %980 = vst [vmem:[#allocation1 + $0x1] ss:$4 sm:$0xff] %v697_v58  ;;  %v704_v40 = vsel %vm667_vm2, %v655_v27, %v547_v42  ;;  %v8054_v58 = vld [vmem:[#allocation30_spill] sm:$0xff]  ;;  %v8062_v27 = vld [vmem:[#allocation32_spill] sm:$0xff] }
 0x187   : > { %979 = vst [vmem:[#allocation1] ss:$4 sm:$0xff] %v823_v54  ;;  %v836_v35 = vrot.slane %v704_v40, 2  ;;  %v837_v34 = vrot.slane %v704_v40, 4  ;;  %v838_v1 = vrot.slane %v704_v40, 6  ;;  %v8055_v54 = vld [vmem:[#allocation21_spill] sm:$0xff] }
 0x188   : > { %981 = vst [vmem:[#allocation1 + $0x2] ss:$4 sm:$0xff] %v698_v61  ;;  %v555_v61 = vpop.permute.xlu1 %554 }
 0x189   : > { %v978_v60 = vld.sshfl [vmem:[#allocation1 + $0x20] sm:$0xff pattern:$0x73625140]  ;;  %982 = vst [vmem:[#allocation1 + $0x3] ss:$4 sm:$0xff] %v824_v8 }
 0x18a   : > { %985 = vst [vmem:[#allocation1 + $0x22] ss:$4 sm:$0xff] %v699_v16 }
 0x18b   : > { %986 = vst [vmem:[#allocation1 + $0x23] ss:$4 sm:$0xff] %v827_v15 }
 0x18c   : > { %983 = vst [vmem:[#allocation1 + $0x20] ss:$4 sm:$0xff] %v825_v19 }
 0x18d   : > { %984 = vst [vmem:[#allocation1 + $0x21] ss:$4 sm:$0xff] %v826_v3  ;;  %4426 = vmatmul.msk.f32.gmra.mxu1 %vm1049_vm3, %v968_v12  ;;  %v553_v12 = vpop.permute.xlu0 %552 }
 0x18e   : > { %v707_v38 = vsel %vm667_vm2, %v658_v50, %v553_v12 }
 0x18f   : > { %v842_v16 = vrot.slane %v707_v38, 2 }
 0x190   : > { %v987_v32 = vld.sshfl [vmem:[#allocation1] sm:$0xff pattern:$0x73625140] }
 0x191   : > { %991 = vst [vmem:[#allocation1 + $0x2] ss:$4 sm:$0xff] %v700_v33  ;;  %4429 = vmatmul.msk.f32.vlgmr.msra.gmra.mxu2 %vm1049_vm3, %v987_v32 }
 0x192   : > { %989 = vst [vmem:[#allocation1] ss:$4 sm:$0xff] %v828_v9  ;;  %v5226_v15 = vpop.f32.mrf.mxu0 }
 0x193   : > { %990 = vst [vmem:[#allocation1 + $0x1] ss:$4 sm:$0xff] %v829_v49  ;;  %v5229_v19 = vrot.slane %v5226_v15, 2  ;;  %v5232_v3 = vrot.slane %v5226_v15, 4  ;;  %v5235_v24 = vrot.slane %v5226_v15, 6  ;;  %v4443_v7 = vrot.slane %v5226_v15, 9 }
 0x194   : > { %v988_v45 = vld.sshfl [vmem:[#allocation1 + $0x20] sm:$0xff pattern:$0x73625140]  ;;  %992 = vst [vmem:[#allocation1 + $0x3] ss:$4 sm:$0xff] %v701_v14  ;;  %v557_v14 = vpop.permute.xlu2 %556 }
 0x195   : > { %996 = vst [vmem:[#allocation1 + $0x23] ss:$4 sm:$0xff] %v702_v28  ;;  %4427 = vmatmul.msk.f32.gmra.mxu1 %vm1049_vm3, %v977_v2  ;;  %v659_v2 = vsel %vm618_vm1, %v8055_v54, %v8054_v58  ;;  %v1500_v48 = vrot.slane %v5229_v19, 7  ;;  %v1503_v53 = vrot.slane %v5232_v3, 7  ;;  %v559_v33 = vpop.permute.xlu0 %558  ;;  %v1506_v49 = vrot.slane %v5235_v24, 7  ;;  %v8061_v28 = vld [vmem:[#allocation34_spill] sm:$0xff] }
 0x196   : > { %993 = vst [vmem:[#allocation1 + $0x20] ss:$4 sm:$0xff] %v830_v36  ;;  %v708_v8 = vsel %vm667_vm2, %v659_v2, %v555_v61  ;;  %v4521_v2 = vld [vmem:[%s4588_s23 + $0x160] sm:$0x3] }
 0x197   : > { %994 = vst [vmem:[#allocation1 + $0x21] ss:$4 sm:$0xff] %v831_v13  ;;  %v845_v47 = vrot.slane %v708_v8, 2  ;;  %v1505_v32 = vrot.slane %v1503_v53, 2  ;;  %v1502_v44 = vrot.slane %v1500_v48, 2  ;;  %v846_v23 = vrot.slane %v708_v8, 4 }
 0x198   : > { %995 = vst [vmem:[#allocation1 + $0x22] ss:$4 sm:$0xff] %v832_v17  ;;  %v1501_v25 = vsel %vm5244_vm10, %v4443_v7, %v1500_v48  ;;  %v844_v13 = vrot.slane %v707_v38, 6 }
 0x199   : > { %4430 = vmatmul.msk.f32.gmra.mxu2 %vm1049_vm3, %v988_v45  ;;  %8056 = vst [vmem:[#allocation5_spill] sm:$0xff] %v5226_v15  ;;  %v4518_v45 = vld [vmem:[%s4588_s23 + $0x150] sm:$0xff]  ;;  %1898 = vrot.lane.b32.xlu0 %v1501_v25, %s4535_s30  ;;  %v1507_v17 = vsel %vm5244_vm10, %v1505_v32, %v1506_v49  ;;  %v1504_v42 = vsel %vm5244_vm10, %v1502_v44, %v1503_v53  ;;  %v8070_v25 = vld [vmem:[#allocation37_spill] sm:$0xff] }
 0x19a   : > { %8057 = vst [vmem:[#allocation23_spill] sm:$0xff] %v5232_v3  ;;  %v661_v36 = vsel %vm618_vm1, %v4518_v45, %v8061_v28  ;;  %1902 = vrot.lane.b32.xlu2 %v1507_v17, %s4535_s30  ;;  %1900 = vrot.lane.b32.xlu1 %v1504_v42, %s4535_s30 }
 0x19b   : > { %v997_v56 = vld.sshfl [vmem:[#allocation1] sm:$0xff pattern:$0x73625140]  ;;  %8058 = vst [vmem:[#allocation2_spill] sm:$0xff] %v5235_v24 }
 0x19c   : > { %999 = vst [vmem:[#allocation1] ss:$4 sm:$0xff] %v833_v18  ;;  %v4519_v18 = vld [vmem:[%s4588_s23 + $0x148] sm:$0x3]  ;;  %v563_v30 = vpop.permute.xlu2 %562 }
 0x19d   : > { %1000 = vst [vmem:[#allocation1 + $0x1] ss:$4 sm:$0xff] %v834_v0  ;;  %4428 = vmatmul.msk.f32.gmra.mxu1 %vm1049_vm3, %v978_v60  ;;  %v843_v60 = vrot.slane %v707_v38, 4  ;;  %v660_v46 = vsel %vm618_vm1, %v4519_v18, %v8062_v27  ;;  %v847_v0 = vrot.slane %v708_v8, 6  ;;  %v565_v32 = vpop.permute.xlu0 %564 }
 0x19e   : > { %1001 = vst [vmem:[#allocation1 + $0x2] ss:$4 sm:$0xff] %v835_v63  ;;  %v5265_v63 = vpop.f32.mrf.mxu0 }
 0x19f   : > { %v998_v11 = vld.sshfl [vmem:[#allocation1 + $0x20] sm:$0xff pattern:$0x73625140]  ;;  %1002 = vst [vmem:[#allocation1 + $0x3] ss:$4 sm:$0xff] %v703_v37  ;;  %v5271_v55 = vrot.slane %v5265_v63, 2  ;;  %v561_v37 = vpop.permute.xlu1 %560 }
 0x1a0   : > { %1003 = vst [vmem:[#allocation1 + $0x20] ss:$4 sm:$0xff] %v704_v40  ;;  %v709_v40 = vsel %vm667_vm2, %v660_v46, %v557_v14  ;;  %v5275_v31 = vrot.slane %v5265_v63, 4  ;;  %v5286_v41 = vrot.slane %v5265_v63, 6 }
 0x1a1   : > { %1004 = vst [vmem:[#allocation1 + $0x21] ss:$4 sm:$0xff] %v836_v35  ;;  %4431 = vmatmul.msk.f32.gmra.mxu2 %vm1049_vm3, %v997_v56  ;;  %v710_v56 = vsel %vm667_vm2, %v661_v36, %v559_v33 }
 0x1a2   : > { %1005 = vst [vmem:[#allocation1 + $0x22] ss:$4 sm:$0xff] %v837_v34  ;;  %v848_v35 = vrot.slane %v710_v56, 2  ;;  %v1512_v34 = vrot.slane %v5271_v55, 7  ;;  %v1515_v21 = vrot.slane %v5275_v31, 7  ;;  %v849_v4 = vrot.slane %v710_v56, 4 }
 0x1a3   : > { %1006 = vst [vmem:[#allocation1 + $0x23] ss:$4 sm:$0xff] %v838_v1  ;;  %v4520_v1 = vld [vmem:[%s4588_s23 + $0x158] sm:$0xff]  ;;  %v850_v58 = vrot.slane %v710_v56, 6 }
 0x1a4   : > { %8063 = vst [vmem:[#allocation4_spill] sm:$0xff] %v5265_v63  ;;  %v662_v29 = vsel %vm618_vm1, %v4520_v1, %v8066_v22  ;;  %v1517_v54 = vrot.slane %v1515_v21, 2 }
 0x1a5   : > { %8064 = vst [vmem:[#allocation24_spill] sm:$0xff] %v5271_v55 }
 0x1a6   : > { %v1007_v43 = vld.sshfl [vmem:[#allocation1] sm:$0xff pattern:$0x73625140]  ;;  %8065 = vst [vmem:[#allocation3_spill] sm:$0xff] %v5275_v31  ;;  %v5299_v39 = vpop.f32.mrf.mxu0 }
 0x1a7   : > { %1009 = vst [vmem:[#allocation1] ss:$4 sm:$0xff] %v705_v26  ;;  %v1508_v26 = vrot.slane %v1506_v49, 2  ;;  %v5302_v61 = vrot.slane %v5299_v39, 4  ;;  %v5319_v44 = vrot.slane %v5299_v39, 6  ;;  %v567_v17 = vpop.permute.xlu1 %566 }
 0x1a8   : > { %1010 = vst [vmem:[#allocation1 + $0x1] ss:$4 sm:$0xff] %v839_v57  ;;  %v1514_v57 = vrot.slane %v1512_v34, 2 }
 0x1a9   : > { %1011 = vst [vmem:[#allocation1 + $0x2] ss:$4 sm:$0xff] %v840_v62  ;;  %4432 = vmatmul.msk.f32.gmra.mxu2 %vm1049_vm3, %v998_v11  ;;  %v1509_v11 = vrot.slane %v5265_v63, 7  ;;  %v1525_v53 = vrot.slane %v5302_v61, 7  ;;  %v1528_v18 = vrot.slane %v5319_v44, 7 }
 0x1aa   : > { %1012 = vst [vmem:[#allocation1 + $0x3] ss:$4 sm:$0xff] %v841_v5  ;;  %v5220_v20 = vld.sshfl [vmem:[#allocation1 + $0x20] sm:$0xff pattern:$0x73625140]  ;;  %v1516_v10 = vsel %vm5244_vm10, %v1514_v57, %v1515_v21 }
 0x1ab   : > { %1013 = vst [vmem:[#allocation1 + $0x20] ss:$4 sm:$0xff] %v706_v51  ;;  %v1511_v12 = vrot.slane %v1509_v11, 2  ;;  %v1510_v50 = vsel %vm5244_vm10, %v1508_v26, %v1509_v11  ;;  %1908 = vrot.lane.b32.xlu2 %v1516_v10, %s4535_s30  ;;  %v1518_v51 = vrot.slane %v5286_v41, 7  ;;  %v1527_v11 = vrot.slane %v1525_v53, 2 }
 0x1ac   : > { %1014 = vst [vmem:[#allocation1 + $0x21] ss:$4 sm:$0xff] %v707_v38  ;;  %1904 = vrot.lane.b32.xlu0 %v1510_v50, %s4535_s30 }
 0x1ad   : > { %1015 = vst [vmem:[#allocation1 + $0x22] ss:$4 sm:$0xff] %v842_v16  ;;  %v1513_v62 = vsel %vm5244_vm10, %v1511_v12, %v1512_v34  ;;  %v8069_v16 = vld [vmem:[#allocation36_spill] sm:$0xff]  ;;  %v1520_v14 = vrot.slane %v1518_v51, 2  ;;  %v1519_v28 = vsel %vm5244_vm10, %v1517_v54, %v1518_v51  ;;  %v1529_v10 = vsel %vm5244_vm10, %v1527_v11, %v1528_v18 }
 0x1ae   : > { %1016 = vst [vmem:[#allocation1 + $0x23] ss:$4 sm:$0xff] %v843_v60  ;;  %1906 = vrot.lane.b32.xlu1 %v1513_v62, %s4535_s30  ;;  %v1521_v60 = vrot.slane %v5299_v39, 7  ;;  %v5334_v42 = vpop.f32.mrf.mxu0  ;;  %v569_v62 = vpop.permute.xlu2 %568  ;;  %v4524_v54 = vld [vmem:[%s4588_s23 + $0x178] sm:$0x3] }
 0x1af   : > { %8067 = vst [vmem:[#allocation7_spill] sm:$0xff] %v5286_v41  ;;  %v1531_v27 = vrot.slane %v5334_v42, 7  ;;  %v5339_v46 = vrot.slane %v5334_v42, 2  ;;  %v5353_v57 = vrot.slane %v5334_v42, 6 }
 0x1b0   : > { %8068 = vst [vmem:[#allocation25_spill] sm:$0xff] %v5299_v39 }
 0x1b1   : > { %v5241_v59 = vld.sshfl [vmem:[#allocation1] sm:$0xff pattern:$0x73625140]  ;;  %4433 = vmatmul.msk.f32.gmra.mxu2 %vm1049_vm3, %v1007_v43  ;;  %v711_v43 = vsel %vm667_vm2, %v662_v29, %v561_v37  ;;  %8071 = vst [vmem:[#allocation6_spill] sm:$0xff] %v5334_v42  ;;  %v1533_v1 = vrot.slane %v1531_v27, 2  ;;  %v1534_v22 = vrot.slane %v5339_v46, 7 }
 0x1b2   : > { %1020 = vst [vmem:[#allocation1 + $0x1] ss:$4 sm:$0xff] %v708_v8  ;;  %v851_v38 = vrot.slane %v711_v43, 2  ;;  %v663_v8 = vsel %vm618_vm1, %v4521_v2, %v8069_v16  ;;  %v852_v7 = vrot.slane %v711_v43, 4  ;;  %v853_v49 = vrot.slane %v711_v43, 6 }
 0x1b3   : > { %1021 = vst [vmem:[#allocation1 + $0x2] ss:$4 sm:$0xff] %v845_v47  ;;  %v712_v47 = vsel %vm667_vm2, %v663_v8, %v563_v30  ;;  %v5347_v29 = vrot.slane %v5334_v42, 4  ;;  %v666_v2 = vsel %vm618_vm1, %v4524_v54, %v5028_v52  ;;  %v1540_v16 = vrot.slane %v5353_v57, 7 }
 0x1b4   : > { %1022 = vst [vmem:[#allocation1 + $0x3] ss:$4 sm:$0xff] %v846_v23  ;;  %v4522_v23 = vld [vmem:[%s4588_s23 + $0x168] sm:$0xff]  ;;  %1910 = vrot.lane.b32.xlu0 %v1519_v28, %s4535_s30  ;;  %v715_v8 = vsel %vm667_vm2, %v666_v2, %v569_v62 }
 0x1b5   : > { %v5268_v6 = vld.sshfl [vmem:[#allocation1 + $0x20] sm:$0xff pattern:$0x73625140]  ;;  %1019 = vst [vmem:[#allocation1] ss:$4 sm:$0xff] %v844_v13  ;;  %v664_v45 = vsel %vm618_vm1, %v4522_v23, %v8070_v25 }
 0x1b6   : > { %1024 = vst [vmem:[#allocation1 + $0x21] ss:$4 sm:$0xff] %v709_v40  ;;  %v713_v36 = vsel %vm667_vm2, %v664_v45, %v565_v32 }
 0x1b7   : > { %1023 = vst [vmem:[#allocation1 + $0x20] ss:$4 sm:$0xff] %v847_v0  ;;  %v4523_v0 = vld [vmem:[%s4588_s23 + $0x170] sm:$0xff]  ;;  %v854_v37 = vrot.slane %v713_v36, 2  ;;  %v855_v26 = vrot.slane %v713_v36, 4  ;;  %v856_v12 = vrot.slane %v713_v36, 6 }
 0x1b8   : > { %1025 = vst [vmem:[#allocation1 + $0x22] ss:$4 sm:$0xff] %v710_v56  ;;  %v8073_v56 = vld [vmem:[#allocation35_spill] sm:$0xff] }
 0x1b9   : > { %1026 = vst [vmem:[#allocation1 + $0x23] ss:$4 sm:$0xff] %v848_v35  ;;  %4434 = vmatmul.msk.f32.gmra.mxu2 %vm1049_vm3, %v5220_v20  ;;  %v7820_v20 = vrot.slane %v5299_v39, 2  ;;  %v665_v40 = vsel %vm618_vm1, %v4523_v0, %v8073_v56  ;;  %vm3938_vm1 = vcmask 785408  }
 0x1ba   : > { %8072 = vst [vmem:[#allocation26_spill] sm:$0xff] %v5339_v46  ;;  %v714_v34 = vsel %vm667_vm2, %v665_v40, %v567_v17 }
 0x1bb   : > { %v4444_v48 = vrot.slane %v7820_v20, 9  ;;  %8074 = vst [vmem:[#allocation8_spill] sm:$0xff] %v5347_v29  ;;  %v857_v21 = vrot.slane %v714_v34, 2  ;;  %v858_v50 = vrot.slane %v714_v34, 4  ;;  %v859_v51 = vrot.slane %v714_v34, 6 }
 0x1bc   : > { %v5295_v5 = vld.sshfl [vmem:[#allocation1] sm:$0xff pattern:$0x73625140]  ;;  %8075 = vst [vmem:[#allocation10_spill] sm:$0xff] %v5353_v57  ;;  %1916 = vrot.lane.b32.xlu0 %v1529_v10, %s4535_s30 }
 0x1bd   : > { %1031 = vst [vmem:[#allocation1 + $0x2] ss:$4 sm:$0xff] %v711_v43  ;;  %v1526_v13 = vsel %vm5244_vm10, %v4444_v48, %v1525_v53  ;;  %v1530_v43 = vrot.slane %v1528_v18, 2 }
 0x1be   : > { %1032 = vst [vmem:[#allocation1 + $0x3] ss:$4 sm:$0xff] %v851_v38  ;;  %1914 = vrot.lane.b32.xlu2 %v1526_v13, %s4535_s30 }
 0x1bf   : > { %1029 = vst [vmem:[#allocation1] ss:$4 sm:$0xff] %v849_v4  ;;  %v1532_v30 = vsel %vm5244_vm10, %v1530_v43, %v1531_v27  ;;  %v1537_v4 = vrot.slane %v5347_v29, 7 }
 0x1c0   : > { %v5314_v33 = vld.sshfl [vmem:[#allocation1 + $0x20] sm:$0xff pattern:$0x73625140]  ;;  %1030 = vst [vmem:[#allocation1 + $0x1] ss:$4 sm:$0xff] %v850_v58  ;;  %v5365_v58 = vpop.f32.mrf.mxu0 }
 0x1c1   : > { %1035 = vst [vmem:[#allocation1 + $0x22] ss:$4 sm:$0xff] %v712_v47  ;;  %4435 = vmatmul.msk.f32.gmra.mxu2 %vm1049_vm3, %v5241_v59  ;;  %v1522_v59 = vsel %vm5244_vm10, %v1520_v14, %v1521_v60  ;;  %v1536_v60 = vrot.slane %v1534_v22, 2  ;;  %v1539_v48 = vrot.slane %v1537_v4, 2  ;;  %v1543_v53 = vrot.slane %v5365_v58, 7 }
 0x1c2   : > { %1033 = vst [vmem:[#allocation1 + $0x20] ss:$4 sm:$0xff] %v852_v7  ;;  %1912 = vrot.lane.b32.xlu1 %v1522_v59, %s4535_s30  ;;  %v1542_v47 = vrot.slane %v1540_v16, 2  ;;  %v5377_v7 = vrot.slane %v5365_v58, 6  ;;  %v7817_v32 = vrot.slane %v5365_v58, 2 }
 0x1c3   : > { %1034 = vst [vmem:[#allocation1 + $0x21] ss:$4 sm:$0xff] %v853_v49  ;;  %v1538_v52 = vsel %vm5244_vm10, %v1536_v60, %v1537_v4  ;;  %v7818_v49 = vrot.slane %v5365_v58, 4  ;;  %v1541_v14 = vsel %vm5244_vm10, %v1539_v48, %v1540_v16  ;;  %v1545_v45 = vrot.slane %v1543_v53, 2 }
 0x1c4   : > { %1036 = vst [vmem:[#allocation1 + $0x23] ss:$4 sm:$0xff] %v713_v36  ;;  %1922 = vrot.lane.b32.xlu0 %v1538_v52, %s4535_s30  ;;  %v1544_v23 = vsel %vm5244_vm10, %v1542_v47, %v1543_v53  ;;  %v1550_v25 = vrot.slane %v5377_v7, 7  ;;  %v1546_v28 = vrot.slane %v7817_v32, 7 }
 0x1c5   : > { %8076 = vst [vmem:[#allocation27_spill] sm:$0xff] %v5365_v58  ;;  %v4445_v36 = vrot.slane %v7818_v49, 9 }
 0x1c6   : > { %v1552_v27 = vrot.slane %v1550_v25, 2  ;;  %v1547_v0 = vsel %vm5244_vm10, %v1545_v45, %v1546_v28 }
 0x1c7   : > { %v1037_v35 = vld.sshfl [vmem:[#allocation1] sm:$0xff pattern:$0x73625140]  ;;  %v1551_v56 = vsel %vm5244_vm10, %v4445_v36, %v1550_v25 }
 0x1c8   : > { %1042 = vst [vmem:[#allocation1 + $0x3] ss:$4 sm:$0xff] %v714_v34  ;;  %4439 = vmatmul.msk.f32.vlgmr.msra.gmra.mxu3 %vm1049_vm3, %v1037_v35 }
 0x1c9   : > { %1039 = vst [vmem:[#allocation1] ss:$4 sm:$0xff] %v854_v37  ;;  %4436 = vmatmul.msk.f32.gmra.mxu2 %vm1049_vm3, %v5268_v6  ;;  %v1535_v6 = vsel %vm5244_vm10, %v1533_v1, %v1534_v22 }
 0x1ca   : > { %1040 = vst [vmem:[#allocation1 + $0x1] ss:$4 sm:$0xff] %v855_v26  ;;  %1918 = vrot.lane.b32.xlu1 %v1532_v30, %s4535_s30  ;;  %1920 = vrot.lane.b32.xlu2 %v1535_v6, %s4535_s30 }
 0x1cb   : > { %v1038_v38 = vld.sshfl [vmem:[#allocation1 + $0x20] sm:$0xff pattern:$0x73625140]  ;;  %1041 = vst [vmem:[#allocation1 + $0x2] ss:$4 sm:$0xff] %v856_v12 }
 0x1cc   : > { %1043 = vst [vmem:[#allocation1 + $0x20] ss:$4 sm:$0xff] %v857_v21  ;;  %1928 = vrot.lane.b32.xlu0 %v1547_v0, %s4535_s30 }
 0x1cd   : > { %1044 = vst [vmem:[#allocation1 + $0x21] ss:$4 sm:$0xff] %v858_v50 }
 0x1ce   : > { %1045 = vst [vmem:[#allocation1 + $0x22] ss:$4 sm:$0xff] %v859_v51 }
 0x1cf   : > { %1046 = vst [vmem:[#allocation1 + $0x23] ss:$4 sm:$0xff] %v715_v8 }
 0x1d0   : > { %4440 = vmatmul.msk.f32.gmra.mxu3 %vm1049_vm3, %v1038_v38 }
 0x1d1   : > { %4437 = vmatmul.msk.f32.gmra.mxu2 %vm1049_vm3, %v5295_v5  ;;  %v5390_v5 = vpop.f32.mrf.mxu0 }
 0x1d2   : > { %1924 = vrot.lane.b32.xlu1 %v1541_v14, %s4535_s30  ;;  %1926 = vrot.lane.b32.xlu2 %v1544_v23, %s4535_s30  ;;  %v1047_v59 = vld.sshfl [vmem:[#allocation1] sm:$0xff pattern:$0x73625140]  ;;  %v5398_v13 = vrot.slane %v5390_v5, 4  ;;  %v1553_v17 = vrot.slane %v5390_v5, 7  ;;  %v5402_v18 = vrot.slane %v5390_v5, 2 }
 0x1d3   : > { %v5421_v35 = vrot.slane %v5390_v5, 6 }
 0x1d4   : > { %8077 = vst [vmem:[#allocation9_spill] sm:$0xff] %v5398_v13  ;;  %v1554_v40 = vsel %vm5244_vm10, %v1552_v27, %v1553_v17  ;;  %v1556_v37 = vrot.slane %v5402_v18, 7  ;;  %v1559_v11 = vrot.slane %v5398_v13, 7  ;;  %v1555_v34 = vrot.slane %v1553_v17, 2 }
 0x1d5   : > { %8078 = vst [vmem:[#allocation12_spill] sm:$0xff] %v5402_v18  ;;  %v1562_v43 = vrot.slane %v5421_v35, 7 }
 0x1d6   : > { %8080 = vst [vmem:[#allocation28_spill] sm:$0xff] %v5421_v35  ;;  %v1048_v1 = vld.sshfl [vmem:[#allocation1 + $0x20] sm:$0xff pattern:$0x73625140]  ;;  %v1561_v26 = vrot.slane %v1559_v11, 2  ;;  %v1558_v12 = vrot.slane %v1556_v37, 2  ;;  %v1557_v21 = vsel %vm5244_vm10, %v1555_v34, %v1556_v37 }
 0x1d7   : > { %1934 = vrot.lane.b32.xlu0 %v1557_v21, %s4535_s30  ;;  %v1564_v2 = vrot.slane %v1562_v43, 2 }
 0x1d8   : > { %4441 = vmatmul.msk.f32.gmra.mxu3 %vm1049_vm3, %v1047_v59  ;;  %v1563_v50 = vsel %vm5244_vm10, %v1561_v26, %v1562_v43  ;;  %v1560_v10 = vsel %vm5244_vm10, %v1558_v12, %v1559_v11 }
 0x1d9   : > { %4438 = vmatmul.msk.f32.gmra.mxu2 %vm1049_vm3, %v5314_v33  ;;  %v5418_v33 = vpop.f32.mrf.mxu0 }
 0x1da   : > { %1930 = vrot.lane.b32.xlu1 %v1551_v56, %s4535_s30  ;;  %1932 = vrot.lane.b32.xlu2 %v1554_v40, %s4535_s30  ;;  %8079 = vst [vmem:[#allocation15_spill] sm:$0xff] %v5418_v33  ;;  %v5424_v22 = vrot.slane %v5418_v33, 2  ;;  %v1565_v62 = vrot.slane %v5418_v33, 7  ;;  %v7815_v6 = vrot.slane %v5418_v33, 4  ;;  %v7819_v14 = vrot.slane %v5418_v33, 6 }
 0x1dc   : > { %8081 = vst [vmem:[#allocation11_spill] sm:$0xff] %v5424_v22  ;;  %v1568_v38 = vrot.slane %v5424_v22, 7  ;;  %v1567_v54 = vrot.slane %v1565_v62, 2  ;;  %v1571_v16 = vrot.slane %v7815_v6, 7  ;;  %v1566_v8 = vsel %vm5244_vm10, %v1564_v2, %v1565_v62 }
 0x1dd   : > { %v4446_v28 = vrot.slane %v7819_v14, 9 }
 0x1de   : > { %v1570_v51 = vrot.slane %v1568_v38, 2  ;;  %v1569_v48 = vsel %vm5244_vm10, %v1567_v54, %v1568_v38 }
 0x1df   : > { %1940 = vrot.lane.b32.xlu0 %v1566_v8, %s4535_s30 }
 0x1e0   : > { %4442 = vmatmul.msk.f32.gmra.mxu3 %vm1049_vm3, %v1048_v1  ;;  %v1572_v60 = vsel %vm5244_vm10, %v1570_v51, %v1571_v16  ;;  %vm3941_vm3 = vcmask 916480  }
 0x1e1   : > { %v5439_v30 = vpop.f32.mrf.mxu0 }
 0x1e2   : > { %1938 = vrot.lane.b32.xlu2 %v1563_v50, %s4535_s30  ;;  %1936 = vrot.lane.b32.xlu1 %v1560_v10, %s4535_s30  ;;  %v5443_v4 = vrot.slane %v5439_v30, 2  ;;  %v1575_v53 = vrot.slane %v5439_v30, 7  ;;  %v5462_v23 = vrot.slane %v5439_v30, 4  ;;  %v5468_v59 = vrot.slane %v5439_v30, 6  ;;  %v5605_v32 = vpop.f32.mrf.mxu1 }
 0x1e3   : > { %8103 = vst [vmem:[#allocation41_spill] sm:$0xff] %v5605_v32 }
 0x1e4   : > { %v1578_v47 = vrot.slane %v5443_v4, 7  ;;  %8083 = vst [vmem:[#allocation13_spill] sm:$0xff] %v5462_v23  ;;  %v1577_v45 = vrot.slane %v1575_v53, 2  ;;  %v1581_v36 = vrot.slane %v5462_v23, 7  ;;  %v1576_v17 = vsel %vm5244_vm10, %v4446_v28, %v1575_v53 }
 0x1e5   : > { %8084 = vst [vmem:[#allocation18_spill] sm:$0xff] %v5468_v59  ;;  %v1584_v37 = vrot.slane %v5468_v59, 7 }
 0x1e6   : > { %v1580_v25 = vrot.slane %v1578_v47, 2  ;;  %v1579_v0 = vsel %vm5244_vm10, %v1577_v45, %v1578_v47  ;;  %v1583_v34 = vrot.slane %v1581_v36, 2 }
 0x1e7   : > { %1946 = vrot.lane.b32.xlu0 %v1576_v17, %s4535_s30  ;;  %v1586_v43 = vrot.slane %v1584_v37, 2 }
 0x1e8   : > { %v1582_v27 = vsel %vm5244_vm10, %v1580_v25, %v1581_v36  ;;  %v1585_v21 = vsel %vm5244_vm10, %v1583_v34, %v1584_v37 }
 0x1e9   : > { %v5458_v52 = vpop.f32.mrf.mxu0 }
 0x1ea   : > { %1944 = vrot.lane.b32.xlu2 %v1572_v60, %s4535_s30  ;;  %1942 = vrot.lane.b32.xlu1 %v1569_v48, %s4535_s30  ;;  %8082 = vst [vmem:[#allocation14_spill] sm:$0xff] %v5458_v52  ;;  %v1587_v56 = vrot.slane %v5458_v52, 7  ;;  %v5479_v40 = vrot.slane %v5458_v52, 2  ;;  %v5488_v12 = vrot.slane %v5458_v52, 4  ;;  %v7816_v51 = vrot.slane %v5458_v52, 6 }
 0x1ec   : > { %8085 = vst [vmem:[#allocation17_spill] sm:$0xff] %v5479_v40  ;;  %v1589_v1 = vrot.slane %v1587_v56, 2  ;;  %v1590_v26 = vrot.slane %v5479_v40, 7  ;;  %v1588_v10 = vsel %vm5244_vm10, %v1586_v43, %v1587_v56  ;;  %v1593_v38 = vrot.slane %v5488_v12, 7 }
 0x1ed   : > { %8086 = vst [vmem:[#allocation16_spill] sm:$0xff] %v5488_v12  ;;  %v1596_v53 = vrot.slane %v7816_v51, 7 }
 0x1ee   : > { %v1591_v62 = vsel %vm5244_vm10, %v1589_v1, %v1590_v26  ;;  %v1592_v54 = vrot.slane %v1590_v26, 2  ;;  %v1595_v16 = vrot.slane %v1593_v38, 2 }
 0x1ef   : > { %1952 = vrot.lane.b32.xlu0 %v1585_v21, %s4535_s30 }
 0x1f0   : > { %v1594_v25 = vsel %vm5244_vm10, %v1592_v54, %v1593_v38  ;;  %v1597_v45 = vsel %vm5244_vm10, %v1595_v16, %v1596_v53 }
 0x1f1   : > { %v5484_v11 = vpop.f32.mrf.mxu0 }
 0x1f2   : > { %1950 = vrot.lane.b32.xlu2 %v1582_v27, %s4535_s30  ;;  %1948 = vrot.lane.b32.xlu1 %v1579_v0, %s4535_s30  ;;  %v5493_v50 = vrot.slane %v5484_v11, 2  ;;  %v5505_v2 = vrot.slane %v5484_v11, 4  ;;  %v5511_v48 = vrot.slane %v5484_v11, 6  ;;  %v4447_v47 = vrot.slane %v5484_v11, 9 }
 0x1f4   : > { %8087 = vst [vmem:[#allocation20_spill] sm:$0xff] %v5493_v50  ;;  %v1600_v8 = vrot.slane %v5493_v50, 7  ;;  %v1603_v36 = vrot.slane %v5505_v2, 7  ;;  %v1606_v17 = vrot.slane %v5511_v48, 7  ;;  %v5550_v16 = vpop.permute.xlu2 %1902 }
 0x1f5   : > { %8088 = vst [vmem:[#allocation31_spill] sm:$0xff] %v5505_v2 }
 0x1f6   : > { %8090 = vst [vmem:[#allocation29_spill] sm:$0xff] %v5511_v48  ;;  %v1601_v28 = vsel %vm5244_vm10, %v4447_v47, %v1600_v8  ;;  %v1602_v27 = vrot.slane %v1600_v8, 2  ;;  %v1605_v56 = vrot.slane %v1603_v36, 2  ;;  %v1608_v1 = vrot.slane %v1606_v17, 2 }
 0x1f7   : > { %1958 = vrot.lane.b32.xlu0 %v1594_v25, %s4535_s30  ;;  %8095 = vst [vmem:[#allocation32_spill] sm:$0xff] %v5550_v16 }
 0x1f8   : > { %v1604_v43 = vsel %vm5244_vm10, %v1602_v27, %v1603_v36  ;;  %v1607_v21 = vsel %vm5244_vm10, %v1605_v56, %v1606_v17 }
 0x1f9   : > { %v5508_v60 = vpop.f32.mrf.mxu0 }
 0x1fa   : > { %1954 = vrot.lane.b32.xlu1 %v1588_v10, %s4535_s30  ;;  %1956 = vrot.lane.b32.xlu2 %v1591_v62, %s4535_s30  ;;  %8089 = vst [vmem:[#allocation22_spill] sm:$0xff] %v5508_v60  ;;  %v5528_v0 = vrot.slane %v5508_v60, 4  ;;  %v1609_v37 = vrot.slane %v5508_v60, 7  ;;  %v5532_v34 = vrot.slane %v5508_v60, 2  ;;  %v5548_v54 = vrot.slane %v5508_v60, 6 }
 0x1fc   : > { %8091 = vst [vmem:[#allocation19_spill] sm:$0xff] %v5528_v0  ;;  %v1610_v10 = vsel %vm5244_vm10, %v1608_v1, %v1609_v37  ;;  %v1612_v62 = vrot.slane %v5532_v34, 7  ;;  %v1615_v38 = vrot.slane %v5528_v0, 7  ;;  %v1611_v8 = vrot.slane %v1609_v37, 2 }
 0x1fd   : > { %8092 = vst [vmem:[#allocation30_spill] sm:$0xff] %v5532_v34 }
 0x1fe   : > { %8094 = vst [vmem:[#allocation34_spill] sm:$0xff] %v5548_v54  ;;  %v1617_v47 = vrot.slane %v1615_v38, 2  ;;  %v1614_v25 = vrot.slane %v1612_v62, 2 }
 0x1ff   : > { %1964 = vrot.lane.b32.xlu0 %v1604_v43, %s4535_s30 }
 0x200   : > { %v1616_v17 = vsel %vm5244_vm10, %v1614_v25, %v1615_v38 }
 0x201   : > { %v5534_v26 = vpop.f32.mrf.mxu0 }
 0x202   : > { %1960 = vrot.lane.b32.xlu1 %v1597_v45, %s4535_s30  ;;  %1962 = vrot.lane.b32.xlu2 %v1601_v28, %s4535_s30  ;;  %8093 = vst [vmem:[#allocation21_spill] sm:$0xff] %v5534_v26  ;;  %v5553_v53 = vrot.slane %v5534_v26, 4  ;;  %v1618_v45 = vrot.slane %v5548_v54, 7  ;;  %v1613_v28 = vsel %vm5244_vm10, %v1611_v8, %v1612_v62  ;;  %v7821_v56 = vrot.slane %v5534_v26, 2 }
 0x203   : > { %v5570_v1 = vrot.slane %v5534_v26, 6  ;;  %v1653_v54 = vrot.slane %v5605_v32, 7 }
 0x204   : > { %v1619_v36 = vsel %vm5244_vm10, %v1617_v47, %v1618_v45  ;;  %v1625_v27 = vrot.slane %v5553_v53, 7  ;;  %v4448_v38 = vrot.slane %v7821_v56, 9  ;;  %v1620_v8 = vrot.slane %v1618_v45, 2 }
 0x205   : > { %8097 = vst [vmem:[#allocation36_spill] sm:$0xff] %v5570_v1  ;;  %v5572_v43 = vpop.permute.xlu2 %1908  ;;  %v1628_v47 = vrot.slane %v5570_v1, 7  ;;  %v1655_v12 = vrot.slane %v1653_v54, 2 }
 0x206   : > { %8098 = vst [vmem:[#allocation37_spill] sm:$0xff] %v5572_v43  ;;  %v1627_v62 = vrot.slane %v1625_v27, 2 }
 0x207   : > { %1970 = vrot.lane.b32.xlu0 %v1613_v28, %s4535_s30 }
 0x208   : > { %v1629_v28 = vsel %vm5244_vm10, %v1627_v62, %v1628_v47  ;;  %v1630_v62 = vrot.slane %v1628_v47, 2 }
 0x209   : > { %v5565_v37 = vpop.f32.mrf.mxu0 }
 0x20a   : > { %1966 = vrot.lane.b32.xlu1 %v1607_v21, %s4535_s30  ;;  %1968 = vrot.lane.b32.xlu2 %v1610_v10, %s4535_s30  ;;  %8096 = vst [vmem:[#allocation33_spill] sm:$0xff] %v5565_v37  ;;  %v1621_v21 = vrot.slane %v5534_v26, 7  ;;  %v5576_v10 = vrot.slane %v5565_v37, 2  ;;  %v5593_v45 = vrot.slane %v5565_v37, 4 }
 0x20b   : > { %v5616_v20 = vpop.permute.xlu0 %1898 }
 0x20c   : > { %8099 = vst [vmem:[#allocation35_spill] sm:$0xff] %v5576_v10  ;;  %v1622_v25 = vsel %vm5244_vm10, %v1620_v8, %v1621_v21  ;;  %v1634_v6 = vrot.slane %v5576_v10, 7 }
 0x20d   : > { %8100 = vst [vmem:[#allocation38_spill] sm:$0xff] %v5593_v45 }
 0x20e   : > { %v1636_v8 = vrot.slane %v1634_v6, 2  ;;  %8104 = vst [vmem:[#allocation42_spill] sm:$0xff] %v5616_v20 }
 0x20f   : > { %1976 = vrot.lane.b32.xlu0 %v1622_v25, %s4535_s30 }
 0x211   : > { %v5597_v51 = vpop.f32.mrf.mxu0 }
 0x212   : > { %1974 = vrot.lane.b32.xlu2 %v1619_v36, %s4535_s30  ;;  %1972 = vrot.lane.b32.xlu1 %v1616_v17, %s4535_s30  ;;  %v1626_v36 = vsel %vm5244_vm10, %v4448_v38, %v1625_v27  ;;  %v1631_v17 = vrot.slane %v5565_v37, 7  ;;  %8101 = vst [vmem:[#allocation39_spill] sm:$0xff] %v5597_v51  ;;  %v1637_v27 = vrot.slane %v5593_v45, 7  ;;  %v5601_v38 = vrot.slane %v5565_v37, 6 }
 0x213   : > { %v1643_v47 = vrot.slane %v5597_v51, 7  ;;  %v7828_v14 = vrot.slane %v5597_v51, 2  ;;  %v5624_v56 = vrot.slane %v5597_v51, 6 }
 0x214   : > { %v1633_v25 = vrot.slane %v1631_v17, 2  ;;  %8102 = vst [vmem:[#allocation40_spill] sm:$0xff] %v5601_v38 }
 0x215   : > { %v1650_v41 = vrot.slane %v5624_v56, 7 }
 0x216   : > { %v1635_v49 = vsel %vm5244_vm10, %v1633_v25, %v1634_v6  ;;  %v1645_v6 = vrot.slane %v1643_v47, 2  ;;  %v1646_v25 = vrot.slane %v7828_v14, 7  ;;  %v5639_v14 = vrot.slane %v5605_v32, 2 }
 0x218   : > { %v5595_v21 = vpop.permute.xlu2 %1914  ;;  %v1647_v22 = vsel %vm5244_vm10, %v1645_v6, %v1646_v25  ;;  %8107 = vst [vmem:[#allocation45_spill] sm:$0xff] %v5639_v14  ;;  %v5654_v6 = vrot.slane %v5605_v32, 4  ;;  %v1652_v25 = vrot.slane %v1650_v41, 2 }
 0x21a   : > { %1980 = vrot.lane.b32.xlu2 %v1629_v28, %s4535_s30  ;;  %1978 = vrot.lane.b32.xlu1 %v1626_v36, %s4535_s30  ;;  %v1632_v28 = vsel %vm5244_vm10, %v1630_v62, %v1631_v17  ;;  %v1638_v36 = vsel %vm5244_vm10, %v1636_v8, %v1637_v27  ;;  %v1640_v17 = vrot.slane %v5601_v38, 7  ;;  %v5619_v62 = vpop.permute.xlu1 %1900  ;;  %v1639_v8 = vrot.slane %v1637_v27, 2  ;;  %8113 = vst [vmem:[#allocation50_spill] sm:$0xff] %v5654_v6 }
 0x21b   : > { %1982 = vrot.lane.b32.xlu0 %v1632_v28, %s4535_s30  ;;  %8105 = vst [vmem:[#allocation43_spill] sm:$0xff] %v5619_v62 }
 0x21c   : > { %v1642_v43 = vrot.slane %v1640_v17, 2 }
 0x21e   : > { %v1644_v27 = vsel %vm5244_vm10, %v1642_v43, %v1643_v47  ;;  %v8112_v43 = vrot.slane %v5597_v51, 4 }
 0x220   : > { %v4449_v47 = vrot.slane %v8112_v43, 9 }
 0x222   : > { %1986 = vrot.lane.b32.xlu2 %v1638_v36, %s4535_s30  ;;  %1984 = vrot.lane.b32.xlu1 %v1635_v49, %s4535_s30  ;;  %v1641_v49 = vsel %vm5244_vm10, %v1639_v8, %v1640_v17  ;;  %v5643_v17 = vpop.f32.mrf.mxu1  ;;  %v5645_v8 = vpop.permute.xlu0 %1904  ;;  %v1651_v0 = vsel %vm5244_vm10, %v4449_v47, %v1650_v41 }
 0x223   : > { %1988 = vrot.lane.b32.xlu0 %v1641_v49, %s4535_s30  ;;  %8108 = vst [vmem:[#allocation46_spill] sm:$0xff] %v5643_v17  ;;  %v5647_v49 = vpop.permute.xlu1 %1906  ;;  %v7847_v38 = vrot.slane %v5643_v17, 4 }
 0x224   : > { %v5621_v28 = vpop.permute.xlu2 %1920  ;;  %8109 = vst [vmem:[#allocation47_spill] sm:$0xff] %v5645_v8 }
 0x225   : > { %8106 = vst [vmem:[#allocation44_spill] sm:$0xff] %v5621_v28 }
 0x226   : > { %8110 = vst [vmem:[#allocation48_spill] sm:$0xff] %v5647_v49  ;;  %v1659_v49 = vrot.slane %v5654_v6, 7 }
 0x228   : > { %v1661_v47 = vrot.slane %v1659_v49, 2 }
 0x22a   : > { %1990 = vrot.lane.b32.xlu1 %v1644_v27, %s4535_s30  ;;  %1992 = vrot.lane.b32.xlu2 %v1647_v22, %s4535_s30  ;;  %v1656_v27 = vrot.slane %v5639_v14, 7  ;;  %v5658_v22 = vrot.slane %v5605_v32, 6  ;;  %v5670_v8 = vpop.permute.xlu0 %1910 }
 0x22b   : > { %1994 = vrot.lane.b32.xlu0 %v1651_v0, %s4535_s30  ;;  %8115 = vst [vmem:[#allocation52_spill] sm:$0xff] %v5670_v8 }
 0x22c   : > { %v5649_v36 = vpop.permute.xlu2 %1926  ;;  %8114 = vst [vmem:[#allocation51_spill] sm:$0xff] %v5658_v22  ;;  %v1657_v43 = vsel %vm5244_vm10, %v1655_v12, %v1656_v27  ;;  %v1662_v28 = vrot.slane %v5658_v22, 7  ;;  %v1658_v0 = vrot.slane %v1656_v27, 2  ;;  %v1665_v12 = vrot.slane %v5643_v17, 7 }
 0x22d   : > { %8111 = vst [vmem:[#allocation49_spill] sm:$0xff] %v5649_v36  ;;  %v1654_v36 = vsel %vm5244_vm10, %v1652_v25, %v1653_v54  ;;  %v5678_v54 = vrot.slane %v5643_v17, 2  ;;  %v5681_v25 = vpop.f32.mrf.mxu1 }
 0x22f   : > { %8118 = vst [vmem:[#allocation55_spill] sm:$0xff] %v5678_v54  ;;  %v1668_v8 = vrot.slane %v5678_v54, 7  ;;  %v1671_v54 = vrot.slane %v7847_v38, 7 }
 0x232   : > { %1996 = vrot.lane.b32.xlu1 %v1654_v36, %s4535_s30  ;;  %1998 = vrot.lane.b32.xlu2 %v1657_v43, %s4535_s30  ;;  %v1664_v36 = vrot.slane %v1662_v28, 2  ;;  %v1660_v43 = vsel %vm5244_vm10, %v1658_v0, %v1659_v49  ;;  %v5693_v40 = vpop.permute.xlu0 %1916  ;;  %v7848_v49 = vrot.slane %v5643_v17, 6 }
 0x233   : > { %2000 = vrot.lane.b32.xlu0 %v1660_v43, %s4535_s30  ;;  %8119 = vst [vmem:[#allocation56_spill] sm:$0xff] %v5693_v40 }
 0x234   : > { %v5673_v31 = vpop.permute.xlu1 %1912  ;;  %v5675_v41 = vpop.permute.xlu2 %1932  ;;  %v1666_v27 = vsel %vm5244_vm10, %v1664_v36, %v1665_v12  ;;  %v5705_v36 = vrot.slane %v5681_v25, 4  ;;  %v4450_v57 = vrot.slane %v7848_v49, 9  ;;  %v5726_v49 = vrot.slane %v5681_v25, 6 }
 0x235   : > { %8116 = vst [vmem:[#allocation53_spill] sm:$0xff] %v5673_v31  ;;  %v1663_v31 = vsel %vm5244_vm10, %v1661_v47, %v1662_v28  ;;  %v1667_v28 = vrot.slane %v1665_v12, 2  ;;  %v5702_v47 = vrot.slane %v5681_v25, 2  ;;  %v5712_v16 = vpop.f32.mrf.mxu1 }
 0x236   : > { %8117 = vst [vmem:[#allocation54_spill] sm:$0xff] %v5675_v41  ;;  %v1681_v38 = vrot.slane %v5705_v36, 7 }
 0x237   : > { %8122 = vst [vmem:[#allocation59_spill] sm:$0xff] %v5702_v47  ;;  %v1669_v12 = vsel %vm5244_vm10, %v1667_v28, %v1668_v8  ;;  %v1678_v22 = vrot.slane %v5702_v47, 7 }
 0x238   : > { %8123 = vst [vmem:[#allocation60_spill] sm:$0xff] %v5705_v36 }
 0x239   : > { %8124 = vst [vmem:[#allocation61_spill] sm:$0xff] %v5712_v16  ;;  %v1680_v35 = vrot.slane %v1678_v22, 2 }
 0x23a   : > { %2002 = vrot.lane.b32.xlu1 %v1663_v31, %s4535_s30  ;;  %2004 = vrot.lane.b32.xlu2 %v1666_v27, %s4535_s30  ;;  %v1670_v31 = vrot.slane %v1668_v8, 2  ;;  %v1675_v27 = vrot.slane %v5681_v25, 7  ;;  %8125 = vst [vmem:[#allocation62_spill] sm:$0xff] %v5726_v49  ;;  %v5728_v8 = vpop.permute.xlu0 %1922 }
 0x23b   : > { %2006 = vrot.lane.b32.xlu0 %v1669_v12, %s4535_s30  ;;  %8126 = vst [vmem:[#allocation63_spill] sm:$0xff] %v5728_v8 }
 0x23c   : > { %v5697_v0 = vpop.permute.xlu1 %1918  ;;  %v5699_v43 = vpop.permute.xlu2 %1938  ;;  %v1676_v34 = vsel %vm5244_vm10, %v4450_v57, %v1675_v27  ;;  %v5735_v57 = vrot.slane %v5712_v16, 2 }
 0x23d   : > { %8120 = vst [vmem:[#allocation57_spill] sm:$0xff] %v5697_v0  ;;  %v1684_v0 = vrot.slane %v5726_v49, 7  ;;  %v5747_v8 = vpop.f32.mrf.mxu1 }
 0x23e   : > { %8121 = vst [vmem:[#allocation58_spill] sm:$0xff] %v5699_v43  ;;  %v1672_v43 = vsel %vm5244_vm10, %v1670_v31, %v1671_v54  ;;  %v1677_v54 = vrot.slane %v1675_v27, 2  ;;  %v1683_v31 = vrot.slane %v1681_v38, 2  ;;  %v1687_v27 = vrot.slane %v5712_v16, 7 }
 0x23f   : > { %8129 = vst [vmem:[#allocation66_spill] sm:$0xff] %v5735_v57  ;;  %v1686_v45 = vrot.slane %v1684_v0, 2 }
 0x240   : > { %8130 = vst [vmem:[#allocation67_spill] sm:$0xff] %v5747_v8  ;;  %v1689_v55 = vrot.slane %v1687_v27, 2 }
 0x242   : > { %2008 = vrot.lane.b32.xlu1 %v1672_v43, %s4535_s30  ;;  %2010 = vrot.lane.b32.xlu2 %v1676_v34, %s4535_s30  ;;  %v1679_v34 = vsel %vm5244_vm10, %v1677_v54, %v1678_v22  ;;  %v1685_v43 = vsel %vm5244_vm10, %v1683_v31, %v1684_v0  ;;  %v5752_v22 = vrot.slane %v5712_v16, 4  ;;  %v5754_v54 = vpop.f32.mrf.mxu2  ;;  %v7863_v0 = vrot.slane %v5712_v16, 6 }
 0x243   : > { %2012 = vrot.lane.b32.xlu0 %v1679_v34, %s4535_s30  ;;  %8132 = vst [vmem:[#allocation69_spill] sm:$0xff] %v5754_v54  ;;  %v5756_v34 = vpop.permute.xlu0 %1928 }
 0x244   : > { %v5730_v28 = vpop.permute.xlu1 %1924  ;;  %v5732_v12 = vpop.permute.xlu2 %1944  ;;  %8131 = vst [vmem:[#allocation68_spill] sm:$0xff] %v5752_v22 }
 0x245   : > { %8127 = vst [vmem:[#allocation64_spill] sm:$0xff] %v5730_v28  ;;  %v1682_v28 = vsel %vm5244_vm10, %v1680_v35, %v1681_v38  ;;  %v5763_v38 = vrot.slane %v5747_v8, 2 }
 0x246   : > { %8128 = vst [vmem:[#allocation65_spill] sm:$0xff] %v5732_v12  ;;  %v1690_v12 = vrot.slane %v5735_v57, 7 }
 0x247   : > { %8133 = vst [vmem:[#allocation70_spill] sm:$0xff] %v5756_v34 }
 0x248   : > { %8136 = vst [vmem:[#allocation73_spill] sm:$0xff] %v5763_v38  ;;  %v1692_v57 = vrot.slane %v1690_v12, 2  ;;  %v1691_v52 = vsel %vm5244_vm10, %v1689_v55, %v1690_v12  ;;  %v5788_v12 = vpop.f32.mrf.mxu1 }
 0x249   : > { %8141 = vst [vmem:[#allocation78_spill] sm:$0xff] %v5788_v12  ;;  %v1709_v16 = vrot.slane %v5788_v12, 7 }
 0x24a   : > { %2016 = vrot.lane.b32.xlu2 %v1685_v43, %s4535_s30  ;;  %2014 = vrot.lane.b32.xlu1 %v1682_v28, %s4535_s30  ;;  %v1693_v43 = vrot.slane %v5752_v22, 7  ;;  %v1688_v28 = vsel %vm5244_vm10, %v1686_v45, %v1687_v27  ;;  %v5778_v22 = vrot.slane %v5747_v8, 4  ;;  %v5786_v29 = vpop.f32.mrf.mxu2 }
 0x24b   : > { %2018 = vrot.lane.b32.xlu0 %v1688_v28, %s4535_s30  ;;  %v5780_v45 = vpop.permute.xlu0 %1934  ;;  %8140 = vst [vmem:[#allocation77_spill] sm:$0xff] %v5786_v29  ;;  %v1711_v13 = vrot.slane %v1709_v16, 2 }
 0x24c   : > { %v5758_v31 = vpop.permute.xlu1 %1930  ;;  %v5760_v35 = vpop.permute.xlu2 %1950  ;;  %v1694_v34 = vsel %vm5244_vm10, %v1692_v57, %v1693_v43  ;;  %8137 = vst [vmem:[#allocation74_spill] sm:$0xff] %v5780_v45  ;;  %v1695_v57 = vrot.slane %v1693_v43, 2  ;;  %v1703_v41 = vrot.slane %v5778_v22, 7  ;;  %v4451_v45 = vrot.slane %v5747_v8, 9 }
 0x24d   : > { %8134 = vst [vmem:[#allocation71_spill] sm:$0xff] %v5758_v31  ;;  %v5800_v43 = vrot.slane %v5788_v12, 2  ;;  %v5984_v31 = vpop.f32.mrf.mxu3 }
 0x24e   : > { %8135 = vst [vmem:[#allocation72_spill] sm:$0xff] %v5760_v35  ;;  %v1700_v35 = vrot.slane %v5763_v38, 7 }
 0x24f   : > { %8143 = vst [vmem:[#allocation80_spill] sm:$0xff] %v5800_v43 }
 0x250   : > { %v1702_v55 = vrot.slane %v1700_v35, 2 }
 0x252   : > { %2022 = vrot.lane.b32.xlu2 %v1694_v34, %s4535_s30  ;;  %2020 = vrot.lane.b32.xlu1 %v1691_v52, %s4535_s30  ;;  %v1696_v52 = vrot.slane %v7863_v0, 7  ;;  %v5793_v34 = vrot.slane %v5747_v8, 6  ;;  %v1701_v0 = vsel %vm5244_vm10, %v4451_v45, %v1700_v35  ;;  %v1712_v35 = vrot.slane %v5800_v43, 7 }
 0x253   : > { %v5810_v6 = vpop.permute.xlu0 %1940  ;;  %v5822_v45 = vrot.slane %v5788_v12, 6  ;;  %v7899_v8 = vrot.slane %v5754_v54, 4 }
 0x254   : > { %v5782_v27 = vpop.permute.xlu1 %1936  ;;  %v5784_v28 = vpop.permute.xlu2 %1956  ;;  %8142 = vst [vmem:[#allocation79_spill] sm:$0xff] %v5793_v34  ;;  %v1713_v63 = vsel %vm5244_vm10, %v1711_v13, %v1712_v35 }
 0x255   : > { %8138 = vst [vmem:[#allocation75_spill] sm:$0xff] %v5782_v27  ;;  %v1697_v27 = vsel %vm5244_vm10, %v1695_v57, %v1696_v52  ;;  %v1706_v57 = vrot.slane %v5793_v34, 7  ;;  %v1718_v62 = vrot.slane %v5822_v45, 7  ;;  %v6020_v34 = vpop.f32.mrf.mxu3 }
 0x256   : > { %8139 = vst [vmem:[#allocation76_spill] sm:$0xff] %v5784_v28  ;;  %2024 = vrot.lane.b32.xlu0 %v1697_v27, %s4535_s30  ;;  %v1704_v28 = vsel %vm5244_vm10, %v1702_v55, %v1703_v41  ;;  %v1705_v27 = vrot.slane %v1703_v41, 2  ;;  %v5818_v55 = vrot.slane %v5788_v12, 4 }
 0x257   : > { %8144 = vst [vmem:[#allocation81_spill] sm:$0xff] %v5810_v6  ;;  %v5826_v6 = vpop.f32.mrf.mxu1 }
 0x258   : > { %8146 = vst [vmem:[#allocation83_spill] sm:$0xff] %v5818_v55  ;;  %v1715_v43 = vrot.slane %v5818_v55, 7  ;;  %v1721_v13 = vrot.slane %v5826_v6, 7 }
 0x259   : > { %8147 = vst [vmem:[#allocation84_spill] sm:$0xff] %v5822_v45 }
 0x25a   : > { %2028 = vrot.lane.b32.xlu2 %v1704_v28, %s4535_s30  ;;  %2026 = vrot.lane.b32.xlu1 %v1701_v0, %s4535_s30  ;;  %v5824_v28 = vpop.f32.mrf.mxu2  ;;  %v1708_v0 = vrot.slane %v1706_v57, 2  ;;  %8149 = vst [vmem:[#allocation86_spill] sm:$0xff] %v5826_v6 }
 0x25b   : > { %8148 = vst [vmem:[#allocation85_spill] sm:$0xff] %v5824_v28  ;;  %v5838_v12 = vpop.permute.xlu0 %1946  ;;  %v5966_v17 = vrot.slane %v5824_v28, 2 }
 0x25c   : > { %v5813_v52 = vpop.permute.xlu1 %1942  ;;  %v5815_v60 = vpop.permute.xlu2 %1962  ;;  %v1710_v41 = vsel %vm5244_vm10, %v1708_v0, %v1709_v16  ;;  %8150 = vst [vmem:[#allocation87_spill] sm:$0xff] %v5838_v12  ;;  %v5846_v16 = vrot.slane %v5826_v6, 4  ;;  %v5850_v0 = vrot.slane %v5826_v6, 6 }
 0x25d   : > { %8145 = vst [vmem:[#allocation82_spill] sm:$0xff] %v5813_v52  ;;  %v1707_v52 = vsel %vm5244_vm10, %v1705_v27, %v1706_v57  ;;  %v1717_v27 = vrot.slane %v1715_v43, 2  ;;  %v6058_v15 = vpop.f32.mrf.mxu3 }
 0x25e   : > { %2030 = vrot.lane.b32.xlu0 %v1707_v52, %s4535_s30  ;;  %v1714_v52 = vrot.slane %v1712_v35, 2  ;;  %8153 = vst [vmem:[#allocation90_spill] sm:$0xff] %v5846_v16 }
 0x25f   : > { %v1719_v35 = vsel %vm5244_vm10, %v1717_v27, %v1718_v62  ;;  %v5863_v40 = vpop.f32.mrf.mxu1  ;;  %8179 = vst [vmem:[#allocation114_spill] sm:$0xff] %v5966_v17 }
 0x260   : > { %v1716_v45 = vsel %vm5244_vm10, %v1714_v52, %v1715_v43  ;;  %8155 = vst [vmem:[#allocation92_spill] sm:$0xff] %v5863_v40  ;;  %v1728_v43 = vrot.slane %v5850_v0, 7  ;;  %v5895_v46 = vrot.slane %v5863_v40, 6 }
 0x261   : > { %8189 = vst [vmem:[#allocation124_spill] sm:$0xff] %v6020_v34 }
 0x262   : > { %2032 = vrot.lane.b32.xlu1 %v1710_v41, %s4535_s30  ;;  %2034 = vrot.lane.b32.xlu2 %v1713_v63, %s4535_s30  ;;  %v1720_v41 = vrot.slane %v1718_v62, 2  ;;  %v5855_v55 = vpop.f32.mrf.mxu2  ;;  %v8159_v62 = vrot.slane %v5826_v6, 2  ;;  %v1730_v10 = vrot.slane %v1728_v43, 2  ;;  %8162 = vst [vmem:[#allocation98_spill] sm:$0xff] %v5895_v46 }
 0x263   : > { %8154 = vst [vmem:[#allocation91_spill] sm:$0xff] %v5855_v55  ;;  %v5867_v63 = vpop.permute.xlu0 %1952 }
 0x264   : > { %v5841_v49 = vpop.permute.xlu1 %1948  ;;  %v5843_v57 = vpop.permute.xlu2 %1968  ;;  %8156 = vst [vmem:[#allocation93_spill] sm:$0xff] %v5867_v63  ;;  %v4452_v27 = vrot.slane %v8159_v62, 9 }
 0x265   : > { %8151 = vst [vmem:[#allocation88_spill] sm:$0xff] %v5841_v49  ;;  %v1725_v49 = vrot.slane %v5846_v16, 7 }
 0x266   : > { %8152 = vst [vmem:[#allocation89_spill] sm:$0xff] %v5843_v57  ;;  %2036 = vrot.lane.b32.xlu0 %v1716_v45, %s4535_s30  ;;  %v1722_v57 = vsel %vm5244_vm10, %v1720_v41, %v1721_v13  ;;  %v5877_v13 = vrot.slane %v5863_v40, 2  ;;  %v5880_v41 = vrot.slane %v5863_v40, 4 }
 0x267   : > { %v1726_v63 = vsel %vm5244_vm10, %v4452_v27, %v1725_v49 }
 0x268   : > { %8160 = vst [vmem:[#allocation96_spill] sm:$0xff] %v5877_v13  ;;  %v1737_v59 = vrot.slane %v5880_v41, 7 }
 0x269   : > { %8161 = vst [vmem:[#allocation97_spill] sm:$0xff] %v5880_v41  ;;  %v1740_v41 = vrot.slane %v5895_v46, 7 }
 0x26a   : > { %2038 = vrot.lane.b32.xlu1 %v1719_v35, %s4535_s30  ;;  %2040 = vrot.lane.b32.xlu2 %v1722_v57, %s4535_s30  ;;  %v1727_v35 = vrot.slane %v1725_v49, 2  ;;  %v1731_v57 = vrot.slane %v5863_v40, 7  ;;  %v5897_v49 = vpop.f32.mrf.mxu2 }
 0x26b   : > { %8163 = vst [vmem:[#allocation99_spill] sm:$0xff] %v5897_v49 }
 0x26c   : > { %v5870_v52 = vpop.permute.xlu1 %1954  ;;  %v5872_v45 = vpop.permute.xlu2 %1974  ;;  %v1732_v62 = vsel %vm5244_vm10, %v1730_v10, %v1731_v57  ;;  %v1733_v10 = vrot.slane %v1731_v57, 2 }
 0x26d   : > { %8157 = vst [vmem:[#allocation94_spill] sm:$0xff] %v5870_v52  ;;  %v1734_v52 = vrot.slane %v5877_v13, 7 }
 0x26e   : > { %8158 = vst [vmem:[#allocation95_spill] sm:$0xff] %v5872_v45  ;;  %2042 = vrot.lane.b32.xlu0 %v1726_v63, %s4535_s30  ;;  %v1729_v45 = vsel %vm5244_vm10, %v1727_v35, %v1728_v43  ;;  %v5899_v63 = vpop.permute.xlu0 %1958  ;;  %v1739_v35 = vrot.slane %v1737_v59, 2 }
 0x26f   : > { %8164 = vst [vmem:[#allocation100_spill] sm:$0xff] %v5899_v63  ;;  %v1736_v13 = vrot.slane %v1734_v52, 2  ;;  %v1743_v63 = vrot.slane %v5754_v54, 7 }
 0x271   : > { %v1738_v57 = vsel %vm5244_vm10, %v1736_v13, %v1737_v59  ;;  %v5930_v59 = vrot.slane %v5786_v29, 2 }
 0x272   : > { %2044 = vrot.lane.b32.xlu1 %v1729_v45, %s4535_s30  ;;  %2046 = vrot.lane.b32.xlu2 %v1732_v62, %s4535_s30  ;;  %v5907_v45 = vrot.slane %v5754_v54, 6  ;;  %v1735_v62 = vsel %vm5244_vm10, %v1733_v10, %v1734_v52  ;;  %v5932_v13 = vpop.f32.mrf.mxu2 }
 0x273   : > { %8171 = vst [vmem:[#allocation107_spill] sm:$0xff] %v5930_v59 }
 0x274   : > { %v5901_v27 = vpop.permute.xlu1 %1960  ;;  %v5903_v43 = vpop.permute.xlu2 %1980  ;;  %8167 = vst [vmem:[#allocation103_spill] sm:$0xff] %v5907_v45  ;;  %v1750_v46 = vrot.slane %v5907_v45, 7 }
 0x275   : > { %8165 = vst [vmem:[#allocation101_spill] sm:$0xff] %v5901_v27  ;;  %v1741_v27 = vsel %vm5244_vm10, %v1739_v35, %v1740_v41  ;;  %v4453_v35 = vrot.slane %v7899_v8, 9 }
 0x276   : > { %8166 = vst [vmem:[#allocation102_spill] sm:$0xff] %v5903_v43  ;;  %2048 = vrot.lane.b32.xlu0 %v1735_v62, %s4535_s30  ;;  %v5921_v43 = vpop.permute.xlu0 %1964  ;;  %v1742_v62 = vrot.slane %v1740_v41, 2 }
 0x277   : > { %8168 = vst [vmem:[#allocation104_spill] sm:$0xff] %v5921_v43  ;;  %v1751_v41 = vsel %vm5244_vm10, %v4453_v35, %v1750_v46  ;;  %v1756_v43 = vrot.slane %v5930_v59, 7 }
 0x279   : > { %v1758_v35 = vrot.slane %v1756_v43, 2 }
 0x27a   : > { %2052 = vrot.lane.b32.xlu2 %v1741_v27, %s4535_s30  ;;  %2050 = vrot.lane.b32.xlu1 %v1738_v57, %s4535_s30  ;;  %v1745_v27 = vrot.slane %v1743_v63, 2  ;;  %v8172_v57 = vrot.slane %v5754_v54, 2  ;;  %v5960_v59 = vpop.f32.mrf.mxu2 }
 0x27b   : > { %8178 = vst [vmem:[#allocation113_spill] sm:$0xff] %v5960_v59 }
 0x27c   : > { %v5923_v52 = vpop.permute.xlu1 %1966  ;;  %v5925_v10 = vpop.permute.xlu2 %1986  ;;  %v1746_v51 = vrot.slane %v8172_v57, 7  ;;  %v5949_v57 = vrot.slane %v5786_v29, 4 }
 0x27d   : > { %8169 = vst [vmem:[#allocation105_spill] sm:$0xff] %v5923_v52  ;;  %v1744_v52 = vsel %vm5244_vm10, %v1742_v62, %v1743_v63 }
 0x27e   : > { %8170 = vst [vmem:[#allocation106_spill] sm:$0xff] %v5925_v10  ;;  %2054 = vrot.lane.b32.xlu0 %v1744_v52, %s4535_s30  ;;  %v1747_v8 = vsel %vm5244_vm10, %v1745_v27, %v1746_v51  ;;  %v1753_v10 = vrot.slane %v5786_v29, 7  ;;  %v5951_v63 = vpop.permute.xlu0 %1970  ;;  %v1752_v51 = vrot.slane %v1750_v46, 2  ;;  %v5958_v27 = vrot.slane %v5786_v29, 6 }
 0x27f   : > { %8173 = vst [vmem:[#allocation108_spill] sm:$0xff] %v5949_v57 }
 0x280   : > { %8174 = vst [vmem:[#allocation109_spill] sm:$0xff] %v5951_v63  ;;  %v1755_v6 = vrot.slane %v1753_v10, 2 }
 0x281   : > { %8177 = vst [vmem:[#allocation112_spill] sm:$0xff] %v5958_v27 }
 0x282   : > { %2058 = vrot.lane.b32.xlu2 %v1751_v41, %s4535_s30  ;;  %2056 = vrot.lane.b32.xlu1 %v1747_v8, %s4535_s30  ;;  %v1759_v41 = vrot.slane %v5949_v57, 7  ;;  %v1754_v8 = vsel %vm5244_vm10, %v1752_v51, %v1753_v10  ;;  %v1757_v46 = vsel %vm5244_vm10, %v1755_v6, %v1756_v43  ;;  %v1762_v10 = vrot.slane %v5958_v27, 7 }
 0x284   : > { %v5953_v52 = vpop.permute.xlu1 %1972  ;;  %v5955_v62 = vpop.permute.xlu2 %1992  ;;  %v1764_v6 = vrot.slane %v1762_v10, 2 }
 0x285   : > { %8175 = vst [vmem:[#allocation110_spill] sm:$0xff] %v5953_v52  ;;  %v1765_v52 = vrot.slane %v5824_v28, 7 }
 0x286   : > { %8176 = vst [vmem:[#allocation111_spill] sm:$0xff] %v5955_v62  ;;  %2060 = vrot.lane.b32.xlu0 %v1754_v8, %s4535_s30  ;;  %v1760_v62 = vsel %vm5244_vm10, %v1758_v35, %v1759_v41  ;;  %v5976_v63 = vpop.permute.xlu0 %1976  ;;  %v1761_v8 = vrot.slane %v1759_v41, 2  ;;  %v1768_v35 = vrot.slane %v5966_v17, 7  ;;  %v1775_v17 = vrot.slane %v5855_v55, 7 }
 0x287   : > { %8180 = vst [vmem:[#allocation115_spill] sm:$0xff] %v5976_v63  ;;  %v1767_v59 = vrot.slane %v1765_v52, 2  ;;  %v1766_v63 = vsel %vm5244_vm10, %v1764_v6, %v1765_v52  ;;  %v6010_v6 = vrot.slane %v5855_v55, 4 }
 0x288   : > { %v1763_v43 = vsel %vm5244_vm10, %v1761_v8, %v1762_v10  ;;  %v7917_v10 = vrot.slane %v5824_v28, 4  ;;  %v1770_v52 = vrot.slane %v1768_v35, 2 }
 0x289   : > { %v1769_v41 = vsel %vm5244_vm10, %v1767_v59, %v1768_v35  ;;  %8187 = vst [vmem:[#allocation122_spill] sm:$0xff] %v6010_v6  ;;  %v1777_v59 = vrot.slane %v1775_v17, 2 }
 0x28a   : > { %2064 = vrot.lane.b32.xlu2 %v1760_v62, %s4535_s30  ;;  %2062 = vrot.lane.b32.xlu1 %v1757_v46, %s4535_s30  ;;  %v5989_v62 = vrot.slane %v5855_v55, 2  ;;  %v5991_v46 = vpop.f32.mrf.mxu2 }
 0x28b   : > { %8183 = vst [vmem:[#allocation118_spill] sm:$0xff] %v5991_v46 }
 0x28c   : > { %v5979_v51 = vpop.permute.xlu1 %1978  ;;  %v5981_v57 = vpop.permute.xlu2 %1998  ;;  %8182 = vst [vmem:[#allocation117_spill] sm:$0xff] %v5989_v62  ;;  %v1778_v58 = vrot.slane %v5989_v62, 7 }
 0x28d   : > { %8181 = vst [vmem:[#allocation116_spill] sm:$0xff] %v5981_v57  ;;  %v7918_v57 = vrot.slane %v5824_v28, 6 }
 0x28e   : > { %2066 = vrot.lane.b32.xlu0 %v1763_v43, %s4535_s30  ;;  %v6002_v8 = vpop.permute.xlu0 %1982 }
 0x28f   : > { %8184 = vst [vmem:[#allocation119_spill] sm:$0xff] %v6002_v8  ;;  %v4454_v8 = vrot.slane %v7918_v57, 9 }
 0x292   : > { %2068 = vrot.lane.b32.xlu1 %v1766_v63, %s4535_s30  ;;  %2070 = vrot.lane.b32.xlu2 %v1769_v41, %s4535_s30  ;;  %v1771_v63 = vrot.slane %v7917_v10, 7  ;;  %v6016_v41 = vrot.slane %v5855_v55, 6  ;;  %v1781_v10 = vrot.slane %v6010_v6, 7  ;;  %v6032_v57 = vpop.f32.mrf.mxu2 }
 0x294   : > { %v6005_v27 = vpop.permute.xlu1 %1984  ;;  %v6007_v43 = vpop.permute.xlu2 %2004  ;;  %8188 = vst [vmem:[#allocation123_spill] sm:$0xff] %v6016_v41  ;;  %v1772_v35 = vsel %vm5244_vm10, %v1770_v52, %v1771_v63  ;;  %v1784_v52 = vrot.slane %v6016_v41, 7 }
 0x295   : > { %8185 = vst [vmem:[#allocation120_spill] sm:$0xff] %v6005_v27  ;;  %v1779_v27 = vsel %vm5244_vm10, %v1777_v59, %v1778_v58  ;;  %v7926_v59 = vrot.slane %v5897_v49, 7 }
 0x296   : > { %8186 = vst [vmem:[#allocation121_spill] sm:$0xff] %v6007_v43  ;;  %2072 = vrot.lane.b32.xlu0 %v1772_v35, %s4535_s30  ;;  %v1776_v43 = vsel %vm5244_vm10, %v4454_v8, %v1775_v17  ;;  %v6034_v14 = vpop.permute.xlu0 %1988  ;;  %v1780_v17 = vrot.slane %v1778_v58, 2  ;;  %v1783_v8 = vrot.slane %v1781_v10, 2  ;;  %v1786_v20 = vrot.slane %v1784_v52, 2 }
 0x297   : > { %8190 = vst [vmem:[#allocation125_spill] sm:$0xff] %v6034_v14  ;;  %v6049_v14 = vrot.slane %v5932_v13, 2 }
 0x298   : > { %v1785_v58 = vsel %vm5244_vm10, %v1783_v8, %v1784_v52  ;;  %v8196_v52 = vrot.slane %v5991_v46, 2 }
 0x29a   : > { %2074 = vrot.lane.b32.xlu1 %v1776_v43, %s4535_s30  ;;  %2076 = vrot.lane.b32.xlu2 %v1779_v27, %s4535_s30  ;;  %v6044_v43 = vrot.slane %v5991_v46, 4  ;;  %v1782_v27 = vsel %vm5244_vm10, %v1780_v17, %v1781_v10  ;;  %v7929_v17 = vrot.slane %v6020_v34, 6  ;;  %v4456_v8 = vrot.slane %v8196_v52, 9 }
 0x29c   : > { %v6037_v63 = vpop.permute.xlu1 %1990  ;;  %v6039_v35 = vpop.permute.xlu2 %2010  ;;  %v1825_v49 = vrot.slane %v6044_v43, 7 }
 0x29d   : > { %8191 = vst [vmem:[#allocation126_spill] sm:$0xff] %v6037_v63  ;;  %v1788_v63 = vsel %vm5244_vm10, %v1786_v20, %v7926_v59  ;;  %v6072_v20 = vpop.f32.mrf.mxu2  ;;  %v7933_v59 = vrot.slane %v6049_v14, 7 }
 0x29e   : > { %8192 = vst [vmem:[#allocation127_spill] sm:$0xff] %v6039_v35  ;;  %2078 = vrot.lane.b32.xlu0 %v1782_v27, %s4535_s30  ;;  %v6062_v10 = vpop.permute.xlu0 %1994  ;;  %v7932_v52 = vrot.slane %v6072_v20, 4 }
 0x29f   : > { %8193 = vst [vmem:[#allocation128_spill] sm:$0xff] %v6062_v10  ;;  %v4458_v10 = vrot.slane %v7929_v17, 9 }
 0x2a2   : > { %2080 = vrot.lane.b32.xlu1 %v1785_v58, %s4535_s30  ;;  %2082 = vrot.lane.b32.xlu2 %v1788_v63, %s4535_s30  ;;  %v1875_v58 = vrot.slane %v6058_v15, 7  ;;  %v4455_v63 = vrot.slane %v5932_v13, 9 }
 0x2a4   : > { %v6065_v41 = vpop.permute.xlu1 %1996  ;;  %v6067_v27 = vpop.permute.xlu2 %2016  ;;  %v1801_v35 = vsel %vm5244_vm10, %v4455_v63, %v7933_v59  ;;  %v1876_v48 = vsel %vm5244_vm10, %v4458_v10, %v1875_v58 }
 0x2a5   : > { %8194 = vst [vmem:[#allocation129_spill] sm:$0xff] %v6065_v41  ;;  %v6080_v41 = vrot.slane %v6072_v20, 6 }
 0x2a6   : > { %8195 = vst [vmem:[#allocation130_spill] sm:$0xff] %v6067_v27  ;;  %v1826_v27 = vsel %vm5244_vm10, %v4456_v8, %v1825_v49  ;;  %v6094_v17 = vpop.permute.xlu0 %2000 }
 0x2a7   : > { %8197 = vst [vmem:[#allocation131_spill] sm:$0xff] %v6080_v41  ;;  %2106 = vrot.lane.b32.xlu0 %v1826_v27, %s4535_s30  ;;  %v4457_v27 = vrot.slane %v7932_v52, 9  ;;  %v1850_v12 = vrot.slane %v6080_v41, 7 }
 0x2a8   : > { %8198 = vst [vmem:[#allocation132_spill] sm:$0xff] %v6094_v17  ;;  %v1827_v17 = vrot.slane %v1825_v49, 2 }
 0x2a9   : > { %v1851_v63 = vsel %vm5244_vm10, %v4457_v27, %v1850_v12 }
 0x2aa   : > { %2090 = vrot.lane.b32.xlu2 %v1801_v35, %s4535_s30  ;;  %2138 = vrot.lane.b32.xlu1 %v1876_v48, %s4535_s30 }
 0x2ac   : > { %v6096_v34 = vpop.permute.xlu1 %2002  ;;  %v6098_v8 = vpop.permute.xlu2 %2022 }
 0x2ad   : > { %8199 = vst [vmem:[#allocation133_spill] sm:$0xff] %v6096_v34 }
 0x2ae   : > { %8200 = vst [vmem:[#allocation134_spill] sm:$0xff] %v6098_v8  ;;  %v6110_v48 = vpop.permute.xlu0 %2006 }
 0x2af   : > { %2122 = vrot.lane.b32.xlu0 %v1851_v63, %s4535_s30  ;;  %8201 = vst [vmem:[#allocation135_spill] sm:$0xff] %v6110_v48 }
 0x2b2   : > { %2458 = vrot.lane.b32.xlu2 %v5439_v30, %s4536_s6  ;;  %2426 = vrot.lane.b32.xlu1 %v5302_v61, %s4536_s6 }
 0x2b4   : > { %v6112_v35 = vpop.permute.xlu1 %2008  ;;  %v6114_v10 = vpop.permute.xlu2 %2028 }
 0x2b5   : > { %8202 = vst [vmem:[#allocation136_spill] sm:$0xff] %v6112_v35 }
 0x2b6   : > { %8203 = vst [vmem:[#allocation137_spill] sm:$0xff] %v6114_v10  ;;  %v6122_v27 = vpop.permute.xlu0 %2012  ;;  %v1877_v10 = vrot.slane %v1875_v58, 2 }
 0x2b7   : > { %2490 = vrot.lane.b32.xlu0 %v5553_v53, %s4536_s6 }
 0x2ba   : > { %2554 = vrot.lane.b32.xlu2 %v5846_v16, %s4536_s6  ;;  %2522 = vrot.lane.b32.xlu1 %v5681_v25, %s4536_s6 }
 0x2bc   : > { %v6124_v63 = vpop.permute.xlu1 %2014  ;;  %v6126_v52 = vpop.permute.xlu2 %2034 }
 0x2bd   : > { %8204 = vst [vmem:[#allocation138_spill] sm:$0xff] %v6124_v63 }
 0x2be   : > { %8205 = vst [vmem:[#allocation139_spill] sm:$0xff] %v6126_v52  ;;  %v6134_v59 = vpop.permute.xlu0 %2018 }
 0x2bf   : > { %2586 = vrot.lane.b32.xlu0 %v5855_v55, %s4536_s6  ;;  %8206 = vst [vmem:[#allocation140_spill] sm:$0xff] %v6134_v59  ;;  %v1852_v55 = vrot.slane %v1850_v12, 2 }
 0x2c2   : > { %2650 = vrot.lane.b32.xlu2 %v6058_v15, %s4536_s6  ;;  %2618 = vrot.lane.b32.xlu1 %v6044_v43, %s4536_s6 }
 0x2c4   : > { %v6136_v35 = vpop.permute.xlu1 %2020  ;;  %v6138_v48 = vpop.permute.xlu2 %2040 }
 0x2c5   : > { %8207 = vst [vmem:[#allocation141_spill] sm:$0xff] %v6136_v35 }
 0x2c6   : > { %8208 = vst [vmem:[#allocation142_spill] sm:$0xff] %v6138_v48  ;;  %v6159_v48 = vrot.slane %v5991_v46, 6 }
 0x2c7   : > { %2410 = vrot.lane.b32.xlu0 %v5229_v19, %s4536_s6 }
 0x2c8   : > { %v6146_v8 = vpop.permute.xlu0 %2024  ;;  %8211 = vst [vmem:[#allocation145_spill] sm:$0xff] %v6159_v48  ;;  %v1828_v63 = vrot.slane %v6159_v48, 7 }
 0x2c9   : > { %8209 = vst [vmem:[#allocation143_spill] sm:$0xff] %v6146_v8 }
 0x2ca   : > { %2474 = vrot.lane.b32.xlu2 %v5493_v50, %s4536_s6  ;;  %2442 = vrot.lane.b32.xlu1 %v5377_v7, %s4536_s6 }
 0x2cc   : > { %v6148_v52 = vpop.permute.xlu1 %2026  ;;  %v6150_v34 = vpop.permute.xlu2 %2046 }
 0x2cd   : > { %8210 = vst [vmem:[#allocation144_spill] sm:$0xff] %v6150_v34  ;;  %v6169_v34 = vrot.slane %v6058_v15, 2 }
 0x2cf   : > { %2506 = vrot.lane.b32.xlu0 %v5624_v56, %s4536_s6  ;;  %8215 = vst [vmem:[#allocation149_spill] sm:$0xff] %v6169_v34 }
 0x2d0   : > { %v6161_v35 = vpop.permute.xlu0 %2030 }
 0x2d1   : > { %8212 = vst [vmem:[#allocation146_spill] sm:$0xff] %v6161_v35 }
 0x2d2   : > { %2570 = vrot.lane.b32.xlu2 %v5907_v45, %s4536_s6  ;;  %2538 = vrot.lane.b32.xlu1 %v5763_v38, %s4536_s6  ;;  %v1829_v45 = vsel %vm5244_vm10, %v1827_v17, %v1828_v63  ;;  %v1878_v38 = vrot.slane %v6169_v34, 7  ;;  %v8219_v17 = vrot.slane %v6049_v14, 7 }
 0x2d4   : > { %v6163_v59 = vpop.permute.xlu1 %2032  ;;  %v6165_v8 = vpop.permute.xlu2 %2052  ;;  %v1802_v16 = vrot.slane %v8219_v17, 2  ;;  %v1879_v50 = vsel %vm5244_vm10, %v1877_v10, %v1878_v38 }
 0x2d5   : > { %8213 = vst [vmem:[#allocation147_spill] sm:$0xff] %v6163_v59  ;;  %v6179_v59 = vrot.slane %v5932_v13, 4 }
 0x2d6   : > { %8214 = vst [vmem:[#allocation148_spill] sm:$0xff] %v6165_v8 }
 0x2d7   : > { %2602 = vrot.lane.b32.xlu0 %v6049_v14, %s4536_s6  ;;  %8216 = vst [vmem:[#allocation150_spill] sm:$0xff] %v6179_v59 }
 0x2d8   : > { %v6181_v49 = vpop.permute.xlu0 %2036 }
 0x2d9   : > { %8217 = vst [vmem:[#allocation151_spill] sm:$0xff] %v6181_v49 }
 0x2da   : > { %2108 = vrot.lane.b32.xlu2 %v1829_v45, %s4535_s30  ;;  %2634 = vrot.lane.b32.xlu1 %v6080_v41, %s4536_s6  ;;  %v1853_v45 = vrot.slane %v5984_v31, 7  ;;  %v1803_v41 = vrot.slane %v6179_v59, 7 }
 0x2dc   : > { %v6183_v8 = vpop.permute.xlu1 %2038  ;;  %v6185_v35 = vpop.permute.xlu2 %2058  ;;  %v1804_v58 = vsel %vm5244_vm10, %v1802_v16, %v1803_v41 }
 0x2dd   : > { %8218 = vst [vmem:[#allocation152_spill] sm:$0xff] %v6183_v8  ;;  %v1854_v8 = vsel %vm5244_vm10, %v1852_v55, %v1853_v45 }
 0x2df   : > { %2140 = vrot.lane.b32.xlu0 %v1879_v50, %s4535_s30 }
 0x2e0   : > { %v6201_v12 = vpop.permute.xlu0 %2042 }
 0x2e2   : > { %2124 = vrot.lane.b32.xlu2 %v1854_v8, %s4535_s30  ;;  %2092 = vrot.lane.b32.xlu1 %v1804_v58, %s4535_s30 }
 0x2e4   : > { %v6203_v17 = vpop.permute.xlu1 %2044  ;;  %v6205_v49 = vpop.permute.xlu2 %2064 }
 0x2e5   : > { %8220 = vst [vmem:[#allocation153_spill] sm:$0xff] %v6205_v49 }
 0x2e7   : > { %2428 = vrot.lane.b32.xlu0 %v5319_v44, %s4536_s6 }
 0x2e8   : > { %v6213_v50 = vpop.permute.xlu0 %2048 }
 0x2e9   : > { %8221 = vst [vmem:[#allocation154_spill] sm:$0xff] %v6213_v50 }
 0x2ea   : > { %2492 = vrot.lane.b32.xlu2 %v5570_v1, %s4536_s6  ;;  %2460 = vrot.lane.b32.xlu1 %v5443_v4, %s4536_s6 }
 0x2ec   : > { %v6215_v55 = vpop.permute.xlu1 %2050  ;;  %v6217_v16 = vpop.permute.xlu2 %2070 }
 0x2ed   : > { %8222 = vst [vmem:[#allocation155_spill] sm:$0xff] %v6215_v55 }
 0x2ee   : > { %8223 = vst [vmem:[#allocation156_spill] sm:$0xff] %v6217_v16 }
 0x2ef   : > { %2524 = vrot.lane.b32.xlu0 %v5702_v47, %s4536_s6  ;;  %v6271_v47 = vrot.slane %v5984_v31, 2 }
 0x2f0   : > { %v6225_v8 = vpop.permute.xlu0 %2054 }
 0x2f1   : > { %8224 = vst [vmem:[#allocation157_spill] sm:$0xff] %v6225_v8 }
 0x2f2   : > { %2588 = vrot.lane.b32.xlu2 %v5989_v62, %s4536_s6  ;;  %2556 = vrot.lane.b32.xlu1 %v5850_v0, %s4536_s6 }
 0x2f4   : > { %v6227_v10 = vpop.permute.xlu1 %2056  ;;  %v6229_v58 = vpop.permute.xlu2 %2076 }
 0x2f5   : > { %8225 = vst [vmem:[#allocation158_spill] sm:$0xff] %v6227_v10 }
 0x2f7   : > { %2620 = vrot.lane.b32.xlu0 %v6159_v48, %s4536_s6  ;;  %v1880_v48 = vrot.slane %v1878_v38, 2  ;;  %v6284_v38 = vrot.slane %v5932_v13, 6 }
 0x2f8   : > { %v6237_v16 = vpop.permute.xlu0 %2060 }
 0x2fa   : > { %2412 = vrot.lane.b32.xlu2 %v5232_v3, %s4536_s6  ;;  %2652 = vrot.lane.b32.xlu1 %v6169_v34, %s4536_s6  ;;  %v1805_v3 = vrot.slane %v1803_v41, 2  ;;  %v7952_v34 = vrot.slane %v6284_v38, 7 }
 0x2fc   : > { %v6239_v55 = vpop.permute.xlu1 %2062  ;;  %v6241_v50 = vpop.permute.xlu2 %2082 }
 0x2fd   : > { %8226 = vst [vmem:[#allocation159_spill] sm:$0xff] %v6239_v55 }
 0x2fe   : > { %8227 = vst [vmem:[#allocation160_spill] sm:$0xff] %v6241_v50  ;;  %v6262_v50 = vrot.slane %v6058_v15, 4 }
 0x2ff   : > { %2444 = vrot.lane.b32.xlu0 %v5390_v5, %s4536_s6 }
 0x300   : > { %v6249_v10 = vpop.permute.xlu0 %2066 }
 0x301   : > { %8228 = vst [vmem:[#allocation161_spill] sm:$0xff] %v6249_v10 }
 0x302   : > { %2508 = vrot.lane.b32.xlu2 %v5605_v32, %s4536_s6  ;;  %2476 = vrot.lane.b32.xlu1 %v5505_v2, %s4536_s6  ;;  %v1830_v32 = vrot.slane %v1828_v63, 2  ;;  %v7953_v2 = vrot.slane %v6262_v50, 7 }
 0x304   : > { %v6251_v8 = vpop.permute.xlu1 %2068  ;;  %v6253_v49 = vpop.permute.xlu2 %2090 }
 0x305   : > { %8229 = vst [vmem:[#allocation162_spill] sm:$0xff] %v6251_v8  ;;  %v7949_v8 = vrot.slane %v6032_v57, 7 }
 0x307   : > { %2540 = vrot.lane.b32.xlu0 %v5778_v22, %s4536_s6 }
 0x308   : > { %v6264_v55 = vpop.permute.xlu0 %2072 }
 0x309   : > { %8230 = vst [vmem:[#allocation163_spill] sm:$0xff] %v6264_v55  ;;  %v1832_v55 = vsel %vm5244_vm10, %v1830_v32, %v7949_v8  ;;  %v1855_v32 = vrot.slane %v1853_v45, 2  ;;  %v7951_v8 = vrot.slane %v6271_v47, 7 }
 0x30a   : > { %2604 = vrot.lane.b32.xlu2 %v6179_v59, %s4536_s6  ;;  %2572 = vrot.lane.b32.xlu1 %v5786_v29, %s4536_s6  ;;  %v1882_v59 = vsel %vm5244_vm10, %v1880_v48, %v7953_v2  ;;  %v1807_v48 = vsel %vm5244_vm10, %v1805_v3, %v7952_v34  ;;  %v8233_v34 = vrot.slane %v5534_v26, 2 }
 0x30c   : > { %v2075_v62 = vpop.permute.xlu1 %2074  ;;  %v6266_v10 = vpop.permute.xlu2 %2458  ;;  %v2322_v2 = vadd.f32 %v5979_v51, %v8233_v34 }
 0x30f   : > { %2636 = vrot.lane.b32.xlu0 %v5984_v31, %s4536_s6 }
 0x310   : > { %v6288_v63 = vpop.permute.xlu0 %2078 }
 0x311   : > { %8231 = vst [vmem:[#allocation164_spill] sm:$0xff] %v6288_v63 }
 0x312   : > { %2110 = vrot.lane.b32.xlu1 %v1832_v55, %s4535_s30  ;;  %2142 = vrot.lane.b32.xlu2 %v1882_v59, %s4535_s30  ;;  %v1857_v59 = vsel %vm5244_vm10, %v1855_v32, %v7951_v8 }
 0x314   : > { %v6290_v29 = vpop.permute.xlu1 %2080  ;;  %v6292_v1 = vpop.permute.xlu2 %2554 }
 0x315   : > { %8232 = vst [vmem:[#allocation165_spill] sm:$0xff] %v6290_v29 }
 0x317   : > { %2094 = vrot.lane.b32.xlu0 %v1807_v48, %s4535_s30 }
 0x319   : > { %v6308_v41 = vpop.permute.xlu0 %2106 }
 0x31a   : > { %2126 = vrot.lane.b32.xlu1 %v1857_v59, %s4535_s30  ;;  %2430 = vrot.lane.b32.xlu2 %v5334_v42, %s4536_s6  ;;  %v4537_v59 = vmov 1934713408  }
 0x31b   : > { %v2926_v8 = vunpack.c.l.s4 %v4537_v59 }
 0x31c   : > { %v6310_v45 = vpop.permute.xlu2 %2650  ;;  %v6312_v55 = vpop.permute.xlu1 %2138 }
 0x31f   : > { %2462 = vrot.lane.b32.xlu0 %v5462_v23, %s4536_s6  ;;  %v2314_v23 = vadd.f32 %v5815_v60, %v5484_v11 }
 0x321   : > { %v6320_v3 = vpop.permute.xlu0 %2122 }
 0x322   : > { %2494 = vrot.lane.b32.xlu1 %v5565_v37, %s4536_s6  ;;  %2526 = vrot.lane.b32.xlu2 %v5705_v36, %s4536_s6 }
 0x324   : > { %v2475_v32 = vpop.permute.xlu2 %2474  ;;  %v2427_v48 = vpop.permute.xlu1 %2426 }
 0x325   : > { %v2826_v59 = vadd.f32 %v2475_v32, %v2314_v23  ;;  %v8235_v23 = vrot.slane %v5754_v54, 4  ;;  %v8237_v32 = vrot.slane %v5418_v33, 6 }
 0x327   : > { %2558 = vrot.lane.b32.xlu0 %v5863_v40, %s4536_s6  ;;  %v6333_v40 = vunpack.c.0.s8 %v2926_v8  ;;  %v2362_v11 = vadd.f32 %v6185_v35, %v8235_v23  ;;  %v8241_v23 = vld [vmem:[#allocation42_spill] sm:$0xff] }
 0x329   : > { %v2491_v36 = vpop.permute.xlu0 %2490 }
 0x32a   : > { %2590 = vrot.lane.b32.xlu1 %v6010_v6, %s4536_s6  ;;  %2622 = vrot.lane.b32.xlu2 %v6032_v57, %s4536_s6  ;;  %v2834_v42 = vadd.f32 %v2491_v36, %v2322_v2  ;;  %v8234_v6 = vrot.slane %v5824_v28, 6  ;;  %v8236_v36 = vrot.slane %v5299_v39, 2  ;;  %v8249_v39 = vld [vmem:[#allocation127_spill] sm:$0xff] }
 0x32c   : > { %v2571_v29 = vpop.permute.xlu2 %2570  ;;  %v2523_v37 = vpop.permute.xlu1 %2522  ;;  %v2939_v26 = vrot.slane %v2834_v42, 4  ;;  %v2370_v63 = vadd.f32 %v2075_v62, %v8234_v6  ;;  %v2290_v62 = vadd.f32 %v5595_v21, %v8236_v36  ;;  %v8246_v36 = vld [vmem:[#allocation71_spill] sm:$0xff] }
 0x32d   : > { %v2874_v6 = vadd.f32 %v2571_v29, %v2362_v11  ;;  %v8242_v29 = vld [vmem:[#allocation45_spill] sm:$0xff]  ;;  %v8243_v11 = vld [vmem:[#allocation79_spill] sm:$0xff] }
 0x32e   : > { %v2940_v34 = vsel %vm2923_vm11, %v2939_v26, %v2826_v59  ;;  %v8238_v59 = vld [vmem:[#allocation87_spill] sm:$0xff]  ;;  %v2802_v28 = vadd.f32 %v2427_v48, %v2290_v62 }
 0x32f   : > { %v6337_v51 = vperm.slane %v2940_v34, %v6333_v40  ;;  %2654 = vrot.lane.b32.xlu0 %v6262_v50, %s4536_s6  ;;  %v2306_v34 = vadd.f32 %v8238_v59, %v8237_v32  ;;  %v8244_v48 = vld [vmem:[#allocation27_spill] sm:$0xff] }
 0x331   : > { %3447 = vst [vmem:[#allocation1 + $0x2] ss:$4 sm:$0xff] %v6337_v51  ;;  %v2587_v42 = vpop.permute.xlu0 %2586  ;;  %v2818_v54 = vadd.f32 %v6266_v10, %v2306_v34  ;;  %v2922_v10 = vrot.slane %v2802_v28, 4 }
 0x332   : > { %2414 = vrot.lane.b32.xlu1 %v5235_v24, %s4536_s6  ;;  %2446 = vrot.lane.b32.xlu2 %v5402_v18, %s4536_s6  ;;  %v2882_v2 = vadd.f32 %v2587_v42, %v2370_v63  ;;  %v8239_v63 = vld [vmem:[#allocation29_spill] sm:$0xff]  ;;  %v8250_v24 = vld [vmem:[#allocation86_spill] sm:$0xff] }
 0x333   : > { %v8240_v42 = vld [vmem:[#allocation5_spill] sm:$0xff]  ;;  %v2931_v59 = vrot.slane %v2818_v54, 4 }
 0x334   : > { %v6351_v60 = vpop.permute.xlu2 %2108  ;;  %v2619_v26 = vpop.permute.xlu1 %2618  ;;  %v2963_v8 = vrot.slane %v2882_v2, 4  ;;  %v2282_v21 = vadd.f32 %v8241_v23, %v8240_v42  ;;  %v8245_v2 = vrot.slane %v8244_v48, 4  ;;  %v8247_v42 = vld [vmem:[#allocation46_spill] sm:$0xff]  ;;  %v8251_v48 = vrot.slane %v8250_v24, 2 }
 0x335   : > { %v8248_v23 = vrot.slane %v8247_v42, 6  ;;  %v8259_v42 = vld [vmem:[#allocation124_spill] sm:$0xff]  ;;  %v8263_v24 = vrot.slane %v6284_v38, 7 }
 0x336   : > { %v2964_v18 = vsel %vm2923_vm11, %v2963_v8, %v2874_v6  ;;  %v2298_v62 = vadd.f32 %v8246_v36, %v8245_v2  ;;  %v2354_v2 = vadd.f32 %v6201_v12, %v8251_v48  ;;  %v8257_v48 = vld [vmem:[#allocation113_spill] sm:$0xff]  ;;  %v8260_v33 = vrot.slane %v8259_v42, 6 }
 0x337   : > { %v6362_v35 = vperm.slane %v2964_v18, %v6333_v40  ;;  %2478 = vrot.lane.b32.xlu0 %v8239_v63, %s4536_s6  ;;  %v1808_v42 = vrot.slane %v8263_v24, 2  ;;  %v8265_v24 = vrot.slane %v8257_v48, 7 }
 0x339   : > { %3453 = vst [vmem:[#allocation1 + $0x21] ss:$4 sm:$0xff] %v6362_v35  ;;  %v2411_v18 = vpop.permute.xlu0 %2410 }
 0x33a   : > { %2510 = vrot.lane.b32.xlu1 %v8242_v29, %s4536_s6  ;;  %2542 = vrot.lane.b32.xlu2 %v8243_v11, %s4536_s6  ;;  %v2794_v6 = vadd.f32 %v2411_v18, %v2282_v21  ;;  %v2338_v29 = vadd.f32 %v8249_v39, %v8248_v23  ;;  %v6388_v21 = vrot.slane %v6032_v57, 2  ;;  %v8252_v39 = vld [vmem:[#allocation107_spill] sm:$0xff] }
 0x33c   : > { %v6376_v8 = vpop.permute.xlu2 %2124  ;;  %v2443_v32 = vpop.permute.xlu1 %2442  ;;  %v2924_v11 = vsel %vm2923_vm11, %v2922_v10, %v2794_v6  ;;  %v2850_v18 = vadd.f32 %v2523_v37, %v2338_v29  ;;  %v8253_v10 = vld [vmem:[#allocation39_spill] sm:$0xff]  ;;  %v6402_v37 = vrot.slane %v6058_v15, 6 }
 0x33d   : > { %v2810_v34 = vadd.f32 %v2443_v32, %v2298_v62  ;;  %v2928_v36 = vperm.slane %v2924_v11, %v6333_v40  ;;  %v2866_v62 = vadd.f32 %v6292_v1, %v2354_v2  ;;  %v8254_v6 = vrot.slane %v8253_v10, 4  ;;  %v8255_v32 = vld [vmem:[#allocation128_spill] sm:$0xff]  ;;  %v8256_v29 = vld [vmem:[#allocation67_spill] sm:$0xff] }
 0x33e   : > { %v2346_v1 = vadd.f32 %v6148_v52, %v8256_v29  ;;  %v8261_v52 = vrot.slane %v6262_v50, 7 }
 0x33f   : > { %v2932_v28 = vsel %vm2923_vm11, %v2931_v59, %v2810_v34  ;;  %3443 = vst [vmem:[#allocation1] ss:$4 sm:$0xff] %v2928_v36  ;;  %2574 = vrot.lane.b32.xlu0 %v8252_v39, %s4536_s6  ;;  %v2330_v12 = vadd.f32 %v8255_v32, %v8254_v6  ;;  %v2947_v34 = vrot.slane %v2850_v18, 4  ;;  %v8258_v6 = vrot.slane %v6032_v57, 7 }
 0x340   : > { %v2936_v54 = vperm.slane %v2932_v28, %v6333_v40  ;;  %v2955_v10 = vrot.slane %v2866_v62, 4  ;;  %v2402_v39 = vadd.f32 %v6312_v55, %v8260_v33  ;;  %v1883_v29 = vrot.slane %v8261_v52, 2 }
 0x341   : > { %v2507_v11 = vpop.permute.xlu0 %2506  ;;  %v1833_v32 = vrot.slane %v8258_v6, 2  ;;  %v8262_v18 = vrot.slane %v5991_v46, 2  ;;  %v7970_v62 = vrot.slane %v6402_v37, 7  ;;  %v2929_v52 = vrot.slane %v2928_v36, 4 }
 0x342   : > { %3445 = vst [vmem:[#allocation1 + $0x1] ss:$4 sm:$0xff] %v2936_v54  ;;  %2606 = vrot.lane.b32.xlu1 %v6284_v38, %s4536_s6  ;;  %2638 = vrot.lane.b32.xlu2 %v6271_v47, %s4536_s6  ;;  %v2842_v23 = vadd.f32 %v2507_v11, %v2330_v12 }
 0x343   : > { %v2386_v12 = vadd.f32 %v6308_v41, %v8262_v18  ;;  %v2914_v41 = vadd.f32 %v6310_v45, %v2402_v39  ;;  %v8266_v45 = vrot.slane %v6072_v20, 4  ;;  %v2930_v36 = vsel %vm2923_vm11, 0.0, %v2929_v52 }
 0x344   : > { %v6407_v2 = vpop.permute.xlu2 %2492  ;;  %v2539_v28 = vpop.permute.xlu1 %2538  ;;  %v2948_v11 = vsel %vm2923_vm11, %v2947_v34, %v2842_v23  ;;  %v2378_v34 = vadd.f32 %v6253_v49, %v5932_v13  ;;  %v2937_v49 = vrot.slane %v2936_v54, 4 }
 0x345   : > { %v2858_v63 = vadd.f32 %v2539_v28, %v2346_v1  ;;  %v2952_v59 = vperm.slane %v2948_v11, %v6333_v40  ;;  %v2898_v33 = vadd.f32 %v2619_v26, %v2386_v12  ;;  %v8264_v1 = vrot.slane %v6388_v21, 7 }
 0x346   : > { %v1810_v26 = vsel %vm5244_vm10, %v1808_v42, %v8265_v24  ;;  %v2394_v39 = vadd.f32 %v6320_v3, %v8266_v45  ;;  %v8267_v12 = vrot.slane %v6271_v47, 7  ;;  %v2979_v13 = vrot.slane %v2914_v41, 4  ;;  %v8270_v45 = vld [vmem:[#allocation18_spill] sm:$0xff] }
 0x347   : > { %v2956_v6 = vsel %vm2923_vm11, %v2955_v10, %v2858_v63  ;;  %v1835_v28 = vsel %vm5244_vm10, %v1833_v32, %v8264_v1  ;;  %3449 = vst [vmem:[#allocation1 + $0x3] ss:$4 sm:$0xff] %v2952_v59  ;;  %v1885_v63 = vsel %vm5244_vm10, %v1883_v29, %v7970_v62  ;;  %v6442_v10 = vrot.slane %v5984_v31, 4 }
 0x348   : > { %v2960_v55 = vperm.slane %v2956_v6, %v6333_v40  ;;  %2112 = vrot.lane.b32.xlu0 %v1835_v28, %s4535_s30  ;;  %v2971_v32 = vrot.slane %v2898_v33, 4  ;;  %v1858_v11 = vrot.slane %v8267_v12, 2  ;;  %v2945_v1 = vrot.slane %v6337_v51, 4  ;;  %v8272_v12 = vld [vmem:[#allocation56_spill] sm:$0xff] }
 0x349   : > { %v2603_v23 = vpop.permute.xlu0 %2602  ;;  %v2953_v3 = vrot.slane %v2952_v59, 4  ;;  %v2938_v54 = vsel %vm2923_vm11, 0.0, %v2937_v49  ;;  %v8273_v49 = vld [vmem:[#allocation62_spill] sm:$0xff] }
 0x34a   : > { %3451 = vst [vmem:[#allocation1 + $0x20] ss:$4 sm:$0xff] %v2960_v55  ;;  %2144 = vrot.lane.b32.xlu1 %v1885_v63, %s4535_s30  ;;  %2096 = vrot.lane.b32.xlu2 %v1810_v26, %s4535_s30  ;;  %v2890_v29 = vadd.f32 %v2603_v23, %v2378_v34  ;;  %v7971_v63 = vrot.slane %v6442_v10, 7  ;;  %v2946_v59 = vsel %vm2923_vm11, 0.0, %v2945_v1  ;;  %v8269_v34 = vld [vmem:[#allocation26_spill] sm:$0xff] }
 0x34c   : > { %v6451_v42 = vpop.permute.xlu2 %2588  ;;  %v2635_v18 = vpop.permute.xlu1 %2634  ;;  %v2972_v28 = vsel %vm2923_vm11, %v2971_v32, %v2890_v29  ;;  %v1860_v41 = vsel %vm5244_vm10, %v1858_v11, %v7971_v63  ;;  %v2961_v29 = vrot.slane %v2960_v55, 4  ;;  %v2291_v11 = vadd.f32 %v8272_v12, %v5302_v61  ;;  %v8294_v63 = vld [vmem:[#allocation90_spill] sm:$0xff] }
 0x34d   : > { %v2906_v6 = vadd.f32 %v2635_v18, %v2394_v39  ;;  %v2976_v51 = vperm.slane %v2972_v28, %v6333_v40  ;;  %v2954_v39 = vsel %vm2923_vm11, 0.0, %v2953_v3  ;;  %v8271_v18 = vld [vmem:[#allocation35_spill] sm:$0xff] }
 0x34e   : > { %v6460_v24 = vld.sshfl [vmem:[#allocation1] sm:$0xff pattern:$0x73625140]  ;;  %v8275_v3 = vld [vmem:[#allocation43_spill] sm:$0xff] }
 0x34f   : > { %v2980_v33 = vsel %vm2923_vm11, %v2979_v13, %v2906_v6  ;;  %8268 = vst [vmem:[#allocation87_spill] sm:$0xff] %v6460_v24  ;;  %v2969_v13 = vrot.slane %v6362_v35, 4  ;;  %v8274_v6 = vld [vmem:[#allocation96_spill] sm:$0xff]  ;;  %v2977_v1 = vrot.slane %v2976_v51, 4 }
 0x350   : > { %3470 = vst [vmem:[#allocation1] ss:$4 sm:$0xff] %v2930_v36  ;;  %2128 = vrot.lane.b32.xlu0 %v1860_v41, %s4535_s30  ;;  %v2984_v26 = vperm.slane %v2980_v33, %v6333_v40  ;;  %v2283_v33 = vadd.f32 %v8275_v3, %v5229_v19 }
 0x351   : > { %3472 = vst [vmem:[#allocation1 + $0x1] ss:$4 sm:$0xff] %v2938_v54  ;;  %v6476_v23 = vpop.permute.xlu0 %2140  ;;  %v2970_v35 = vsel %vm2923_vm11, 0.0, %v2969_v13  ;;  %v2978_v62 = vsel %vm2923_vm11, 0.0, %v2977_v1  ;;  %v8279_v13 = vld [vmem:[#allocation129_spill] sm:$0xff] }
 0x352   : > { %2432 = vrot.lane.b32.xlu1 %v8269_v34, %s4536_s6  ;;  %2464 = vrot.lane.b32.xlu2 %v8270_v45, %s4536_s6  ;;  %3474 = vst [vmem:[#allocation1 + $0x2] ss:$4 sm:$0xff] %v2946_v59  ;;  %v2985_v55 = vrot.slane %v2984_v26, 4  ;;  %v2962_v59 = vsel %vm2923_vm11, 0.0, %v2961_v29  ;;  %v8277_v29 = vld [vmem:[#allocation123_spill] sm:$0xff]  ;;  %v2331_v1 = vadd.f32 %v8279_v13, %v5624_v56  ;;  %v8282_v56 = vld [vmem:[#allocation22_spill] sm:$0xff] }
 0x353   : > { %3476 = vst [vmem:[#allocation1 + $0x3] ss:$4 sm:$0xff] %v2954_v39 }
 0x354   : > { %v2413_v32 = vpop.permute.xlu2 %2412  ;;  %v2093_v52 = vpop.permute.xlu1 %2092  ;;  %3455 = vst [vmem:[#allocation1 + $0x22] ss:$4 sm:$0xff] %v2976_v51  ;;  %v2986_v51 = vsel %vm2923_vm11, 0.0, %v2985_v55 }
 0x355   : > { %3457 = vst [vmem:[#allocation1 + $0x23] ss:$4 sm:$0xff] %v2984_v26  ;;  %v2795_v39 = vadd.f32 %v2413_v32, %v2283_v33 }
 0x358   : > { %2496 = vrot.lane.b32.xlu0 %v8271_v18, %s4536_s6 }
 0x359   : > { %v2429_v28 = vpop.permute.xlu0 %2428 }
 0x35a   : > { %2528 = vrot.lane.b32.xlu1 %v8273_v49, %s4536_s6  ;;  %2560 = vrot.lane.b32.xlu2 %v8274_v6, %s4536_s6  ;;  %v2803_v36 = vadd.f32 %v2429_v28, %v2291_v11  ;;  %v2339_v11 = vadd.f32 %v6122_v27, %v5681_v25  ;;  %v6503_v32 = vld.sshfl [vmem:[#allocation1] sm:$0xff pattern:$0x73625140] }
 0x35b   : > { %8278 = vst [vmem:[#allocation42_spill] sm:$0xff] %v6503_v32  ;;  %v8295_v32 = vld [vmem:[#allocation91_spill] sm:$0xff] }
 0x35c   : > { %v2509_v41 = vpop.permute.xlu2 %2508  ;;  %v2461_v54 = vpop.permute.xlu1 %2460  ;;  %v6490_v61 = vld.sshfl [vmem:[#allocation1 + $0x20] sm:$0xff pattern:$0x73625140]  ;;  %v2987_v12 = vrot.slane %v2803_v36, 4 }
 0x35d   : > { %8276 = vst [vmem:[#allocation5_spill] sm:$0xff] %v6490_v61  ;;  %v2843_v55 = vadd.f32 %v2509_v41, %v2331_v1  ;;  %v8284_v1 = vld [vmem:[#allocation102_spill] sm:$0xff]  ;;  %v2355_v61 = vadd.f32 %v6203_v17, %v8294_v63  ;;  %v8297_v63 = vld [vmem:[#allocation73_spill] sm:$0xff] }
 0x35e   : > { %3478 = vst [vmem:[#allocation1 + $0x20] ss:$4 sm:$0xff] %v2962_v59  ;;  %v2988_v19 = vsel %vm2923_vm11, %v2987_v12, %v2795_v39  ;;  %v8280_v59 = vld [vmem:[#allocation4_spill] sm:$0xff]  ;;  %v8281_v39 = vld [vmem:[#allocation9_spill] sm:$0xff]  ;;  %v2379_v12 = vadd.f32 %v2093_v52, %v6049_v14  ;;  %v8285_v52 = vld [vmem:[#allocation50_spill] sm:$0xff] }
 0x35f   : > { %3480 = vst [vmem:[#allocation1 + $0x21] ss:$4 sm:$0xff] %v2970_v35  ;;  %v6497_v26 = vperm.slane %v2988_v19, %v6333_v40  ;;  %v2387_v35 = vadd.f32 %v6351_v60, %v6044_v43 }
 0x360   : > { %3482 = vst [vmem:[#allocation1 + $0x22] ss:$4 sm:$0xff] %v2978_v62  ;;  %2592 = vrot.lane.b32.xlu0 %v8277_v29, %s4536_s6 }
 0x361   : > { %3484 = vst [vmem:[#allocation1 + $0x23] ss:$4 sm:$0xff] %v2986_v51  ;;  %v2525_v62 = vpop.permute.xlu0 %2524 }
 0x362   : > { %2624 = vrot.lane.b32.xlu1 %v6388_v21, %s4536_s6  ;;  %2656 = vrot.lane.b32.xlu2 %v6402_v37, %s4536_s6  ;;  %3501 = vst [vmem:[#allocation1] ss:$4 sm:$0xff] %v6497_v26  ;;  %v2851_v28 = vadd.f32 %v2525_v62, %v2339_v11  ;;  %v8283_v62 = vld [vmem:[#allocation88_spill] sm:$0xff] }
 0x363   : > { %v2307_v13 = vadd.f32 %v8283_v62, %v5439_v30 }
 0x364   : > { %v2605_v3 = vpop.permute.xlu2 %2604  ;;  %v2557_v33 = vpop.permute.xlu1 %2556  ;;  %v3011_v36 = vrot.slane %v2851_v28, 4  ;;  %v2323_v28 = vadd.f32 %v8284_v1, %v5553_v53  ;;  %v8289_v53 = vld [vmem:[#allocation108_spill] sm:$0xff] }
 0x365   : > { %v2891_v43 = vadd.f32 %v2605_v3, %v2379_v12  ;;  %v8288_v3 = vld [vmem:[#allocation78_spill] sm:$0xff]  ;;  %v8292_v12 = vld [vmem:[#allocation104_spill] sm:$0xff] }
 0x366   : > { %v3012_v25 = vsel %vm2923_vm11, %v3011_v36, %v2843_v55  ;;  %v2819_v55 = vadd.f32 %v2461_v54, %v2307_v13  ;;  %v6550_v54 = vrot.slane %v6032_v57, 4 }
 0x367   : > { %v6514_v27 = vperm.slane %v3012_v25, %v6333_v40  ;;  %v2835_v25 = vadd.f32 %v6407_v2, %v2323_v28  ;;  %v8291_v2 = vld [vmem:[#allocation20_spill] sm:$0xff] }
 0x368   : > { %2416 = vrot.lane.b32.xlu0 %v8280_v59, %s4536_s6  ;;  %v6543_v30 = vld.sshfl [vmem:[#allocation1 + $0x20] sm:$0xff pattern:$0x73625140]  ;;  %8290 = vst [vmem:[#allocation127_spill] sm:$0xff] %v6550_v54  ;;  %v2995_v13 = vrot.slane %v2819_v55, 4 }
 0x369   : > { %3507 = vst [vmem:[#allocation1 + $0x3] ss:$4 sm:$0xff] %v6514_v27  ;;  %v2621_v41 = vpop.permute.xlu0 %2620  ;;  %v3003_v1 = vrot.slane %v2835_v25, 4  ;;  %v6568_v25 = vrot.slane %v8257_v48, 2 }
 0x36a   : > { %2448 = vrot.lane.b32.xlu1 %v8281_v39, %s4536_s6  ;;  %2480 = vrot.lane.b32.xlu2 %v8282_v56, %s4536_s6  ;;  %v2899_v51 = vadd.f32 %v2621_v41, %v2387_v35  ;;  %v8286_v35 = vld [vmem:[#allocation54_spill] sm:$0xff]  ;;  %8287 = vst [vmem:[#allocation71_spill] sm:$0xff] %v6543_v30  ;;  %v8302_v30 = vrot.slane %v6442_v10, 7 }
 0x36b   : > { %v2299_v41 = vadd.f32 %v8286_v35, %v5377_v7  ;;  %8296 = vst [vmem:[#allocation128_spill] sm:$0xff] %v6568_v25 }
 0x36c   : > { %v6526_v19 = vpop.permute.xlu1 %2652  ;;  %v6528_v11 = vpop.permute.xlu2 %2142  ;;  %v3035_v60 = vrot.slane %v2899_v51, 4  ;;  %v2315_v51 = vadd.f32 %v8292_v12, %v8291_v2  ;;  %v2371_v2 = vadd.f32 %v6229_v58, %v8295_v32 }
 0x36e   : > { %v3036_v36 = vsel %vm2923_vm11, %v3035_v60, %v2891_v43  ;;  %v2883_v17 = vadd.f32 %v6451_v42, %v2371_v2  ;;  %v6586_v42 = vrot.slane %v5984_v31, 6 }
 0x36f   : > { %v6537_v14 = vperm.slane %v3036_v36, %v6333_v40  ;;  %v8293_v36 = vrot.slane %v6388_v21, 7 }
 0x370   : > { %2512 = vrot.lane.b32.xlu0 %v8285_v52, %s4536_s6  ;;  %8299 = vst [vmem:[#allocation67_spill] sm:$0xff] %v6586_v42 }
 0x371   : > { %3513 = vst [vmem:[#allocation1 + $0x22] ss:$4 sm:$0xff] %v6537_v14  ;;  %v2445_v62 = vpop.permute.xlu0 %2444  ;;  %v1836_v35 = vrot.slane %v8293_v36, 2 }
 0x372   : > { %2544 = vrot.lane.b32.xlu1 %v8288_v3, %s4536_s6  ;;  %2576 = vrot.lane.b32.xlu2 %v8289_v53, %s4536_s6  ;;  %v2811_v43 = vadd.f32 %v2445_v62, %v2299_v41  ;;  %v7972_v41 = vrot.slane %v6550_v54, 7 }
 0x374   : > { %v2477_v7 = vpop.permute.xlu1 %2476  ;;  %v6555_v60 = vpop.permute.xlu2 %2430  ;;  %v2996_v24 = vsel %vm2923_vm11, %v2995_v13, %v2811_v43  ;;  %v1838_v58 = vsel %vm5244_vm10, %v1836_v35, %v7972_v41  ;;  %v8301_v43 = vrot.slane %v8257_v48, 7 }
 0x375   : > { %v2827_v28 = vadd.f32 %v2477_v7, %v2315_v51  ;;  %v3000_v12 = vperm.slane %v2996_v24, %v6333_v40  ;;  %v2867_v51 = vadd.f32 %v2557_v33, %v2355_v61  ;;  %v6571_v7 = vpop.f32.mrf.mxu3  ;;  %v8298_v24 = vld [vmem:[#allocation137_spill] sm:$0xff]  ;;  %v8300_v61 = vld [vmem:[#allocation103_spill] sm:$0xff] }
 0x376   : > { %v2347_v32 = vadd.f32 %v8298_v24, %v8297_v63  ;;  %v2363_v33 = vadd.f32 %v6237_v16, %v8300_v61  ;;  %v7976_v63 = vrot.slane %v6568_v25, 7  ;;  %v2993_v24 = vrot.slane %v6497_v26, 4 }
 0x377   : > { %v3004_v55 = vsel %vm2923_vm11, %v3003_v1, %v2827_v28  ;;  %3503 = vst [vmem:[#allocation1 + $0x1] ss:$4 sm:$0xff] %v3000_v12  ;;  %v1811_v1 = vrot.slane %v8301_v43, 2  ;;  %v3019_v28 = vrot.slane %v2867_v51, 4  ;;  %v1861_v16 = vrot.slane %v8302_v30, 2 }
 0x378   : > { %v3008_v62 = vperm.slane %v3004_v55, %v6333_v40  ;;  %2608 = vrot.lane.b32.xlu0 %v8257_v48, %s4536_s6  ;;  %v2403_v61 = vadd.f32 %v6476_v23, %v6058_v15  ;;  %v3001_v43 = vrot.slane %v3000_v12, 4  ;;  %v7975_v26 = vrot.slane %v6586_v42, 7 }
 0x379   : > { %v2541_v13 = vpop.permute.xlu0 %2540  ;;  %v2994_v23 = vsel %vm2923_vm11, 0.0, %v2993_v24 }
 0x37a   : > { %3505 = vst [vmem:[#allocation1 + $0x2] ss:$4 sm:$0xff] %v3008_v62  ;;  %2640 = vrot.lane.b32.xlu1 %v6442_v10, %s4536_s6  ;;  %2114 = vrot.lane.b32.xlu2 %v1838_v58, %s4535_s30  ;;  %v2859_v36 = vadd.f32 %v2541_v13, %v2347_v32  ;;  %v3027_v58 = vrot.slane %v2883_v17, 4  ;;  %v8303_v32 = vrot.slane %v6402_v37, 7  ;;  %v3009_v46 = vrot.slane %v3008_v62, 4 }
 0x37b   : > { %v2915_v30 = vadd.f32 %v6526_v19, %v2403_v61  ;;  %v8306_v19 = vld [vmem:[#allocation131_spill] sm:$0xff] }
 0x37c   : > { %v2573_v35 = vpop.permute.xlu1 %2572  ;;  %v6592_v2 = vpop.permute.xlu2 %2526  ;;  %v3020_v51 = vsel %vm2923_vm11, %v3019_v28, %v2859_v36  ;;  %v1886_v13 = vrot.slane %v8303_v32, 2  ;;  %v2395_v62 = vadd.f32 %v6376_v8, %v8306_v19  ;;  %v3002_v28 = vsel %vm2923_vm11, 0.0, %v3001_v43 }
 0x37d   : > { %v2875_v41 = vadd.f32 %v2573_v35, %v2363_v33  ;;  %v3024_v55 = vperm.slane %v3020_v51, %v6333_v40  ;;  %v3017_v33 = vrot.slane %v6514_v27, 4  ;;  %v8304_v35 = vrot.slane %v6571_v7, 7 }
 0x37e   : > { %v1863_v27 = vsel %vm5244_vm10, %v1861_v16, %v7975_v26  ;;  %v3043_v61 = vrot.slane %v2915_v30, 4 }
 0x37f   : > { %v3028_v17 = vsel %vm2923_vm11, %v3027_v58, %v2875_v41  ;;  %v1888_v15 = vsel %vm5244_vm10, %v1886_v13, %v8304_v35  ;;  %3509 = vst [vmem:[#allocation1 + $0x20] ss:$4 sm:$0xff] %v3024_v55  ;;  %v1813_v41 = vsel %vm5244_vm10, %v1811_v1, %v7976_v63  ;;  %v3010_v58 = vsel %vm2923_vm11, 0.0, %v3009_v46  ;;  %v8307_v46 = vld [vmem:[#allocation8_spill] sm:$0xff]  ;;  %v8308_v13 = vld [vmem:[#allocation14_spill] sm:$0xff] }
 0x380   : > { %2146 = vrot.lane.b32.xlu0 %v1888_v15, %s4535_s30  ;;  %v3032_v36 = vperm.slane %v3028_v17, %v6333_v40  ;;  %v3018_v24 = vsel %vm2923_vm11, 0.0, %v3017_v33  ;;  %v8309_v17 = vld [vmem:[#allocation38_spill] sm:$0xff]  ;;  %v3025_v30 = vrot.slane %v3024_v55, 4 }
 0x381   : > { %v6614_v12 = vld.sshfl [vmem:[#allocation1] sm:$0xff pattern:$0x73625140]  ;;  %v2637_v1 = vpop.permute.xlu0 %2636 }
 0x382   : > { %8305 = vst [vmem:[#allocation113_spill] sm:$0xff] %v6614_v12  ;;  %2098 = vrot.lane.b32.xlu1 %v1813_v41, %s4535_s30  ;;  %2130 = vrot.lane.b32.xlu2 %v1863_v27, %s4535_s30  ;;  %v2907_v16 = vadd.f32 %v2637_v1, %v2395_v62  ;;  %v3041_v41 = vrot.slane %v6537_v14, 4  ;;  %v3026_v19 = vsel %vm2923_vm11, 0.0, %v3025_v30  ;;  %v8312_v1 = vld [vmem:[#allocation72_spill] sm:$0xff]  ;;  %v8314_v14 = vld [vmem:[#allocation99_spill] sm:$0xff] }
 0x383   : > { %3532 = vst [vmem:[#allocation1] ss:$4 sm:$0xff] %v2994_v23  ;;  %v3033_v23 = vrot.slane %v3032_v36, 4 }
 0x384   : > { %3534 = vst [vmem:[#allocation1 + $0x1] ss:$4 sm:$0xff] %v3002_v28  ;;  %v6633_v51 = vpop.permute.xlu1 %2110  ;;  %v6635_v8 = vpop.permute.xlu2 %2622  ;;  %v3044_v43 = vsel %vm2923_vm11, %v3043_v61, %v2907_v16  ;;  %v3042_v55 = vsel %vm2923_vm11, 0.0, %v3041_v41 }
 0x385   : > { %3536 = vst [vmem:[#allocation1 + $0x2] ss:$4 sm:$0xff] %v3010_v58  ;;  %v3048_v32 = vperm.slane %v3044_v43, %v6333_v40  ;;  %v3034_v28 = vsel %vm2923_vm11, 0.0, %v3033_v23  ;;  %v8311_v58 = vld [vmem:[#allocation61_spill] sm:$0xff]  ;;  %v8315_v43 = vld [vmem:[#allocation74_spill] sm:$0xff] }
 0x386   : > { %3538 = vst [vmem:[#allocation1 + $0x3] ss:$4 sm:$0xff] %v3018_v24  ;;  %v2308_v24 = vadd.f32 %v8312_v1, %v5443_v4 }
 0x387   : > { %3511 = vst [vmem:[#allocation1 + $0x21] ss:$4 sm:$0xff] %v3032_v36  ;;  %v3049_v27 = vrot.slane %v3048_v32, 4  ;;  %v8313_v36 = vld [vmem:[#allocation97_spill] sm:$0xff] }
 0x388   : > { %3515 = vst [vmem:[#allocation1 + $0x23] ss:$4 sm:$0xff] %v3048_v32  ;;  %2434 = vrot.lane.b32.xlu0 %v8307_v46, %s4536_s6  ;;  %v2300_v32 = vadd.f32 %v8315_v43, %v5390_v5  ;;  %v8318_v5 = vld [vmem:[#allocation24_spill] sm:$0xff] }
 0x389   : > { %v6645_v33 = vpop.permute.xlu0 %2094  ;;  %v3050_v61 = vsel %vm2923_vm11, 0.0, %v3049_v27  ;;  %v8316_v27 = vld [vmem:[#allocation144_spill] sm:$0xff] }
 0x38a   : > { %2466 = vrot.lane.b32.xlu1 %v8308_v13, %s4536_s6  ;;  %2498 = vrot.lane.b32.xlu2 %v8309_v17, %s4536_s6 }
 0x38c   : > { %v2127_v35 = vpop.permute.xlu1 %2126  ;;  %v2447_v15 = vpop.permute.xlu2 %2446 }
 0x38d   : > { %v6672_v26 = vld.sshfl [vmem:[#allocation1] sm:$0xff pattern:$0x73625140] }
 0x38e   : > { %8317 = vst [vmem:[#allocation18_spill] sm:$0xff] %v6672_v26  ;;  %v8321_v26 = vld [vmem:[#allocation28_spill] sm:$0xff] }
 0x38f   : > { %v6649_v62 = vld.sshfl [vmem:[#allocation1 + $0x20] sm:$0xff pattern:$0x73625140] }
 0x390   : > { %8310 = vst [vmem:[#allocation26_spill] sm:$0xff] %v6649_v62  ;;  %2530 = vrot.lane.b32.xlu0 %v8311_v58, %s4536_s6  ;;  %v8322_v62 = vld [vmem:[#allocation149_spill] sm:$0xff] }
 0x391   : > { %3540 = vst [vmem:[#allocation1 + $0x20] ss:$4 sm:$0xff] %v3026_v19  ;;  %v2463_v16 = vpop.permute.xlu0 %2462  ;;  %v2812_v19 = vadd.f32 %v2447_v15, %v2300_v32 }
 0x392   : > { %3542 = vst [vmem:[#allocation1 + $0x21] ss:$4 sm:$0xff] %v3034_v28  ;;  %2562 = vrot.lane.b32.xlu1 %v8313_v36, %s4536_s6  ;;  %2594 = vrot.lane.b32.xlu2 %v8314_v14, %s4536_s6  ;;  %v2820_v30 = vadd.f32 %v2463_v16, %v2308_v24  ;;  %v8319_v24 = vld [vmem:[#allocation146_spill] sm:$0xff] }
 0x393   : > { %3544 = vst [vmem:[#allocation1 + $0x22] ss:$4 sm:$0xff] %v3042_v55  ;;  %v2356_v55 = vadd.f32 %v8316_v27, %v5850_v0  ;;  %v8320_v0 = vld [vmem:[#allocation57_spill] sm:$0xff] }
 0x394   : > { %3546 = vst [vmem:[#allocation1 + $0x23] ss:$4 sm:$0xff] %v3050_v61  ;;  %v2495_v23 = vpop.permute.xlu1 %2494  ;;  %v2543_v4 = vpop.permute.xlu2 %2542  ;;  %v3059_v41 = vrot.slane %v2820_v30, 4  ;;  %v2348_v61 = vadd.f32 %v8319_v24, %v5778_v22  ;;  %v2404_v22 = vadd.f32 %v6528_v11, %v8322_v62  ;;  %v8327_v24 = vld [vmem:[#allocation32_spill] sm:$0xff] }
 0x396   : > { %v3060_v28 = vsel %vm2923_vm11, %v3059_v41, %v2812_v19  ;;  %v2860_v30 = vadd.f32 %v2543_v4, %v2348_v61  ;;  %v2292_v41 = vadd.f32 %v8320_v0, %v5319_v44  ;;  %v8324_v4 = vld [vmem:[#allocation51_spill] sm:$0xff]  ;;  %v8325_v44 = vld [vmem:[#allocation30_spill] sm:$0xff] }
 0x397   : > { %v6666_v1 = vperm.slane %v3060_v28, %v6333_v40 }
 0x398   : > { %2626 = vrot.lane.b32.xlu0 %v6550_v54, %s4536_s6  ;;  %v2804_v27 = vadd.f32 %v6555_v60, %v2292_v41  ;;  %v8328_v41 = vld [vmem:[#allocation36_spill] sm:$0xff] }
 0x399   : > { %3565 = vst [vmem:[#allocation1 + $0x1] ss:$4 sm:$0xff] %v6666_v1  ;;  %v2559_v15 = vpop.permute.xlu0 %2558 }
 0x39a   : > { %2418 = vrot.lane.b32.xlu2 %v8318_v5, %s4536_s6  ;;  %2658 = vrot.lane.b32.xlu1 %v6571_v7, %s4536_s6  ;;  %v2868_v16 = vadd.f32 %v2559_v15, %v2356_v55  ;;  %v8326_v15 = vld [vmem:[#allocation23_spill] sm:$0xff]  ;;  %v3051_v11 = vrot.slane %v2804_v27, 4 }
 0x39b   : > { %v6692_v55 = vld.sshfl [vmem:[#allocation1 + $0x20] sm:$0xff pattern:$0x73625140]  ;;  %v2284_v60 = vadd.f32 %v8327_v24, %v8326_v15  ;;  %v6710_v24 = vrot.slane %v8314_v14, 2 }
 0x39c   : > { %v2591_v43 = vpop.permute.xlu1 %2590  ;;  %v2639_v32 = vpop.permute.xlu2 %2638  ;;  %v3083_v19 = vrot.slane %v2868_v16, 4  ;;  %8323 = vst [vmem:[#allocation35_spill] sm:$0xff] %v6692_v55  ;;  %v2396_v16 = vadd.f32 %v2127_v35, %v5984_v31 }
 0x39e   : > { %v3084_v28 = vsel %vm2923_vm11, %v3083_v19, %v2860_v30  ;;  %v2908_v12 = vadd.f32 %v2639_v32, %v2396_v16  ;;  %v8332_v32 = vld [vmem:[#allocation80_spill] sm:$0xff] }
 0x39f   : > { %v6686_v63 = vperm.slane %v3084_v28, %v6333_v40  ;;  %v8329_v28 = vld [vmem:[#allocation119_spill] sm:$0xff] }
 0x3a0   : > { %2450 = vrot.lane.b32.xlu0 %v8321_v26, %s4536_s6  ;;  %v2324_v55 = vadd.f32 %v8329_v28, %v8328_v41  ;;  %v8331_v26 = vld [vmem:[#allocation138_spill] sm:$0xff] }
 0x3a1   : > { %3571 = vst [vmem:[#allocation1 + $0x20] ss:$4 sm:$0xff] %v6686_v63  ;;  %v2655_v61 = vpop.permute.xlu0 %2654 }
 0x3a2   : > { %2514 = vrot.lane.b32.xlu2 %v8324_v4, %s4536_s6  ;;  %2482 = vrot.lane.b32.xlu1 %v8325_v44, %s4536_s6  ;;  %v2916_v30 = vadd.f32 %v2655_v61, %v2404_v22  ;;  %v8330_v44 = vld [vmem:[#allocation59_spill] sm:$0xff]  ;;  %v2836_v31 = vadd.f32 %v2495_v23, %v2324_v55 }
 0x3a3   : > { %v2340_v17 = vadd.f32 %v8331_v26, %v8330_v44  ;;  %v8333_v26 = vld [vmem:[#allocation31_spill] sm:$0xff]  ;;  %v8334_v44 = vld [vmem:[#allocation105_spill] sm:$0xff] }
 0x3a4   : > { %v2415_v19 = vpop.permute.xlu1 %2414  ;;  %v6702_v0 = vpop.permute.xlu2 %2096  ;;  %v3107_v36 = vrot.slane %v2916_v30, 4  ;;  %v2316_v61 = vadd.f32 %v8334_v44, %v8333_v26  ;;  %v3067_v16 = vrot.slane %v2836_v31, 4 }
 0x3a5   : > { %v2796_v62 = vadd.f32 %v2415_v19, %v2284_v60  ;;  %v2852_v27 = vadd.f32 %v6592_v2, %v2340_v17  ;;  %v8336_v2 = vld [vmem:[#allocation41_spill] sm:$0xff]  ;;  %v8337_v17 = vld [vmem:[#allocation116_spill] sm:$0xff] }
 0x3a6   : > { %v3108_v35 = vsel %vm2923_vm11, %v3107_v36, %v2908_v12  ;;  %v8335_v12 = vld [vmem:[#allocation112_spill] sm:$0xff]  ;;  %v6730_v36 = vrot.slane %v6032_v57, 6  ;;  %v2332_v23 = vadd.f32 %v8337_v17, %v8336_v2  ;;  %v8340_v2 = vrot.slane %v6550_v54, 7 }
 0x3a7   : > { %v3052_v15 = vsel %vm2923_vm11, %v3051_v11, %v2796_v62  ;;  %v6718_v60 = vperm.slane %v3108_v35, %v6333_v40  ;;  %v8338_v62 = vrot.slane %v8314_v14, 7  ;;  %v8339_v35 = vld [vmem:[#allocation145_spill] sm:$0xff] }
 0x3a8   : > { %v6714_v22 = vperm.slane %v3052_v15, %v6333_v40  ;;  %2546 = vrot.lane.b32.xlu0 %v8332_v32, %s4536_s6  ;;  %v3075_v15 = vrot.slane %v2852_v27, 4  ;;  %v2388_v26 = vadd.f32 %v6633_v51, %v8339_v35  ;;  %v1839_v17 = vrot.slane %v8340_v2, 2  ;;  %v8342_v32 = vld [vmem:[#allocation164_spill] sm:$0xff] }
 0x3a9   : > { %3577 = vst [vmem:[#allocation1 + $0x23] ss:$4 sm:$0xff] %v6718_v60  ;;  %v2479_v55 = vpop.permute.xlu0 %2478  ;;  %v1789_v41 = vrot.slane %v8338_v62, 2  ;;  %v7977_v62 = vrot.slane %v6730_v36, 7  ;;  %v6751_v27 = vrot.slane %v6571_v7, 2 }
 0x3aa   : > { %3563 = vst [vmem:[#allocation1] ss:$4 sm:$0xff] %v6714_v22  ;;  %2610 = vrot.lane.b32.xlu2 %v6568_v25, %s4536_s6  ;;  %2578 = vrot.lane.b32.xlu1 %v8335_v12, %s4536_s6  ;;  %v2828_v30 = vadd.f32 %v2479_v55, %v2316_v61  ;;  %v8341_v12 = vld [vmem:[#allocation117_spill] sm:$0xff] }
 0x3ab   : > { %v2372_v31 = vadd.f32 %v8342_v32, %v8341_v12  ;;  %v1841_v32 = vsel %vm5244_vm10, %v1839_v17, %v7977_v62  ;;  %v8343_v12 = vrot.slane %v6710_v24, 7  ;;  %v8349_v62 = vld [vmem:[#allocation124_spill] sm:$0xff] }
 0x3ac   : > { %v2511_v19 = vpop.permute.xlu1 %2510  ;;  %v6735_v11 = vpop.permute.xlu2 %2464  ;;  %v3068_v61 = vsel %vm2923_vm11, %v3067_v16, %v2828_v30  ;;  %v8345_v30 = vld [vmem:[#allocation159_spill] sm:$0xff] }
 0x3ad   : > { %v2844_v44 = vadd.f32 %v2511_v19, %v2332_v23  ;;  %v3072_v55 = vperm.slane %v3068_v61, %v6333_v40  ;;  %v2884_v28 = vadd.f32 %v2591_v43, %v2372_v31  ;;  %v2900_v23 = vadd.f32 %v6635_v8, %v2388_v26  ;;  %v8346_v19 = vld [vmem:[#allocation150_spill] sm:$0xff] }
 0x3ae   : > { %v1791_v16 = vsel %vm5244_vm10, %v1789_v41, %v8343_v12  ;;  %v6766_v43 = vrot.slane %v8257_v48, 4  ;;  %v8347_v26 = vrot.slane %v6568_v25, 7  ;;  %v8348_v61 = vrot.slane %v6571_v7, 7 }
 0x3af   : > { %v3076_v4 = vsel %vm2923_vm11, %v3075_v15, %v2844_v44  ;;  %3567 = vst [vmem:[#allocation1 + $0x2] ss:$4 sm:$0xff] %v3072_v55  ;;  %v2380_v15 = vadd.f32 %v6645_v33, %v8346_v19  ;;  %v3091_v2 = vrot.slane %v2884_v28, 4  ;;  %v7980_v33 = vrot.slane %v8349_v62, 7 }
 0x3b0   : > { %v3080_v51 = vperm.slane %v3076_v4, %v6333_v40  ;;  %2642 = vrot.lane.b32.xlu0 %v6586_v42, %s4536_s6  ;;  %v8344_v4 = vld [vmem:[#allocation77_spill] sm:$0xff]  ;;  %v1814_v44 = vrot.slane %v8347_v26, 2  ;;  %v1889_v12 = vrot.slane %v8348_v61, 2  ;;  %v3065_v19 = vrot.slane %v6666_v1, 4 }
 0x3b1   : > { %v2364_v8 = vadd.f32 %v8345_v30, %v8344_v4  ;;  %v2575_v35 = vpop.permute.xlu0 %2574  ;;  %v7979_v28 = vrot.slane %v6766_v43, 7  ;;  %v8350_v61 = vrot.slane %v6586_v42, 7 }
 0x3b2   : > { %3569 = vst [vmem:[#allocation1 + $0x3] ss:$4 sm:$0xff] %v3080_v51  ;;  %2116 = vrot.lane.b32.xlu2 %v1841_v32, %s4535_s30  ;;  %2084 = vrot.lane.b32.xlu1 %v1791_v16, %s4535_s30  ;;  %v3099_v32 = vrot.slane %v2900_v23, 4  ;;  %v3057_v16 = vrot.slane %v6714_v22, 4  ;;  %v3081_v23 = vrot.slane %v3080_v51, 4  ;;  %v8351_v22 = vrot.slane %v6751_v27, 7 }
 0x3b3   : > { %v2876_v41 = vadd.f32 %v2575_v35, %v2364_v8  ;;  %v3073_v8 = vrot.slane %v3072_v55, 4  ;;  %v1864_v4 = vrot.slane %v8350_v61, 2  ;;  %v1816_v51 = vsel %vm5244_vm10, %v1814_v44, %v7979_v28 }
 0x3b4   : > { %v2607_v17 = vpop.permute.xlu1 %2606  ;;  %v6776_v31 = vpop.permute.xlu2 %2560  ;;  %v3058_v1 = vsel %vm2923_vm11, 0.0, %v3057_v16 }
 0x3b5   : > { %v2892_v30 = vadd.f32 %v2607_v17, %v2380_v15  ;;  %v3092_v26 = vsel %vm2923_vm11, %v3091_v2, %v2876_v41  ;;  %v1891_v15 = vsel %vm5244_vm10, %v1889_v12, %v8351_v22  ;;  %v1866_v55 = vsel %vm5244_vm10, %v1864_v4, %v7980_v33 }
 0x3b6   : > { %v3096_v35 = vperm.slane %v3092_v26, %v6333_v40  ;;  %v3066_v2 = vsel %vm2923_vm11, 0.0, %v3065_v19  ;;  %v3074_v12 = vsel %vm2923_vm11, 0.0, %v3073_v8  ;;  %v3082_v4 = vsel %vm2923_vm11, 0.0, %v3081_v23  ;;  %v8354_v26 = vld [vmem:[#allocation40_spill] sm:$0xff]  ;;  %v8355_v8 = vld [vmem:[#allocation17_spill] sm:$0xff] }
 0x3b7   : > { %v3100_v25 = vsel %vm2923_vm11, %v3099_v32, %v2892_v30  ;;  %v8353_v30 = vld [vmem:[#allocation10_spill] sm:$0xff]  ;;  %v3113_v22 = vrot.slane %v6718_v60, 4  ;;  %v8358_v60 = vld [vmem:[#allocation33_spill] sm:$0xff] }
 0x3b8   : > { %3573 = vst [vmem:[#allocation1 + $0x21] ss:$4 sm:$0xff] %v3096_v35  ;;  %2148 = vrot.lane.b32.xlu0 %v1891_v15, %s4535_s30  ;;  %v3104_v41 = vperm.slane %v3100_v25, %v6333_v40  ;;  %v3089_v25 = vrot.slane %v6686_v63, 4  ;;  %v3097_v19 = vrot.slane %v3096_v35, 4 }
 0x3b9   : > { %v6795_v17 = vld.sshfl [vmem:[#allocation1] sm:$0xff pattern:$0x73625140] }
 0x3ba   : > { %8352 = vst [vmem:[#allocation56_spill] sm:$0xff] %v6795_v17  ;;  %2132 = vrot.lane.b32.xlu2 %v1866_v55, %s4535_s30  ;;  %2100 = vrot.lane.b32.xlu1 %v1816_v51, %s4535_s30  ;;  %v6811_v32 = vpop.permute.xlu0 %2112  ;;  %v3105_v61 = vrot.slane %v3104_v41, 4  ;;  %v3090_v55 = vsel %vm2923_vm11, 0.0, %v3089_v25  ;;  %v3098_v51 = vsel %vm2923_vm11, 0.0, %v3097_v19  ;;  %v8360_v25 = vld [vmem:[#allocation98_spill] sm:$0xff]  ;;  %v8371_v17 = vld [vmem:[#allocation13_spill] sm:$0xff] }
 0x3bb   : > { %3594 = vst [vmem:[#allocation1] ss:$4 sm:$0xff] %v3058_v1 }
 0x3bc   : > { %3596 = vst [vmem:[#allocation1 + $0x1] ss:$4 sm:$0xff] %v3066_v2  ;;  %v6814_v16 = vpop.permute.xlu1 %2144  ;;  %v6816_v44 = vpop.permute.xlu2 %2656  ;;  %v3106_v35 = vsel %vm2923_vm11, 0.0, %v3105_v61  ;;  %v3114_v2 = vsel %vm2923_vm11, 0.0, %v3113_v22  ;;  %v8362_v61 = vld [vmem:[#allocation89_spill] sm:$0xff] }
 0x3bd   : > { %3598 = vst [vmem:[#allocation1 + $0x2] ss:$4 sm:$0xff] %v3074_v12  ;;  %v8359_v12 = vld [vmem:[#allocation120_spill] sm:$0xff] }
 0x3be   : > { %3600 = vst [vmem:[#allocation1 + $0x3] ss:$4 sm:$0xff] %v3082_v4  ;;  %v2325_v4 = vadd.f32 %v8359_v12, %v8358_v60  ;;  %v8363_v60 = vld [vmem:[#allocation122_spill] sm:$0xff]  ;;  %v8364_v12 = vld [vmem:[#allocation165_spill] sm:$0xff] }
 0x3bf   : > { %3575 = vst [vmem:[#allocation1 + $0x22] ss:$4 sm:$0xff] %v3104_v41  ;;  %v8357_v41 = vld [vmem:[#allocation66_spill] sm:$0xff] }
 0x3c0   : > { %2436 = vrot.lane.b32.xlu0 %v8353_v30, %s4536_s6 }
 0x3c2   : > { %2500 = vrot.lane.b32.xlu2 %v8354_v26, %s4536_s6  ;;  %2468 = vrot.lane.b32.xlu1 %v8355_v8, %s4536_s6  ;;  %v6825_v23 = vpop.permute.xlu0 %2128 }
 0x3c4   : > { %v2433_v15 = vpop.permute.xlu1 %2432  ;;  %v2481_v1 = vpop.permute.xlu2 %2480 }
 0x3c6   : > { %v6829_v63 = vld.sshfl [vmem:[#allocation1 + $0x20] sm:$0xff pattern:$0x73625140] }
 0x3c7   : > { %8356 = vst [vmem:[#allocation62_spill] sm:$0xff] %v6829_v63  ;;  %v6852_v63 = vld.sshfl [vmem:[#allocation1] sm:$0xff pattern:$0x73625140] }
 0x3c8   : > { %3602 = vst [vmem:[#allocation1 + $0x20] ss:$4 sm:$0xff] %v3090_v55  ;;  %2532 = vrot.lane.b32.xlu0 %v8357_v41, %s4536_s6  ;;  %v8361_v55 = vld [vmem:[#allocation29_spill] sm:$0xff] }
 0x3c9   : > { %3604 = vst [vmem:[#allocation1 + $0x21] ss:$4 sm:$0xff] %v3098_v51  ;;  %v2317_v51 = vadd.f32 %v8362_v61, %v8361_v55  ;;  %v8366_v55 = vld [vmem:[#allocation3_spill] sm:$0xff]  ;;  %v8372_v41 = vld [vmem:[#allocation93_spill] sm:$0xff] }
 0x3ca   : > { %3606 = vst [vmem:[#allocation1 + $0x22] ss:$4 sm:$0xff] %v3106_v35  ;;  %2596 = vrot.lane.b32.xlu2 %v6710_v24, %s4536_s6  ;;  %2564 = vrot.lane.b32.xlu1 %v8360_v25, %s4536_s6  ;;  %v2497_v19 = vpop.permute.xlu0 %2496  ;;  %v2373_v25 = vadd.f32 %v8364_v12, %v8363_v60 }
 0x3cb   : > { %3608 = vst [vmem:[#allocation1 + $0x23] ss:$4 sm:$0xff] %v3114_v2  ;;  %v2837_v28 = vadd.f32 %v2497_v19, %v2325_v4  ;;  %v2829_v2 = vadd.f32 %v2481_v1, %v2317_v51  ;;  %v8369_v51 = vld [vmem:[#allocation6_spill] sm:$0xff] }
 0x3cc   : > { %v2529_v22 = vpop.permute.xlu1 %2528  ;;  %v2577_v35 = vpop.permute.xlu2 %2576  ;;  %8365 = vst [vmem:[#allocation96_spill] sm:$0xff] %v6852_v63 }
 0x3cd   : > { %v3131_v33 = vrot.slane %v2837_v28, 4  ;;  %v8367_v28 = vld [vmem:[#allocation107_spill] sm:$0xff] }
 0x3cf   : > { %v3132_v26 = vsel %vm2923_vm11, %v3131_v33, %v2829_v2  ;;  %v8370_v2 = vld [vmem:[#allocation44_spill] sm:$0xff] }
 0x3d0   : > { %v6846_v8 = vperm.slane %v3132_v26, %v6333_v40  ;;  %2628 = vrot.lane.b32.xlu0 %v6730_v36, %s4536_s6  ;;  %v8368_v26 = vld [vmem:[#allocation153_spill] sm:$0xff]  ;;  %v2293_v60 = vadd.f32 %v8370_v2, %v8369_v51 }
 0x3d1   : > { %v2365_v1 = vadd.f32 %v8368_v26, %v8367_v28  ;;  %v8375_v28 = vld [vmem:[#allocation47_spill] sm:$0xff] }
 0x3d2   : > { %2420 = vrot.lane.b32.xlu2 %v8366_v55, %s4536_s6  ;;  %2660 = vrot.lane.b32.xlu1 %v6751_v27, %s4536_s6  ;;  %3629 = vst [vmem:[#allocation1 + $0x2] ss:$4 sm:$0xff] %v6846_v8  ;;  %v2593_v33 = vpop.permute.xlu0 %2592  ;;  %v2309_v55 = vadd.f32 %v8372_v41, %v8371_v17  ;;  %v2805_v30 = vadd.f32 %v2433_v15, %v2293_v60  ;;  %v6876_v51 = vld.sshfl [vmem:[#allocation1 + $0x20] sm:$0xff pattern:$0x73625140]  ;;  %v8378_v17 = vld [vmem:[#allocation19_spill] sm:$0xff] }
 0x3d3   : > { %v2885_v4 = vadd.f32 %v2593_v33, %v2373_v25  ;;  %v2877_v12 = vadd.f32 %v2577_v35, %v2365_v1  ;;  %v8373_v25 = vld [vmem:[#allocation15_spill] sm:$0xff]  ;;  %v8374_v33 = vld [vmem:[#allocation2_spill] sm:$0xff]  ;;  %8376 = vst [vmem:[#allocation43_spill] sm:$0xff] %v6876_v51  ;;  %v8379_v15 = vld [vmem:[#allocation12_spill] sm:$0xff] }
 0x3d4   : > { %v2625_v19 = vpop.permute.xlu1 %2624  ;;  %v6861_v61 = vpop.permute.xlu2 %2114  ;;  %v2821_v54 = vadd.f32 %v6735_v11, %v2309_v55  ;;  %v2285_v26 = vadd.f32 %v8375_v28, %v8374_v33  ;;  %v8377_v35 = vld [vmem:[#allocation46_spill] sm:$0xff]  ;;  %v3115_v41 = vrot.slane %v2805_v30, 4 }
 0x3d5   : > { %v3155_v63 = vrot.slane %v2885_v4, 4  ;;  %v8382_v33 = vld [vmem:[#allocation130_spill] sm:$0xff] }
 0x3d6   : > { %v3123_v2 = vrot.slane %v2821_v54, 4 }
 0x3d7   : > { %v3156_v42 = vsel %vm2923_vm11, %v3155_v63, %v2877_v12  ;;  %v8380_v63 = vld [vmem:[#allocation75_spill] sm:$0xff]  ;;  %v8381_v12 = vld [vmem:[#allocation60_spill] sm:$0xff] }
 0x3d8   : > { %v6870_v58 = vperm.slane %v3156_v42, %v6333_v40  ;;  %2452 = vrot.lane.b32.xlu0 %v8373_v25, %s4536_s6  ;;  %v2301_v11 = vadd.f32 %v8380_v63, %v8379_v15  ;;  %v2341_v28 = vadd.f32 %v8382_v33, %v8381_v12  ;;  %v8391_v33 = vrot.slane %v6710_v24, 7 }
 0x3da   : > { %2516 = vrot.lane.b32.xlu2 %v8377_v35, %s4536_s6  ;;  %2484 = vrot.lane.b32.xlu1 %v8378_v17, %s4536_s6  ;;  %3635 = vst [vmem:[#allocation1 + $0x21] ss:$4 sm:$0xff] %v6870_v58  ;;  %v2417_v42 = vpop.permute.xlu0 %2416  ;;  %v8383_v35 = vld [vmem:[#allocation92_spill] sm:$0xff]  ;;  %v8384_v17 = vld [vmem:[#allocation154_spill] sm:$0xff]  ;;  %v2853_v30 = vadd.f32 %v2529_v22, %v2341_v28  ;;  %v8388_v22 = vld [vmem:[#allocation85_spill] sm:$0xff]  ;;  %v1792_v28 = vrot.slane %v8391_v33, 2 }
 0x3db   : > { %v2797_v55 = vadd.f32 %v2417_v42, %v2285_v26  ;;  %v2357_v25 = vadd.f32 %v8384_v17, %v8383_v35  ;;  %v8386_v42 = vld [vmem:[#allocation45_spill] sm:$0xff] }
 0x3dc   : > { %v2449_v1 = vpop.permute.xlu1 %2448  ;;  %v6885_v4 = vpop.permute.xlu2 %2130 }
 0x3dd   : > { %v2813_v60 = vadd.f32 %v2449_v1, %v2301_v11  ;;  %v3116_v51 = vsel %vm2923_vm11, %v3115_v41, %v2797_v55  ;;  %v2869_v54 = vadd.f32 %v6776_v31, %v2357_v25  ;;  %v8385_v11 = vld [vmem:[#allocation83_spill] sm:$0xff]  ;;  %v8387_v41 = vld [vmem:[#allocation132_spill] sm:$0xff]  ;;  %v3139_v1 = vrot.slane %v2853_v30, 4 }
 0x3de   : > { %v6893_v15 = vperm.slane %v3116_v51, %v6333_v40  ;;  %v2333_v55 = vadd.f32 %v8387_v41, %v8386_v42  ;;  %v6911_v51 = vrot.slane %v8314_v14, 4  ;;  %v8389_v31 = vld [vmem:[#allocation79_spill] sm:$0xff]  ;;  %v2405_v42 = vadd.f32 %v6814_v16, %v6262_v50 }
 0x3df   : > { %v3124_v63 = vsel %vm2923_vm11, %v3123_v2, %v2813_v60  ;;  %v8390_v25 = vld [vmem:[#allocation147_spill] sm:$0xff]  ;;  %v6934_v16 = vrot.slane %v8349_v62, 2 }
 0x3e0   : > { %v6897_v26 = vperm.slane %v3124_v63, %v6333_v40  ;;  %3625 = vst [vmem:[#allocation1] ss:$4 sm:$0xff] %v6893_v15  ;;  %2548 = vrot.lane.b32.xlu0 %v8385_v11, %s4536_s6  ;;  %v2349_v35 = vadd.f32 %v8390_v25, %v8389_v31  ;;  %v3147_v63 = vrot.slane %v2869_v54, 4  ;;  %v7983_v11 = vrot.slane %v6072_v20, 7 }
 0x3e1   : > { %v8392_v25 = vrot.slane %v6730_v36, 7  ;;  %v7987_v54 = vrot.slane %v6911_v51, 7 }
 0x3e2   : > { %3627 = vst [vmem:[#allocation1 + $0x1] ss:$4 sm:$0xff] %v6897_v26  ;;  %2612 = vrot.lane.b32.xlu2 %v6766_v43, %s4536_s6  ;;  %2580 = vrot.lane.b32.xlu1 %v8388_v22, %s4536_s6  ;;  %v2513_v17 = vpop.permute.xlu0 %2512  ;;  %v2389_v22 = vadd.f32 %v6811_v32, %v6032_v57  ;;  %v2917_v57 = vadd.f32 %v6816_v44, %v2405_v42 }
 0x3e3   : > { %v2845_v2 = vadd.f32 %v2513_v17, %v2333_v55  ;;  %v1842_v17 = vrot.slane %v8392_v25, 2  ;;  %v2381_v44 = vadd.f32 %v6702_v0, %v6284_v38  ;;  %v3121_v0 = vrot.slane %v6893_v15, 4 }
 0x3e4   : > { %v2545_v60 = vpop.permute.xlu1 %2544  ;;  %v6915_v12 = vpop.permute.xlu2 %2498  ;;  %v2901_v33 = vadd.f32 %v2625_v19, %v2389_v22  ;;  %v1794_v19 = vsel %vm5244_vm10, %v1792_v28, %v7987_v54  ;;  %v6948_v22 = vrot.slane %v6571_v7, 4  ;;  %v8395_v25 = vrot.slane %v6751_v27, 7 }
 0x3e5   : > { %v2861_v41 = vadd.f32 %v2545_v60, %v2349_v35  ;;  %v3140_v31 = vsel %vm2923_vm11, %v3139_v1, %v2845_v2  ;;  %v1844_v32 = vsel %vm5244_vm10, %v1842_v17, %v7983_v11  ;;  %v6956_v35 = vrot.slane %v8257_v48, 6 }
 0x3e6   : > { %v3144_v30 = vperm.slane %v3140_v31, %v6333_v40  ;;  %v2397_v1 = vadd.f32 %v6825_v23, %v6271_v47  ;;  %v8393_v60 = vrot.slane %v8349_v62, 7  ;;  %v3163_v38 = vrot.slane %v2901_v33, 4 }
 0x3e7   : > { %v3148_v55 = vsel %vm2923_vm11, %v3147_v63, %v2861_v41  ;;  %v8394_v63 = vrot.slane %v6766_v43, 7  ;;  %v1892_v17 = vrot.slane %v8395_v25, 2  ;;  %v3129_v47 = vrot.slane %v6897_v26, 4 }
 0x3e8   : > { %v6931_v50 = vperm.slane %v3148_v55, %v6333_v40  ;;  %3631 = vst [vmem:[#allocation1 + $0x3] ss:$4 sm:$0xff] %v3144_v30  ;;  %2644 = vrot.lane.b32.xlu0 %v8349_v62, %s4536_s6  ;;  %v1867_v28 = vrot.slane %v8393_v60, 2  ;;  %v3137_v60 = vrot.slane %v6846_v8, 4  ;;  %v7986_v33 = vrot.slane %v6948_v22, 7 }
 0x3e9   : > { %v1817_v42 = vrot.slane %v8394_v63, 2  ;;  %v3145_v15 = vrot.slane %v3144_v30, 4  ;;  %v3122_v11 = vsel %vm2923_vm11, 0.0, %v3121_v0  ;;  %v3130_v8 = vsel %vm2923_vm11, 0.0, %v3129_v47 }
 0x3ea   : > { %3633 = vst [vmem:[#allocation1 + $0x20] ss:$4 sm:$0xff] %v6931_v50  ;;  %2118 = vrot.lane.b32.xlu2 %v1844_v32, %s4535_s30  ;;  %2086 = vrot.lane.b32.xlu1 %v1794_v19, %s4535_s30  ;;  %v2609_v2 = vpop.permute.xlu0 %2608  ;;  %v3171_v32 = vrot.slane %v2917_v57, 4  ;;  %v7985_v19 = vrot.slane %v6934_v16, 7  ;;  %v1894_v26 = vsel %vm5244_vm10, %v1892_v17, %v7986_v33  ;;  %v8396_v17 = vld [vmem:[#allocation27_spill] sm:$0xff] }
 0x3eb   : > { %v2893_v41 = vadd.f32 %v2609_v2, %v2381_v44  ;;  %v7984_v2 = vrot.slane %v6956_v35, 7 }
 0x3ec   : > { %v2641_v31 = vpop.permute.xlu1 %2640  ;;  %v6965_v55 = vpop.permute.xlu2 %2594  ;;  %v1869_v30 = vsel %vm5244_vm10, %v1867_v28, %v7985_v19 }
 0x3ed   : > { %v2909_v23 = vadd.f32 %v2641_v31, %v2397_v1  ;;  %v3164_v63 = vsel %vm2923_vm11, %v3163_v38, %v2893_v41  ;;  %v1819_v1 = vsel %vm5244_vm10, %v1817_v42, %v7984_v2  ;;  %v3138_v38 = vsel %vm2923_vm11, 0.0, %v3137_v60  ;;  %v8398_v60 = vld [vmem:[#allocation39_spill] sm:$0xff] }
 0x3ee   : > { %v3168_v57 = vperm.slane %v3164_v63, %v6333_v40  ;;  %v3153_v42 = vrot.slane %v6931_v50, 4  ;;  %v8399_v63 = vld [vmem:[#allocation16_spill] sm:$0xff] }
 0x3ef   : > { %v3172_v44 = vsel %vm2923_vm11, %v3171_v32, %v2909_v23  ;;  %v6977_v25 = vld.sshfl [vmem:[#allocation1] sm:$0xff pattern:$0x73625140]  ;;  %v8397_v32 = vld [vmem:[#allocation63_spill] sm:$0xff]  ;;  %v3161_v23 = vrot.slane %v6870_v58, 4 }
 0x3f0   : > { %3656 = vst [vmem:[#allocation1] ss:$4 sm:$0xff] %v3122_v11  ;;  %2150 = vrot.lane.b32.xlu0 %v1894_v26, %s4535_s30  ;;  %v3176_v0 = vperm.slane %v3172_v44, %v6333_v40  ;;  %v3146_v11 = vsel %vm2923_vm11, 0.0, %v3145_v15  ;;  %v2294_v47 = vadd.f32 %v8397_v32, %v8269_v34  ;;  %v3169_v15 = vrot.slane %v3168_v57, 4  ;;  %v8400_v26 = vld [vmem:[#allocation48_spill] sm:$0xff] }
 0x3f1   : > { %3658 = vst [vmem:[#allocation1 + $0x1] ss:$4 sm:$0xff] %v3130_v8  ;;  %v2286_v8 = vadd.f32 %v8400_v26, %v8280_v59  ;;  %v3162_v58 = vsel %vm2923_vm11, 0.0, %v3161_v23 }
 0x3f2   : > { %2134 = vrot.lane.b32.xlu2 %v1869_v30, %s4535_s30  ;;  %2102 = vrot.lane.b32.xlu1 %v1819_v1, %s4535_s30  ;;  %3660 = vst [vmem:[#allocation1 + $0x2] ss:$4 sm:$0xff] %v3138_v38  ;;  %v6999_v41 = vpop.permute.xlu0 %2146  ;;  %v3177_v50 = vrot.slane %v3176_v0, 4  ;;  %v3170_v19 = vsel %vm2923_vm11, 0.0, %v3169_v15  ;;  %v8403_v15 = vld [vmem:[#allocation69_spill] sm:$0xff] }
 0x3f3   : > { %3662 = vst [vmem:[#allocation1 + $0x3] ss:$4 sm:$0xff] %v3146_v11  ;;  %v3154_v11 = vsel %vm2923_vm11, 0.0, %v3153_v42  ;;  %v8401_v42 = vld [vmem:[#allocation68_spill] sm:$0xff] }
 0x3f4   : > { %v2099_v28 = vpop.permute.xlu1 %2098  ;;  %v2419_v31 = vpop.permute.xlu2 %2418  ;;  %3637 = vst [vmem:[#allocation1 + $0x22] ss:$4 sm:$0xff] %v3168_v57  ;;  %v3178_v57 = vsel %vm2923_vm11, 0.0, %v3177_v50 }
 0x3f5   : > { %3639 = vst [vmem:[#allocation1 + $0x23] ss:$4 sm:$0xff] %v3176_v0  ;;  %v2798_v32 = vadd.f32 %v2419_v31, %v2286_v8 }
 0x3f8   : > { %2438 = vrot.lane.b32.xlu0 %v8396_v17, %s4536_s6 }
 0x3fa   : > { %2502 = vrot.lane.b32.xlu2 %v8398_v60, %s4536_s6  ;;  %2470 = vrot.lane.b32.xlu1 %v8399_v63, %s4536_s6  ;;  %v2435_v44 = vpop.permute.xlu0 %2434  ;;  %v7027_v31 = vld.sshfl [vmem:[#allocation1] sm:$0xff pattern:$0x73625140] }
 0x3fb   : > { %v2806_v30 = vadd.f32 %v2435_v44, %v2294_v47  ;;  %v8402_v47 = vld [vmem:[#allocation140_spill] sm:$0xff] }
 0x3fc   : > { %v2467_v1 = vpop.permute.xlu1 %2466  ;;  %v2515_v38 = vpop.permute.xlu2 %2514  ;;  %v7014_v34 = vld.sshfl [vmem:[#allocation1 + $0x20] sm:$0xff pattern:$0x73625140]  ;;  %v2342_v23 = vadd.f32 %v8402_v47, %v8273_v49 }
 0x3fd   : > { %3664 = vst [vmem:[#allocation1 + $0x20] ss:$4 sm:$0xff] %v3154_v11  ;;  %v3179_v2 = vrot.slane %v2806_v30, 4 }
 0x3fe   : > { %3666 = vst [vmem:[#allocation1 + $0x21] ss:$4 sm:$0xff] %v3162_v58 }
 0x3ff   : > { %3668 = vst [vmem:[#allocation1 + $0x22] ss:$4 sm:$0xff] %v3170_v19  ;;  %v3180_v59 = vsel %vm2923_vm11, %v3179_v2, %v2798_v32  ;;  %v8404_v2 = vld [vmem:[#allocation133_spill] sm:$0xff]  ;;  %v2390_v32 = vadd.f32 %v6861_v61, %v6388_v21  ;;  %v8407_v61 = vld [vmem:[#allocation106_spill] sm:$0xff] }
 0x400   : > { %3670 = vst [vmem:[#allocation1 + $0x23] ss:$4 sm:$0xff] %v3178_v57  ;;  %v7021_v0 = vperm.slane %v3180_v59, %v6333_v40  ;;  %2534 = vrot.lane.b32.xlu0 %v8401_v42, %s4536_s6  ;;  %v2334_v44 = vadd.f32 %v8404_v2, %v8285_v52  ;;  %v8405_v57 = vld [vmem:[#allocation7_spill] sm:$0xff] }
 0x402   : > { %2598 = vrot.lane.b32.xlu2 %v6911_v51, %s4536_s6  ;;  %2566 = vrot.lane.b32.xlu1 %v8403_v15, %s4536_s6  ;;  %3687 = vst [vmem:[#allocation1] ss:$4 sm:$0xff] %v7021_v0  ;;  %v2531_v19 = vpop.permute.xlu0 %2530  ;;  %v2846_v30 = vadd.f32 %v2515_v38, %v2334_v44  ;;  %v2382_v38 = vadd.f32 %v2099_v28, %v8257_v48  ;;  %v8408_v48 = vld [vmem:[#allocation11_spill] sm:$0xff]  ;;  %v8409_v28 = vld [vmem:[#allocation58_spill] sm:$0xff] }
 0x403   : > { %v2854_v26 = vadd.f32 %v2531_v19, %v2342_v23  ;;  %v8406_v19 = vld [vmem:[#allocation94_spill] sm:$0xff] }
 0x404   : > { %v2563_v8 = vpop.permute.xlu1 %2562  ;;  %v2611_v50 = vpop.permute.xlu2 %2610  ;;  %v2310_v2 = vadd.f32 %v8406_v19, %v8270_v45 }
 0x405   : > { %v3203_v11 = vrot.slane %v2854_v26, 4  ;;  %v2894_v44 = vadd.f32 %v2611_v50, %v2382_v38  ;;  %v2326_v26 = vadd.f32 %v8407_v61, %v8271_v18  ;;  %v8410_v50 = vld [vmem:[#allocation55_spill] sm:$0xff]  ;;  %v8411_v18 = vld [vmem:[#allocation34_spill] sm:$0xff] }
 0x407   : > { %v3204_v49 = vsel %vm2923_vm11, %v3203_v11, %v2846_v30  ;;  %v2822_v30 = vadd.f32 %v2467_v1, %v2310_v2  ;;  %v7065_v45 = vld.sshfl [vmem:[#allocation1 + $0x20] sm:$0xff pattern:$0x73625140] }
 0x408   : > { %v7038_v58 = vperm.slane %v3204_v49, %v6333_v40  ;;  %2630 = vrot.lane.b32.xlu0 %v6072_v20, %s4536_s6  ;;  %v2838_v49 = vadd.f32 %v6915_v12, %v2326_v26  ;;  %v8412_v1 = vld [vmem:[#allocation109_spill] sm:$0xff] }
 0x409   : > { %v2318_v12 = vadd.f32 %v8412_v1, %v8282_v56  ;;  %v3187_v38 = vrot.slane %v2822_v30, 4 }
 0x40a   : > { %2422 = vrot.lane.b32.xlu2 %v8405_v57, %s4536_s6  ;;  %2662 = vrot.lane.b32.xlu1 %v6948_v22, %s4536_s6  ;;  %3693 = vst [vmem:[#allocation1 + $0x3] ss:$4 sm:$0xff] %v7038_v58  ;;  %v2627_v52 = vpop.permute.xlu0 %2626 }
 0x40b   : > { %v2902_v59 = vadd.f32 %v2627_v52, %v2390_v32  ;;  %v2302_v32 = vadd.f32 %v8409_v28, %v8281_v39  ;;  %v3195_v39 = vrot.slane %v2838_v49, 4  ;;  %v8415_v49 = vld [vmem:[#allocation84_spill] sm:$0xff] }
 0x40c   : > { %v7050_v47 = vpop.permute.xlu2 %2116  ;;  %v2659_v23 = vpop.permute.xlu1 %2658 }
 0x40d   : > { %v3227_v21 = vrot.slane %v2902_v59, 4 }
 0x40f   : > { %v3228_v11 = vsel %vm2923_vm11, %v3227_v21, %v2894_v44  ;;  %v8413_v21 = vld [vmem:[#allocation155_spill] sm:$0xff] }
 0x410   : > { %v7059_v33 = vperm.slane %v3228_v11, %v6333_v40  ;;  %2454 = vrot.lane.b32.xlu0 %v8408_v48, %s4536_s6  ;;  %v2358_v61 = vadd.f32 %v8413_v21, %v8274_v6  ;;  %v8414_v11 = vld [vmem:[#allocation160_spill] sm:$0xff]  ;;  %v7988_v6 = vrot.slane %v6072_v20, 2 }
 0x411   : > { %v2374_v28 = vadd.f32 %v8414_v11, %v8277_v29  ;;  %v8417_v29 = vld [vmem:[#allocation114_spill] sm:$0xff] }
 0x412   : > { %2518 = vrot.lane.b32.xlu2 %v8410_v50, %s4536_s6  ;;  %2486 = vrot.lane.b32.xlu1 %v8411_v18, %s4536_s6  ;;  %3699 = vst [vmem:[#allocation1 + $0x22] ss:$4 sm:$0xff] %v7059_v33  ;;  %v2451_v52 = vpop.permute.xlu0 %2450  ;;  %v2870_v54 = vadd.f32 %v2563_v8, %v2358_v61  ;;  %v8418_v8 = vld [vmem:[#allocation161_spill] sm:$0xff] }
 0x413   : > { %v2814_v59 = vadd.f32 %v2451_v52, %v2302_v32  ;;  %v2886_v32 = vadd.f32 %v6965_v55, %v2374_v28  ;;  %v8420_v28 = vrot.slane %v6072_v20, 7 }
 0x414   : > { %v7074_v19 = vpop.permute.xlu2 %2132  ;;  %v2483_v2 = vpop.permute.xlu1 %2482 }
 0x415   : > { %v2830_v44 = vadd.f32 %v2483_v2, %v2318_v12  ;;  %v3188_v26 = vsel %vm2923_vm11, %v3187_v38, %v2814_v59  ;;  %v8416_v12 = vld [vmem:[#allocation139_spill] sm:$0xff]  ;;  %v2366_v38 = vadd.f32 %v8418_v8, %v8289_v53  ;;  %v1367_v59 = vrot.slane %v8314_v14, 6 }
 0x416   : > { %v3192_v56 = vperm.slane %v3188_v26, %v6333_v40  ;;  %v2350_v52 = vadd.f32 %v8416_v12, %v8288_v3  ;;  %v3211_v2 = vrot.slane %v2870_v54, 4  ;;  %v8419_v3 = vrot.slane %v6911_v51, 7 }
 0x417   : > { %v3196_v1 = vsel %vm2923_vm11, %v3195_v39, %v2830_v44  ;;  %v3219_v26 = vrot.slane %v2886_v32, 4  ;;  %v1846_v12 = vrot.slane %v7988_v6, 7  ;;  %v2406_v53 = vadd.f32 %v6999_v41, %v6402_v37 }
 0x418   : > { %v3200_v30 = vperm.slane %v3196_v1, %v6333_v40  ;;  %3689 = vst [vmem:[#allocation1 + $0x1] ss:$4 sm:$0xff] %v3192_v56  ;;  %2550 = vrot.lane.b32.xlu0 %v8415_v49, %s4536_s6  ;;  %v1795_v61 = vrot.slane %v8419_v3, 2  ;;  %v1845_v1 = vrot.slane %v8420_v28, 2  ;;  %v3185_v54 = vrot.slane %v7021_v0, 4 }
 0x419   : > { %v3193_v8 = vrot.slane %v3192_v56, 4  ;;  %v1796_v32 = vrot.slane %v1367_v59, 7  ;;  %v3209_v6 = vrot.slane %v7038_v58, 4  ;;  %v1394_v0 = vrot.slane %v6571_v7, 6 }
 0x41a   : > { %3691 = vst [vmem:[#allocation1 + $0x2] ss:$4 sm:$0xff] %v3200_v30  ;;  %2614 = vrot.lane.b32.xlu2 %v6956_v35, %s4536_s6  ;;  %2582 = vrot.lane.b32.xlu1 %v8417_v29, %s4536_s6  ;;  %v2547_v55 = vpop.permute.xlu0 %2546  ;;  %v1847_v37 = vsel %vm5244_vm10, %v1845_v1, %v1846_v12  ;;  %v3186_v56 = vsel %vm2923_vm11, 0.0, %v3185_v54  ;;  %v8421_v1 = vrot.slane %v6948_v22, 7  ;;  %v8422_v54 = vrot.slane %v6934_v16, 7 }
 0x41b   : > { %v2862_v39 = vadd.f32 %v2547_v55, %v2350_v52  ;;  %v1797_v41 = vsel %vm5244_vm10, %v1795_v61, %v1796_v32 }
 0x41c   : > { %v7097_v44 = vpop.permute.xlu2 %2500  ;;  %v2579_v21 = vpop.permute.xlu1 %2578  ;;  %v1895_v12 = vrot.slane %v8421_v1, 2 }
 0x41d   : > { %v2878_v11 = vadd.f32 %v2579_v21, %v2366_v38  ;;  %v3212_v52 = vsel %vm2923_vm11, %v3211_v2, %v2862_v39  ;;  %v2918_v38 = vadd.f32 %v2659_v23, %v2406_v53  ;;  %v3201_v21 = vrot.slane %v3200_v30, 4 }
 0x41e   : > { %v3216_v55 = vperm.slane %v3212_v52, %v6333_v40  ;;  %v2398_v23 = vadd.f32 %v6885_v4, %v6442_v10  ;;  %v3194_v30 = vsel %vm2923_vm11, 0.0, %v3193_v8  ;;  %v7989_v39 = vrot.slane %v8349_v62, 4  ;;  %v8423_v8 = vld [vmem:[#allocation118_spill] sm:$0xff] }
 0x41f   : > { %v3220_v3 = vsel %vm2923_vm11, %v3219_v26, %v2878_v11  ;;  %v3235_v61 = vrot.slane %v2918_v38, 4  ;;  %v3202_v26 = vsel %vm2923_vm11, 0.0, %v3201_v21  ;;  %v3210_v53 = vsel %vm2923_vm11, 0.0, %v3209_v6 }
 0x420   : > { %v3224_v28 = vperm.slane %v3220_v3, %v6333_v40  ;;  %3695 = vst [vmem:[#allocation1 + $0x20] ss:$4 sm:$0xff] %v3216_v55  ;;  %2646 = vrot.lane.b32.xlu0 %v6934_v16, %s4536_s6  ;;  %v1870_v52 = vrot.slane %v8422_v54, 2  ;;  %v1821_v3 = vrot.slane %v8423_v8, 7  ;;  %v1896_v38 = vrot.slane %v1394_v0, 7 }
 0x421   : > { %v7127_v58 = vld.sshfl [vmem:[#allocation1] sm:$0xff pattern:$0x73625140] }
 0x422   : > { %3697 = vst [vmem:[#allocation1 + $0x21] ss:$4 sm:$0xff] %v3224_v28  ;;  %2120 = vrot.lane.b32.xlu2 %v1847_v37, %s4535_s30  ;;  %2088 = vrot.lane.b32.xlu1 %v1797_v41, %s4535_s30  ;;  %v2643_v2 = vpop.permute.xlu0 %2642  ;;  %v1871_v37 = vrot.slane %v7989_v39, 7  ;;  %v8424_v41 = vrot.slane %v6956_v35, 7  ;;  %v3225_v1 = vrot.slane %v3224_v28, 4  ;;  %v8428_v28 = vrot.slane %v8308_v13, 6 }
 0x423   : > { %3714 = vst [vmem:[#allocation1] ss:$4 sm:$0xff] %v3186_v56  ;;  %v2910_v11 = vadd.f32 %v2643_v2, %v2398_v23  ;;  %v1897_v23 = vsel %vm5244_vm10, %v1895_v12, %v1896_v38  ;;  %v3233_v12 = vrot.slane %v7059_v33, 4  ;;  %v8427_v33 = vrot.slane %v8398_v60, 2 }
 0x424   : > { %v7132_v10 = vpop.permute.xlu2 %2596  ;;  %v7134_v4 = vpop.permute.xlu1 %2084  ;;  %3716 = vst [vmem:[#allocation1 + $0x1] ss:$4 sm:$0xff] %v3194_v30  ;;  %v1820_v6 = vrot.slane %v8424_v41, 2  ;;  %v1872_v56 = vsel %vm5244_vm10, %v1870_v52, %v1871_v37  ;;  %v3226_v9 = vsel %vm2923_vm11, 0.0, %v3225_v1  ;;  %v8425_v52 = vrot.slane %v8396_v17, 2  ;;  %v8429_v41 = vld [vmem:[#allocation37_spill] sm:$0xff] }
 0x425   : > { %3718 = vst [vmem:[#allocation1 + $0x2] ss:$4 sm:$0xff] %v3202_v26  ;;  %v3236_v32 = vsel %vm2923_vm11, %v3235_v61, %v2910_v11  ;;  %v3217_v61 = vrot.slane %v3216_v55, 4  ;;  %v3234_v38 = vsel %vm2923_vm11, 0.0, %v3233_v12 }
 0x426   : > { %3720 = vst [vmem:[#allocation1 + $0x3] ss:$4 sm:$0xff] %v3210_v53  ;;  %v3240_v21 = vperm.slane %v3236_v32, %v6333_v40  ;;  %v1822_v30 = vsel %vm5244_vm10, %v1820_v6, %v1821_v3  ;;  %v8426_v3 = vld [vmem:[#allocation64_spill] sm:$0xff]  ;;  %v2287_v6 = vadd.f32 %v8429_v41, %v8318_v5  ;;  %v8433_v5 = vrot.slane %v8403_v15, 2 }
 0x427   : > { %v3218_v54 = vsel %vm2923_vm11, 0.0, %v3217_v61  ;;  %v2295_v55 = vadd.f32 %v8426_v3, %v8307_v46 }
 0x428   : > { %3701 = vst [vmem:[#allocation1 + $0x23] ss:$4 sm:$0xff] %v3240_v21  ;;  %2152 = vrot.lane.b32.xlu0 %v1897_v23, %s4535_s30  ;;  %v3241_v53 = vrot.slane %v3240_v21, 4 }
 0x42a   : > { %2136 = vrot.lane.b32.xlu2 %v1872_v56, %s4535_s30  ;;  %2104 = vrot.lane.b32.xlu1 %v1822_v30, %s4535_s30  ;;  %v7159_v2 = vpop.permute.xlu0 %2148  ;;  %v3242_v21 = vsel %vm2923_vm11, 0.0, %v3241_v53  ;;  %v8432_v53 = vld [vmem:[#allocation141_spill] sm:$0xff] }
 0x42c   : > { %v2421_v26 = vpop.permute.xlu2 %2420  ;;  %v2101_v11 = vpop.permute.xlu1 %2100 }
 0x42d   : > { %v2799_v30 = vadd.f32 %v2421_v26, %v2287_v6  ;;  %v7196_v26 = vld.sshfl [vmem:[#allocation1] sm:$0xff pattern:$0x73625140] }
 0x42f   : > { %v7163_v32 = vld.sshfl [vmem:[#allocation1 + $0x20] sm:$0xff pattern:$0x73625140] }
 0x430   : > { %2440 = vrot.lane.b32.xlu0 %v8425_v52, %s4536_s6  ;;  %3722 = vst [vmem:[#allocation1 + $0x20] ss:$4 sm:$0xff] %v3218_v54  ;;  %v8430_v54 = vld [vmem:[#allocation61_spill] sm:$0xff] }
 0x431   : > { %3724 = vst [vmem:[#allocation1 + $0x21] ss:$4 sm:$0xff] %v3226_v9  ;;  %v8431_v9 = vrot.slane %v8430_v54, 6  ;;  %v2343_v52 = vadd.f32 %v8432_v53, %v8430_v54  ;;  %v8438_v54 = vld [vmem:[#allocation25_spill] sm:$0xff] }
 0x432   : > { %2504 = vrot.lane.b32.xlu2 %v8427_v33, %s4536_s6  ;;  %2472 = vrot.lane.b32.xlu1 %v8428_v28, %s4536_s6  ;;  %v2437_v37 = vpop.permute.xlu0 %2436  ;;  %3726 = vst [vmem:[#allocation1 + $0x22] ss:$4 sm:$0xff] %v3234_v38  ;;  %v8435_v38 = vld [vmem:[#allocation121_spill] sm:$0xff] }
 0x433   : > { %v2807_v23 = vadd.f32 %v2437_v37, %v2295_v55  ;;  %3728 = vst [vmem:[#allocation1 + $0x23] ss:$4 sm:$0xff] %v3242_v21  ;;  %v8434_v55 = vld [vmem:[#allocation51_spill] sm:$0xff] }
 0x434   : > { %v2517_v46 = vpop.permute.xlu2 %2516  ;;  %v2469_v56 = vpop.permute.xlu1 %2468  ;;  %v2335_v33 = vadd.f32 %v8435_v38, %v8434_v55  ;;  %v8440_v55 = vld [vmem:[#allocation76_spill] sm:$0xff] }
 0x435   : > { %v3243_v61 = vrot.slane %v2807_v23, 4  ;;  %v2311_v38 = vadd.f32 %v8440_v55, %v8308_v13 }
 0x436   : > { %v2847_v41 = vadd.f32 %v2517_v46, %v2335_v33 }
 0x437   : > { %v3244_v1 = vsel %vm2923_vm11, %v3243_v61, %v2799_v30  ;;  %v8436_v30 = vrot.slane %v6072_v20, 2  ;;  %v8437_v61 = vld [vmem:[#allocation127_spill] sm:$0xff] }
 0x438   : > { %v7183_v12 = vperm.slane %v3244_v1, %v6333_v40  ;;  %2536 = vrot.lane.b32.xlu0 %v8431_v9, %s4536_s6  ;;  %v2391_v1 = vadd.f32 %v7050_v47, %v8437_v61  ;;  %v8439_v9 = vld [vmem:[#allocation128_spill] sm:$0xff] }
 0x439   : > { %v2383_v53 = vadd.f32 %v2101_v11, %v8439_v9  ;;  %v8443_v11 = vld [vmem:[#allocation15_spill] sm:$0xff] }
 0x43a   : > { %2600 = vrot.lane.b32.xlu2 %v1367_v59, %s4536_s6  ;;  %2568 = vrot.lane.b32.xlu1 %v8433_v5, %s4536_s6  ;;  %v2533_v3 = vpop.permute.xlu0 %2532  ;;  %3745 = vst [vmem:[#allocation1] ss:$4 sm:$0xff] %v7183_v12 }
 0x43b   : > { %v2855_v28 = vadd.f32 %v2533_v3, %v2343_v52 }
 0x43c   : > { %v2613_v21 = vpop.permute.xlu2 %2612  ;;  %v2565_v37 = vpop.permute.xlu1 %2564 }
 0x43d   : > { %v3267_v6 = vrot.slane %v2855_v28, 4  ;;  %v2895_v47 = vadd.f32 %v2613_v21, %v2383_v53  ;;  %v8441_v28 = vld [vmem:[#allocation38_spill] sm:$0xff]  ;;  %v7238_v53 = vld.sshfl [vmem:[#allocation1 + $0x20] sm:$0xff pattern:$0x73625140] }
 0x43e   : > { %v8447_v21 = vld [vmem:[#allocation46_spill] sm:$0xff] }
 0x43f   : > { %v3268_v23 = vsel %vm2923_vm11, %v3267_v6, %v2847_v41  ;;  %v8442_v41 = vld [vmem:[#allocation125_spill] sm:$0xff]  ;;  %v8448_v9 = vrot.slane %v8447_v21, 4 }
 0x440   : > { %v7203_v59 = vperm.slane %v3268_v23, %v6333_v40  ;;  %2632 = vrot.lane.b32.xlu0 %v8436_v30, %s4536_s6  ;;  %v2327_v6 = vadd.f32 %v8442_v41, %v8441_v28  ;;  %v2823_v23 = vadd.f32 %v2469_v56, %v2311_v38  ;;  %v8449_v56 = vld [vmem:[#allocation21_spill] sm:$0xff] }
 0x442   : > { %2424 = vrot.lane.b32.xlu2 %v8438_v54, %s4536_s6  ;;  %2664 = vrot.lane.b32.xlu1 %v1394_v0, %s4536_s6  ;;  %v2629_v46 = vpop.permute.xlu0 %2628  ;;  %3751 = vst [vmem:[#allocation1 + $0x3] ss:$4 sm:$0xff] %v7203_v59  ;;  %v2839_v30 = vadd.f32 %v7097_v44, %v2327_v6  ;;  %v8445_v54 = vld [vmem:[#allocation28_spill] sm:$0xff]  ;;  %v8450_v44 = vld [vmem:[#allocation30_spill] sm:$0xff] }
 0x443   : > { %v2903_v52 = vadd.f32 %v2629_v46, %v2391_v1  ;;  %v8444_v1 = vrot.slane %v8443_v11, 4  ;;  %v8446_v46 = vld [vmem:[#allocation81_spill] sm:$0xff] }
 0x444   : > { %v7217_v5 = vpop.permute.xlu2 %2118  ;;  %v2661_v3 = vpop.permute.xlu1 %2660  ;;  %v2303_v13 = vadd.f32 %v8446_v46, %v8445_v54  ;;  %v3259_v6 = vrot.slane %v2839_v30, 4  ;;  %v8452_v54 = vld [vmem:[#allocation97_spill] sm:$0xff]  ;;  %v8453_v46 = vld [vmem:[#allocation148_spill] sm:$0xff]  ;;  %v8454_v30 = vld [vmem:[#allocation86_spill] sm:$0xff] }
 0x445   : > { %v3291_v33 = vrot.slane %v2903_v52, 4  ;;  %v8451_v52 = vld [vmem:[#allocation110_spill] sm:$0xff] }
 0x446   : > { %v2319_v55 = vadd.f32 %v8451_v52, %v8450_v44 }
 0x447   : > { %v3292_v0 = vsel %vm2923_vm11, %v3291_v33, %v2895_v47  ;;  %v3251_v47 = vrot.slane %v2823_v23, 4 }
 0x448   : > { %v7226_v61 = vperm.slane %v3292_v0, %v6333_v40  ;;  %2456 = vrot.lane.b32.xlu0 %v8444_v1, %s4536_s6  ;;  %v2375_v0 = vadd.f32 %v7134_v4, %v8314_v14  ;;  %v8455_v14 = vld [vmem:[#allocation80_spill] sm:$0xff]  ;;  %v8456_v4 = vld [vmem:[#allocation151_spill] sm:$0xff] }
 0x44a   : > { %2520 = vrot.lane.b32.xlu2 %v8448_v9, %s4536_s6  ;;  %2488 = vrot.lane.b32.xlu1 %v8449_v56, %s4536_s6  ;;  %v2453_v38 = vpop.permute.xlu0 %2452  ;;  %3757 = vst [vmem:[#allocation1 + $0x22] ss:$4 sm:$0xff] %v7226_v61  ;;  %v2359_v9 = vadd.f32 %v8453_v46, %v8452_v54 }
 0x44b   : > { %v2815_v33 = vadd.f32 %v2453_v38, %v2303_v13  ;;  %v2887_v13 = vadd.f32 %v7132_v10, %v2375_v0  ;;  %v8457_v38 = vld [vmem:[#allocation85_spill] sm:$0xff] }
 0x44c   : > { %v7243_v28 = vpop.permute.xlu2 %2134  ;;  %v2485_v41 = vpop.permute.xlu1 %2484  ;;  %v2871_v39 = vadd.f32 %v2565_v37, %v2359_v9  ;;  %v8459_v37 = vld [vmem:[#allocation112_spill] sm:$0xff] }
 0x44d   : > { %v2831_v1 = vadd.f32 %v2485_v41, %v2319_v55  ;;  %v3252_v56 = vsel %vm2923_vm11, %v3251_v47, %v2815_v33  ;;  %v2351_v55 = vadd.f32 %v8456_v4, %v8455_v14  ;;  %v8458_v47 = vrot.slane %v8457_v38, 4  ;;  %v8460_v33 = vld [vmem:[#allocation162_spill] sm:$0xff] }
 0x44e   : > { %v3256_v44 = vperm.slane %v3252_v56, %v6333_v40  ;;  %v2367_v41 = vadd.f32 %v8460_v33, %v8459_v37  ;;  %v3275_v10 = vrot.slane %v2871_v39, 4  ;;  %v3283_v46 = vrot.slane %v2887_v13, 4  ;;  %v8463_v33 = vld [vmem:[#allocation71_spill] sm:$0xff] }
 0x44f   : > { %v3260_v52 = vsel %vm2923_vm11, %v3259_v6, %v2831_v1  ;;  %v2407_v56 = vadd.f32 %v7159_v2, %v6571_v7  ;;  %v3273_v37 = vrot.slane %v7203_v59, 4  ;;  %v8461_v13 = vrot.slane %v8349_v62, 4  ;;  %v8462_v2 = vld [vmem:[#allocation67_spill] sm:$0xff] }
 0x450   : > { %v3264_v23 = vperm.slane %v3260_v52, %v6333_v40  ;;  %2552 = vrot.lane.b32.xlu0 %v8454_v30, %s4536_s6  ;;  %3747 = vst [vmem:[#allocation1 + $0x1] ss:$4 sm:$0xff] %v3256_v44  ;;  %v3257_v30 = vrot.slane %v3256_v44, 4 }
 0x452   : > { %2616 = vrot.lane.b32.xlu2 %v8423_v8, %s4536_s6  ;;  %2584 = vrot.lane.b32.xlu1 %v8458_v47, %s4536_s6  ;;  %3749 = vst [vmem:[#allocation1 + $0x2] ss:$4 sm:$0xff] %v3264_v23  ;;  %v2549_v6 = vpop.permute.xlu0 %2548  ;;  %v3249_v8 = vrot.slane %v7183_v12, 4  ;;  %v2919_v47 = vadd.f32 %v2661_v3, %v2407_v56  ;;  %v3265_v39 = vrot.slane %v3264_v23, 4  ;;  %v2399_v12 = vadd.f32 %v7074_v19, %v8462_v2  ;;  %v8464_v3 = vld [vmem:[#allocation42_spill] sm:$0xff]  ;;  %v8465_v56 = vld [vmem:[#allocation113_spill] sm:$0xff] }
 0x453   : > { %v2863_v0 = vadd.f32 %v2549_v6, %v2351_v55  ;;  %v3258_v23 = vsel %vm2923_vm11, 0.0, %v3257_v30  ;;  %v3274_v19 = vsel %vm2923_vm11, 0.0, %v3273_v37 }
 0x454   : > { %v7265_v1 = vpop.permute.xlu2 %2502  ;;  %v2581_v54 = vpop.permute.xlu1 %2580  ;;  %v3250_v44 = vsel %vm2923_vm11, 0.0, %v3249_v8  ;;  %v3266_v6 = vsel %vm2923_vm11, 0.0, %v3265_v39  ;;  %v3297_v39 = vrot.slane %v7226_v61, 4 }
 0x455   : > { %v2879_v9 = vadd.f32 %v2581_v54, %v2367_v41  ;;  %v3276_v52 = vsel %vm2923_vm11, %v3275_v10, %v2863_v0  ;;  %v3299_v41 = vrot.slane %v2919_v47, 4 }
 0x456   : > { %v3280_v14 = vperm.slane %v3276_v52, %v6333_v40 }
 0x457   : > { %v3284_v4 = vsel %vm2923_vm11, %v3283_v46, %v2879_v9 }
 0x458   : > { %v3288_v55 = vperm.slane %v3284_v4, %v6333_v40  ;;  %2648 = vrot.lane.b32.xlu0 %v8461_v13, %s4536_s6  ;;  %3753 = vst [vmem:[#allocation1 + $0x20] ss:$4 sm:$0xff] %v3280_v14  ;;  %v3281_v52 = vrot.slane %v3280_v14, 4 }
 0x459   : > { %v3760_v7 = vld.sshfl [vmem:[#allocation1] sm:$0xff pattern:$0x73625140] }
 0x45a   : > { %3489 = vrot.lane.b32.xlu2 %v8463_v33, %s4538_s7  ;;  %3487 = vrot.lane.b32.xlu1 %v8464_v3, %s4538_s7  ;;  %3755 = vst [vmem:[#allocation1 + $0x21] ss:$4 sm:$0xff] %v3288_v55  ;;  %v2645_v59 = vpop.permute.xlu0 %2644  ;;  %v3289_v47 = vrot.slane %v3288_v55, 4  ;;  %v3282_v13 = vsel %vm2923_vm11, 0.0, %v3281_v52  ;;  %v8468_v33 = vld [vmem:[#allocation49_spill] sm:$0xff]  ;;  %v3298_v3 = vsel %vm2923_vm11, 0.0, %v3297_v39 }
 0x45b   : > { %3776 = vst [vmem:[#allocation1] ss:$4 sm:$0xff] %v3250_v44  ;;  %v2911_v10 = vadd.f32 %v2645_v59, %v2399_v12  ;;  %v8466_v12 = vld [vmem:[#allocation26_spill] sm:$0xff]  ;;  %v8469_v55 = vld [vmem:[#allocation3_spill] sm:$0xff] }
 0x45c   : > { %v7285_v0 = vpop.permute.xlu2 %2598  ;;  %v7287_v54 = vpop.permute.xlu1 %2086  ;;  %3778 = vst [vmem:[#allocation1 + $0x1] ss:$4 sm:$0xff] %v3258_v23  ;;  %v8467_v44 = vld [vmem:[#allocation10_spill] sm:$0xff]  ;;  %v8470_v23 = vld [vmem:[#allocation52_spill] sm:$0xff] }
 0x45d   : > { %3780 = vst [vmem:[#allocation1 + $0x2] ss:$4 sm:$0xff] %v3266_v6  ;;  %v3300_v46 = vsel %vm2923_vm11, %v3299_v41, %v2911_v10  ;;  %v2288_v59 = vadd.f32 %v8470_v23, %v8469_v55  ;;  %v8473_v39 = vld [vmem:[#allocation134_spill] sm:$0xff]  ;;  %v2392_v23 = vadd.f32 %v7217_v5, %v6730_v36 }
 0x45e   : > { %3782 = vst [vmem:[#allocation1 + $0x3] ss:$4 sm:$0xff] %v3274_v19  ;;  %v3304_v9 = vperm.slane %v3300_v46, %v6333_v40 }
 0x460   : > { %3731 = vrot.lane.b32.xlu0 %v7196_v26, %s4538_s7  ;;  %3759 = vst [vmem:[#allocation1 + $0x23] ss:$4 sm:$0xff] %v3304_v9  ;;  %v3305_v37 = vrot.slane %v3304_v9, 4  ;;  %v3290_v26 = vsel %vm2923_vm11, 0.0, %v3289_v47  ;;  %v8472_v47 = vld [vmem:[#allocation66_spill] sm:$0xff] }
 0x462   : > { %3518 = vrot.lane.b32.xlu2 %v8465_v56, %s4539_s8  ;;  %3733 = vrot.lane.b32.xlu1 %v7238_v53, %s4538_s7  ;;  %v7295_v8 = vpop.permute.xlu0 %2150  ;;  %v2296_v53 = vadd.f32 %v8468_v33, %v8467_v44  ;;  %v3306_v14 = vsel %vm2923_vm11, 0.0, %v3305_v37  ;;  %v2344_v37 = vadd.f32 %v8473_v39, %v8472_v47  ;;  %v8480_v39 = vld [vmem:[#allocation40_spill] sm:$0xff] }
 0x464   : > { %v2423_v30 = vpop.permute.xlu2 %2422  ;;  %v2103_v4 = vpop.permute.xlu1 %2102 }
 0x465   : > { %v2800_v19 = vadd.f32 %v2423_v30, %v2288_v59  ;;  %v3791_v52 = vld.sshfl [vmem:[#allocation1] sm:$0xff pattern:$0x73625140]  ;;  %v8475_v30 = vld [vmem:[#allocation135_spill] sm:$0xff]  ;;  %v8476_v59 = vld [vmem:[#allocation56_spill] sm:$0xff] }
 0x467   : > { %v3761_v2 = vld.sshfl [vmem:[#allocation1 + $0x20] sm:$0xff pattern:$0x73625140] }
 0x468   : > { %3520 = vrot.lane.b32.xlu0 %v8466_v12, %s4539_s8  ;;  %3784 = vst [vmem:[#allocation1 + $0x20] ss:$4 sm:$0xff] %v3282_v13  ;;  %v8474_v13 = vld [vmem:[#allocation35_spill] sm:$0xff] }
 0x469   : > { %3786 = vst [vmem:[#allocation1 + $0x21] ss:$4 sm:$0xff] %v3290_v26  ;;  %v2336_v26 = vadd.f32 %v8475_v30, %v8447_v21  ;;  %v8477_v21 = vld [vmem:[#allocation62_spill] sm:$0xff] }
 0x46a   : > { %3762 = vrot.lane.b32.xlu1 %v3760_v7, %s4539_s8  ;;  %3764 = vrot.lane.b32.xlu2 %v3761_v2, %s4539_s8  ;;  %3788 = vst [vmem:[#allocation1 + $0x22] ss:$4 sm:$0xff] %v3298_v3  ;;  %v2439_v61 = vpop.permute.xlu0 %2438  ;;  %v8471_v7 = vld [vmem:[#allocation18_spill] sm:$0xff] }
 0x46b   : > { %3790 = vst [vmem:[#allocation1 + $0x23] ss:$4 sm:$0xff] %v3306_v14  ;;  %v2808_v41 = vadd.f32 %v2439_v61, %v2296_v53 }
 0x46c   : > { %v2519_v6 = vpop.permute.xlu2 %2518  ;;  %v2471_v10 = vpop.permute.xlu1 %2470 }
 0x46d   : > { %v3307_v46 = vrot.slane %v2808_v41, 4  ;;  %v2848_v53 = vadd.f32 %v2519_v6, %v2336_v26  ;;  %v2384_v6 = vadd.f32 %v2103_v4, %v6766_v43  ;;  %v8482_v43 = vld [vmem:[#allocation82_spill] sm:$0xff] }
 0x46e   : > { %v2304_v4 = vadd.f32 %v8482_v43, %v8443_v11 }
 0x46f   : > { %v3308_v9 = vsel %vm2923_vm11, %v3307_v46, %v2800_v19 }
 0x470   : > { %v7309_v56 = vperm.slane %v3308_v9, %v6333_v40  ;;  %3549 = vrot.lane.b32.xlu0 %v8471_v7, %s4540_s9  ;;  %v8478_v7 = vld [vmem:[#allocation17_spill] sm:$0xff] }
 0x472   : > { %3551 = vrot.lane.b32.xlu1 %v8474_v13, %s4540_s9  ;;  %3793 = vrot.lane.b32.xlu2 %v3791_v52, %s4540_s9  ;;  %3807 = vst [vmem:[#allocation1] ss:$4 sm:$0xff] %v7309_v56  ;;  %v2535_v2 = vpop.permute.xlu0 %2534  ;;  %v3792_v61 = vld.sshfl [vmem:[#allocation1 + $0x20] sm:$0xff pattern:$0x73625140]  ;;  %v8479_v52 = vld [vmem:[#allocation100_spill] sm:$0xff] }
 0x473   : > { %v2856_v12 = vadd.f32 %v2535_v2, %v2344_v37  ;;  %v2312_v47 = vadd.f32 %v8479_v52, %v8478_v7  ;;  %v8481_v37 = vld [vmem:[#allocation126_spill] sm:$0xff] }
 0x474   : > { %v2615_v44 = vpop.permute.xlu2 %2614  ;;  %v2567_v33 = vpop.permute.xlu1 %2566  ;;  %v2328_v13 = vadd.f32 %v8481_v37, %v8480_v39 }
 0x475   : > { %v3331_v3 = vrot.slane %v2856_v12, 4  ;;  %v2896_v36 = vadd.f32 %v2615_v44, %v2384_v6  ;;  %v2824_v2 = vadd.f32 %v2471_v10, %v2312_v47  ;;  %v8484_v44 = vld [vmem:[#allocation19_spill] sm:$0xff]  ;;  %v8486_v6 = vld [vmem:[#allocation98_spill] sm:$0xff] }
 0x476   : > { %v2840_v26 = vadd.f32 %v7265_v1, %v2328_v13  ;;  %v8488_v13 = vld [vmem:[#allocation83_spill] sm:$0xff] }
 0x477   : > { %v3332_v14 = vsel %vm2923_vm11, %v3331_v3, %v2848_v53  ;;  %v8483_v53 = vld [vmem:[#allocation96_spill] sm:$0xff]  ;;  %v8485_v3 = vld [vmem:[#allocation95_spill] sm:$0xff] }
 0x478   : > { %v7320_v55 = vperm.slane %v3332_v14, %v6333_v40  ;;  %3795 = vrot.lane.b32.xlu0 %v3792_v61, %s4540_s9  ;;  %v2320_v14 = vadd.f32 %v8485_v3, %v8484_v44  ;;  %v3315_v61 = vrot.slane %v2824_v2, 4  ;;  %v8489_v2 = vld [vmem:[#allocation152_spill] sm:$0xff] }
 0x47a   : > { %3580 = vrot.lane.b32.xlu1 %v8476_v59, %s4541_s10  ;;  %3582 = vrot.lane.b32.xlu2 %v8477_v21, %s4541_s10  ;;  %3813 = vst [vmem:[#allocation1 + $0x3] ss:$4 sm:$0xff] %v7320_v55  ;;  %v2631_v41 = vpop.permute.xlu0 %2630  ;;  %v3323_v21 = vrot.slane %v2840_v26, 4 }
 0x47b   : > { %v2904_v19 = vadd.f32 %v2631_v41, %v2392_v23  ;;  %v2376_v41 = vadd.f32 %v7287_v54, %v6710_v24  ;;  %v8490_v24 = vld [vmem:[#allocation156_spill] sm:$0xff] }
 0x47c   : > { %v7330_v46 = vpop.permute.xlu2 %2120  ;;  %v2663_v9 = vpop.permute.xlu1 %2662  ;;  %v2368_v54 = vadd.f32 %v8490_v24, %v8457_v38 }
 0x47d   : > { %v3355_v5 = vrot.slane %v2904_v19, 4  ;;  %v8487_v19 = vld [vmem:[#allocation157_spill] sm:$0xff]  ;;  %v2888_v37 = vadd.f32 %v7285_v0, %v2376_v41  ;;  %v3313_v0 = vrot.slane %v7309_v56, 4 }
 0x47e   : > { %v2360_v7 = vadd.f32 %v8487_v19, %v8486_v6 }
 0x47f   : > { %v3356_v30 = vsel %vm2923_vm11, %v3355_v5, %v2896_v36  ;;  %v3347_v3 = vrot.slane %v2888_v37, 4 }
 0x480   : > { %v7339_v12 = vperm.slane %v3356_v30, %v6333_v40  ;;  %v2872_v5 = vadd.f32 %v2567_v33, %v2360_v7  ;;  %v2352_v30 = vadd.f32 %v8489_v2, %v8488_v13 }
 0x482   : > { %3611 = vrot.lane.b32.xlu2 %v8483_v53, %s4542_s11  ;;  %3819 = vst [vmem:[#allocation1 + $0x22] ss:$4 sm:$0xff] %v7339_v12  ;;  %v2455_v10 = vpop.permute.xlu0 %2454  ;;  %v3339_v43 = vrot.slane %v2872_v5, 4  ;;  %v8491_v5 = vld [vmem:[#allocation43_spill] sm:$0xff] }
 0x483   : > { %v2816_v23 = vadd.f32 %v2455_v10, %v2304_v4 }
 0x484   : > { %v7348_v59 = vpop.permute.xlu2 %2136  ;;  %v2487_v1 = vpop.permute.xlu1 %2486 }
 0x485   : > { %v2832_v11 = vadd.f32 %v2487_v1, %v2320_v14  ;;  %v3316_v52 = vsel %vm2923_vm11, %v3315_v61, %v2816_v23  ;;  %v2408_v14 = vadd.f32 %v7295_v8, %v6751_v27  ;;  %v2400_v27 = vadd.f32 %v7243_v28, %v8349_v62 }
 0x486   : > { %v3320_v47 = vperm.slane %v3316_v52, %v6333_v40  ;;  %v3314_v8 = vsel %vm2923_vm11, 0.0, %v3313_v0  ;;  %v8493_v0 = vld [vmem:[#allocation53_spill] sm:$0xff] }
 0x487   : > { %v3324_v36 = vsel %vm2923_vm11, %v3323_v21, %v2832_v11  ;;  %v2920_v1 = vadd.f32 %v2663_v9, %v2408_v14  ;;  %v3337_v11 = vrot.slane %v7320_v55, 4 }
 0x488   : > { %v3328_v39 = vperm.slane %v3324_v36, %v6333_v40  ;;  %3809 = vst [vmem:[#allocation1 + $0x1] ss:$4 sm:$0xff] %v3320_v47  ;;  %v3321_v61 = vrot.slane %v3320_v47, 4 }
 0x489   : > { %v3363_v9 = vrot.slane %v2920_v1, 4  ;;  %v3338_v47 = vsel %vm2923_vm11, 0.0, %v3337_v11 }
 0x48a   : > { %3811 = vst [vmem:[#allocation1 + $0x2] ss:$4 sm:$0xff] %v3328_v39  ;;  %v2551_v26 = vpop.permute.xlu0 %2550  ;;  %v3329_v21 = vrot.slane %v3328_v39, 4  ;;  %v3322_v56 = vsel %vm2923_vm11, 0.0, %v3321_v61 }
 0x48b   : > { %v2864_v4 = vadd.f32 %v2551_v26, %v2352_v30  ;;  %v3361_v30 = vrot.slane %v7339_v12, 4 }
 0x48c   : > { %v7363_v53 = vpop.permute.xlu2 %2504  ;;  %v2583_v44 = vpop.permute.xlu1 %2582  ;;  %v3330_v7 = vsel %vm2923_vm11, 0.0, %v3329_v21 }
 0x48d   : > { %v2880_v33 = vadd.f32 %v2583_v44, %v2368_v54  ;;  %v3340_v10 = vsel %vm2923_vm11, %v3339_v43, %v2864_v4  ;;  %v8492_v44 = vld [vmem:[#allocation70_spill] sm:$0xff] }
 0x48e   : > { %v3344_v23 = vperm.slane %v3340_v10, %v6333_v40  ;;  %v2289_v10 = vadd.f32 %v8493_v0, %v8405_v57 }
 0x48f   : > { %v3348_v38 = vsel %vm2923_vm11, %v3347_v3, %v2880_v33  ;;  %v2297_v3 = vadd.f32 %v8492_v44, %v8396_v17  ;;  %v3362_v33 = vsel %vm2923_vm11, 0.0, %v3361_v30  ;;  %v8496_v30 = vld [vmem:[#allocation101_spill] sm:$0xff] }
 0x490   : > { %v3352_v41 = vperm.slane %v3348_v38, %v6333_v40  ;;  %3815 = vst [vmem:[#allocation1 + $0x20] ss:$4 sm:$0xff] %v3344_v23  ;;  %v3345_v37 = vrot.slane %v3344_v23, 4 }
 0x491   : > { %v3822_v6 = vld.sshfl [vmem:[#allocation1] sm:$0xff pattern:$0x73625140] }
 0x492   : > { %3817 = vst [vmem:[#allocation1 + $0x21] ss:$4 sm:$0xff] %v3352_v41  ;;  %3824 = vrot.lane.b32.xlu0 %v3822_v6, %s4541_s10  ;;  %v2647_v19 = vpop.permute.xlu0 %2646  ;;  %v3353_v2 = vrot.slane %v3352_v41, 4  ;;  %v3346_v26 = vsel %vm2923_vm11, 0.0, %v3345_v37 }
 0x493   : > { %3838 = vst [vmem:[#allocation1] ss:$4 sm:$0xff] %v3314_v8  ;;  %v2912_v52 = vadd.f32 %v2647_v19, %v2400_v27  ;;  %v8495_v8 = vld [vmem:[#allocation136_spill] sm:$0xff] }
 0x494   : > { %3840 = vst [vmem:[#allocation1 + $0x1] ss:$4 sm:$0xff] %v3322_v56  ;;  %v7379_v55 = vpop.permute.xlu1 %2088  ;;  %v7382_v62 = vpop.permute.xlu2 %2600  ;;  %v3354_v4 = vsel %vm2923_vm11, 0.0, %v3353_v2  ;;  %v2337_v56 = vadd.f32 %v8495_v8, %v8410_v50 }
 0x495   : > { %3842 = vst [vmem:[#allocation1 + $0x2] ss:$4 sm:$0xff] %v3330_v7  ;;  %v3364_v28 = vsel %vm2923_vm11, %v3363_v9, %v2912_v52 }
 0x496   : > { %3844 = vst [vmem:[#allocation1 + $0x3] ss:$4 sm:$0xff] %v3338_v47  ;;  %v3368_v36 = vperm.slane %v3364_v28, %v6333_v40 }
 0x498   : > { %3821 = vst [vmem:[#allocation1 + $0x23] ss:$4 sm:$0xff] %v3368_v36  ;;  %v3369_v24 = vrot.slane %v3368_v36, 4 }
 0x49a   : > { %3613 = vrot.lane.b32.xlu0 %v8491_v5, %s4542_s11  ;;  %v7388_v39 = vpop.permute.xlu0 %2152  ;;  %v3370_v12 = vsel %vm2923_vm11, 0.0, %v3369_v24  ;;  %v2313_v24 = vadd.f32 %v8496_v30, %v8399_v63  ;;  %v8499_v63 = vld [vmem:[#allocation115_spill] sm:$0xff] }
 0x49c   : > { %v2105_v13 = vpop.permute.xlu1 %2104  ;;  %v2425_v54 = vpop.permute.xlu2 %2424 }
 0x49d   : > { %v2801_v38 = vadd.f32 %v2425_v54, %v2289_v10  ;;  %v3853_v21 = vld.sshfl [vmem:[#allocation1] sm:$0xff pattern:$0x73625140]  ;;  %v2385_v5 = vadd.f32 %v2105_v13, %v6956_v35 }
 0x49e   : > { %v8498_v35 = vld [vmem:[#allocation65_spill] sm:$0xff] }
 0x49f   : > { %v3823_v43 = vld.sshfl [vmem:[#allocation1 + $0x20] sm:$0xff pattern:$0x73625140]  ;;  %v2305_v13 = vadd.f32 %v8498_v35, %v8408_v48 }
 0x4a0   : > { %3826 = vrot.lane.b32.xlu1 %v3823_v43, %s4541_s10  ;;  %3846 = vst [vmem:[#allocation1 + $0x20] ss:$4 sm:$0xff] %v3346_v26  ;;  %v8497_v43 = vld [vmem:[#allocation111_spill] sm:$0xff] }
 0x4a1   : > { %3848 = vst [vmem:[#allocation1 + $0x21] ss:$4 sm:$0xff] %v3354_v4  ;;  %v2329_v4 = vadd.f32 %v8497_v43, %v8398_v60 }
 0x4a2   : > { %3642 = vrot.lane.b32.xlu0 %v6977_v25, %s4536_s6  ;;  %3850 = vst [vmem:[#allocation1 + $0x22] ss:$4 sm:$0xff] %v3362_v33  ;;  %v2441_v14 = vpop.permute.xlu0 %2440  ;;  %v8494_v25 = vld [vmem:[#allocation143_spill] sm:$0xff] }
 0x4a3   : > { %3852 = vst [vmem:[#allocation1 + $0x23] ss:$4 sm:$0xff] %v3370_v12  ;;  %v2809_v61 = vadd.f32 %v2441_v14, %v2297_v3  ;;  %v2345_v6 = vadd.f32 %v8494_v25, %v8401_v42  ;;  %v2393_v42 = vadd.f32 %v7330_v46, %v6072_v20  ;;  %v2841_v20 = vadd.f32 %v7363_v53, %v2329_v4 }
 0x4a4   : > { %v2473_v23 = vpop.permute.xlu1 %2472  ;;  %v2521_v11 = vpop.permute.xlu2 %2520  ;;  %v2321_v3 = vadd.f32 %v8499_v63, %v8411_v18  ;;  %v2377_v53 = vadd.f32 %v7379_v55, %v6911_v51  ;;  %v8501_v51 = vld [vmem:[#allocation142_spill] sm:$0xff] }
 0x4a5   : > { %v3371_v1 = vrot.slane %v2809_v61, 4  ;;  %v2849_v7 = vadd.f32 %v2521_v11, %v2337_v56  ;;  %v3387_v0 = vrot.slane %v2841_v20, 4  ;;  %v8500_v61 = vld [vmem:[#allocation158_spill] sm:$0xff]  ;;  %v2353_v55 = vadd.f32 %v8501_v51, %v8415_v49  ;;  %v7532_v51 = vld [vmem:[%s7791_s3 + $0xe0] sm:$0xff] }
 0x4a7   : > { %v3372_v17 = vsel %vm2923_vm11, %v3371_v1, %v2801_v38 }
 0x4a8   : > { %v7404_v41 = vperm.slane %v3372_v17, %v6333_v40  ;;  %3855 = vrot.lane.b32.xlu1 %v3853_v21, %s4542_s11  ;;  %v2889_v21 = vadd.f32 %v7382_v62, %v2377_v53 }
 0x4aa   : > { %3869 = vst [vmem:[#allocation1] ss:$4 sm:$0xff] %v7404_v41  ;;  %v3854_v57 = vld.sshfl [vmem:[#allocation1 + $0x20] sm:$0xff pattern:$0x73625140]  ;;  %v2537_v27 = vpop.permute.xlu0 %2536  ;;  %v3411_v8 = vrot.slane %v2889_v21, 4 }
 0x4ab   : > { %3857 = vrot.lane.b32.xlu2 %v3854_v57, %s4542_s11  ;;  %v2857_v19 = vadd.f32 %v2537_v27, %v2345_v6  ;;  %v4017_v21 = vld [vmem:[%s7791_s3 + $0x68] sm:$0xff] }
 0x4ac   : > { %v2569_v9 = vpop.permute.xlu1 %2568  ;;  %v2617_v50 = vpop.permute.xlu2 %2616 }
 0x4ad   : > { %v3395_v52 = vrot.slane %v2857_v19, 4  ;;  %v2897_v54 = vadd.f32 %v2617_v50, %v2385_v5  ;;  %v2409_v19 = vadd.f32 %v7388_v39, %v6948_v22  ;;  %v2401_v22 = vadd.f32 %v7348_v59, %v6934_v16 }
 0x4af   : > { %v3396_v47 = vsel %vm2923_vm11, %v3395_v52, %v2849_v7 }
 0x4b0   : > { %v7415_v28 = vperm.slane %v3396_v47, %v6333_v40  ;;  %3644 = vrot.lane.b32.xlu1 %v7014_v34, %s4536_s6  ;;  %v2825_v34 = vadd.f32 %v2473_v23, %v2313_v24 }
 0x4b2   : > { %3875 = vst [vmem:[#allocation1 + $0x3] ss:$4 sm:$0xff] %v7415_v28  ;;  %v2633_v36 = vpop.permute.xlu0 %2632  ;;  %v3379_v33 = vrot.slane %v2825_v34, 4  ;;  %v3401_v50 = vrot.slane %v7415_v28, 4 }
 0x4b3   : > { %v2905_v37 = vadd.f32 %v2633_v36, %v2393_v42 }
 0x4b4   : > { %v2665_v2 = vpop.permute.xlu1 %2664  ;;  %v7446_v1 = vpop.permute.xlu2 %3489  ;;  %v3402_v16 = vsel %vm2923_vm11, 0.0, %v3401_v50  ;;  %v7595_v50 = vld [vmem:[%s7791_s3 + $0xb8] sm:$0xff] }
 0x4b5   : > { %v3419_v26 = vrot.slane %v2905_v37, 4  ;;  %v2921_v47 = vadd.f32 %v2665_v2, %v2409_v19  ;;  %v7565_v19 = vld [vmem:[%s7791_s3 + $0xd0] sm:$0xff] }
 0x4b7   : > { %v3420_v44 = vsel %vm2923_vm11, %v3419_v26, %v2897_v54  ;;  %v3427_v2 = vrot.slane %v2921_v47, 4  ;;  %v4010_v47 = vld [vmem:[%s7791_s3 + $0x30] sm:$0xff] }
 0x4b8   : > { %v7430_v46 = vperm.slane %v3420_v44, %v6333_v40  ;;  %3673 = vrot.lane.b32.xlu1 %v7027_v31, %s4535_s30  ;;  %v2361_v31 = vadd.f32 %v8500_v61, %v8403_v15  ;;  %v8502_v15 = vld [vmem:[#allocation163_spill] sm:$0xff]  ;;  %v7499_v61 = vld [vmem:[%s7791_s3 + $0xf8] sm:$0xff] }
 0x4b9   : > { %v2369_v11 = vadd.f32 %v8502_v15, %v8417_v29  ;;  %4058 = vmatpush.msrb.mxu2 %v7499_v61  ;;  %v7541_v15 = vld [vmem:[%s7791_s3 + $0xd8] sm:$0xff] }
 0x4ba   : > { %3881 = vst [vmem:[#allocation1 + $0x22] ss:$4 sm:$0xff] %v7430_v46  ;;  %v2457_v60 = vpop.permute.xlu0 %2456  ;;  %v2873_v38 = vadd.f32 %v2569_v9, %v2361_v31  ;;  %v3377_v9 = vrot.slane %v7404_v41, 4  ;;  %v3425_v20 = vrot.slane %v7430_v46, 4 }
 0x4bb   : > { %v2817_v12 = vadd.f32 %v2457_v60, %v2305_v13 }
 0x4bc   : > { %v2489_v14 = vpop.permute.xlu1 %2488  ;;  %v3403_v6 = vrot.slane %v2873_v38, 4  ;;  %v3378_v39 = vsel %vm2923_vm11, 0.0, %v3377_v9  ;;  %v7465_v41 = vpop.permute.xlu2 %3518  ;;  %v3426_v60 = vsel %vm2923_vm11, 0.0, %v3425_v20  ;;  %v4011_v9 = vld [vmem:[%s7791_s3 + $0x38] sm:$0xff] }
 0x4bd   : > { %v2833_v10 = vadd.f32 %v2489_v14, %v2321_v3  ;;  %v3380_v23 = vsel %vm2923_vm11, %v3379_v33, %v2817_v12 }
 0x4be   : > { %v3384_v48 = vperm.slane %v3380_v23, %v6333_v40  ;;  %v7513_v23 = vld [vmem:[%s7791_s3 + $0xe8] sm:$0xff] }
 0x4bf   : > { %v3388_v18 = vsel %vm2923_vm11, %v3387_v0, %v2833_v10 }
 0x4c0   : > { %v3392_v17 = vperm.slane %v3388_v18, %v6333_v40  ;;  %3871 = vst [vmem:[#allocation1 + $0x1] ss:$4 sm:$0xff] %v3384_v48  ;;  %v3385_v7 = vrot.slane %v3384_v48, 4  ;;  %v4019_v48 = vld [vmem:[%s7791_s3 + $0x78] sm:$0xff]  ;;  %v4018_v18 = vld [vmem:[%s7791_s3 + $0x70] sm:$0xff] }
 0x4c1   : > { %4038 = vmatpush.msrb.mxu1 %v4019_v48  ;;  %4086 = vmatpush.msrb.mxu3 %v4019_v48 }
 0x4c2   : > { %3873 = vst [vmem:[#allocation1 + $0x2] ss:$4 sm:$0xff] %v3392_v17  ;;  %v2553_v25 = vpop.permute.xlu0 %2552  ;;  %v3393_v29 = vrot.slane %v3392_v17, 4  ;;  %v3386_v5 = vsel %vm2923_vm11, 0.0, %v3385_v7  ;;  %v7576_v7 = vld [vmem:[%s7791_s3 + $0xc8] sm:$0xff] }
 0x4c3   : > { %v2865_v57 = vadd.f32 %v2553_v25, %v2353_v55  ;;  %4039 = vmatpush.msrb.mxu1 %v4018_v18  ;;  %4087 = vmatpush.msrb.mxu3 %v4018_v18  ;;  %v4016_v55 = vld [vmem:[%s7791_s3 + $0x60] sm:$0xff]  ;;  %v4014_v25 = vld [vmem:[%s7791_s3 + $0x50] sm:$0xff] }
 0x4c4   : > { %v2585_v27 = vpop.permute.xlu1 %2584  ;;  %v3394_v30 = vsel %vm2923_vm11, 0.0, %v3393_v29  ;;  %v3765_v43 = vpop.permute.xlu2 %3764  ;;  %v7586_v29 = vld [vmem:[%s7791_s3 + $0xc0] sm:$0xff] }
 0x4c5   : > { %v2881_v56 = vadd.f32 %v2585_v27, %v2369_v11  ;;  %v3404_v62 = vsel %vm2923_vm11, %v3403_v6, %v2865_v57  ;;  %4040 = vmatpush.msrb.mxu1 %v4017_v21  ;;  %4088 = vmatpush.msrb.mxu3 %v4017_v21  ;;  %v4015_v11 = vld [vmem:[%s7791_s3 + $0x58] sm:$0xff] }
 0x4c6   : > { %v3408_v49 = vperm.slane %v3404_v62, %v6333_v40 }
 0x4c7   : > { %v3412_v52 = vsel %vm2923_vm11, %v3411_v8, %v2881_v56  ;;  %4041 = vmatpush.msrb.mxu1 %v4016_v55  ;;  %4089 = vmatpush.msrb.mxu3 %v4016_v55  ;;  %v4013_v8 = vld [vmem:[%s7791_s3 + $0x48] sm:$0xff]  ;;  %v4012_v56 = vld [vmem:[%s7791_s3 + $0x40] sm:$0xff] }
 0x4c8   : > { %v3416_v42 = vperm.slane %v3412_v52, %v6333_v40  ;;  %3877 = vst [vmem:[#allocation1 + $0x20] ss:$4 sm:$0xff] %v3408_v49  ;;  %v3409_v26 = vrot.slane %v3408_v49, 4 }
 0x4c9   : > { %v3884_v36 = vld.sshfl [vmem:[#allocation1] sm:$0xff pattern:$0x73625140]  ;;  %4042 = vmatpush.msrb.mxu1 %v4015_v11  ;;  %4090 = vmatpush.msrb.mxu3 %v4015_v11 }
 0x4ca   : > { %3879 = vst [vmem:[#allocation1 + $0x21] ss:$4 sm:$0xff] %v3416_v42  ;;  %3886 = vrot.lane.b32.xlu2 %v3884_v36, %s4536_s6  ;;  %v2649_v37 = vpop.permute.xlu0 %2648  ;;  %v3417_v34 = vrot.slane %v3416_v42, 4  ;;  %v4009_v42 = vld [vmem:[%s7791_s3 + $0x28] sm:$0xff]  ;;  %v4008_v36 = vld [vmem:[%s7791_s3 + $0x20] sm:$0xff] }
 0x4cb   : > { %3900 = vst [vmem:[#allocation1] ss:$4 sm:$0xff] %v3378_v39  ;;  %v2913_v28 = vadd.f32 %v2649_v37, %v2401_v22  ;;  %4043 = vmatpush.msrb.mxu1 %v4014_v25  ;;  %4091 = vmatpush.msrb.mxu3 %v4014_v25  ;;  %v4007_v22 = vld [vmem:[%s7791_s3 + $0x18] sm:$0xff]  ;;  %v4006_v37 = vld [vmem:[%s7791_s3 + $0x10] sm:$0xff] }
 0x4cc   : > { %3902 = vst [vmem:[#allocation1 + $0x1] ss:$4 sm:$0xff] %v3386_v5  ;;  %v7470_v24 = vpop.permute.xlu1 %3487  ;;  %v3794_v14 = vpop.permute.xlu2 %3793 }
 0x4cd   : > { %3904 = vst [vmem:[#allocation1 + $0x2] ss:$4 sm:$0xff] %v3394_v30  ;;  %v3428_v59 = vsel %vm2923_vm11, %v3427_v2, %v2913_v28  ;;  %4044 = vmatpush.msrb.mxu1 %v4013_v8  ;;  %4092 = vmatpush.msrb.mxu3 %v4013_v8  ;;  %v4005_v30 = vld [vmem:[%s7791_s3 + $0x8] sm:$0xff]  ;;  %v4004_v28 = vld [vmem:[%s7791_s3] sm:$0xff] }
 0x4ce   : > { %3906 = vst [vmem:[#allocation1 + $0x3] ss:$4 sm:$0xff] %v3402_v16  ;;  %v3432_v54 = vperm.slane %v3428_v59, %v6333_v40  ;;  %v3410_v40 = vsel %vm2923_vm11, 0.0, %v3409_v26  ;;  %v4026_v16 = vld [vmem:[%s7791_s3 + $0xb0] sm:$0xff]  ;;  %v4025_v59 = vld [vmem:[%s7791_s3 + $0xa8] sm:$0xff] }
 0x4cf   : > { %4045 = vmatpush.msrb.mxu1 %v4012_v56  ;;  %4093 = vmatpush.msrb.mxu3 %v4012_v56 }
 0x4d0   : > { %3883 = vst [vmem:[#allocation1 + $0x23] ss:$4 sm:$0xff] %v3432_v54  ;;  %v3433_v13 = vrot.slane %v3432_v54, 4  ;;  %v8503_v54 = vld [vmem:[#allocation87_spill] sm:$0xff] }
 0x4d1   : > { %4046 = vmatpush.msrb.mxu1 %v4011_v9  ;;  %4094 = vmatpush.msrb.mxu3 %v4011_v9  ;;  %v3924_v26 = vsel %vm3923_vm12, %v8503_v54, %v7470_v24 }
 0x4d2   : > { %3675 = vrot.lane.b32.xlu2 %v7065_v45, %s4535_s30  ;;  %v3418_v45 = vsel %vm2923_vm11, 0.0, %v3417_v34  ;;  %v3732_v3 = vpop.permute.xlu0 %3731  ;;  %v8504_v34 = vld [vmem:[#allocation5_spill] sm:$0xff]  ;;  %v3927_v20 = vsel %vm3926_vm13, %v3924_v26, %v7465_v41 }
 0x4d3   : > { %v3944_v46 = vsel %vm3923_vm12, %v7127_v58, %v3732_v3  ;;  %v7505_v58 = vld [vmem:[%s7791_s3 + $0xf0] sm:$0xff]  ;;  %4047 = vmatpush.msrb.mxu1 %v4010_v47  ;;  %4095 = vmatpush.msrb.mxu3 %v4010_v47  ;;  %v4020_v47 = vld [vmem:[%s7791_s3 + $0x80] sm:$0xff] }
 0x4d4   : > { %v3734_v4 = vpop.permute.xlu1 %3733  ;;  %4059 = vmatpush.msrb.mxu2 %v7505_v58  ;;  %v7550_v6 = vpop.permute.xlu2 %3582 }
 0x4d5   : > { %v3945_v44 = vsel %vm3923_vm12, %v7163_v32, %v3734_v4  ;;  %v3434_v32 = vsel %vm2923_vm11, 0.0, %v3433_v13  ;;  %v3915_v53 = vld.sshfl [vmem:[#allocation1] sm:$0xff pattern:$0x73625140]  ;;  %4048 = vmatpush.msrb.mxu1 %v4009_v42  ;;  %4096 = vmatpush.msrb.mxu3 %v4009_v42 }
 0x4d6   : > { %v7481_v35 = vsel %vm3926_vm13, %v3945_v44, %v3765_v43  ;;  %4060 = vmatpush.msrb.mxu2 %v7513_v23  ;;  %v3925_v44 = vsel %vm3923_vm12, %v8504_v34, %v7446_v1 }
 0x4d7   : > { %v3885_v63 = vld.sshfl [vmem:[#allocation1 + $0x20] sm:$0xff pattern:$0x73625140]  ;;  %4049 = vmatpush.msrb.mxu1 %v4008_v36  ;;  %4097 = vmatpush.msrb.mxu3 %v4008_v36 }
 0x4d8   : > { %3888 = vrot.lane.b32.xlu0 %v3885_v63, %s4536_s6  ;;  %3908 = vst [vmem:[#allocation1 + $0x20] ss:$4 sm:$0xff] %v3410_v40  ;;  %4061 = vmatpush.msrb.mxu2 %v7532_v51  ;;  %v7642_v40 = vld [vmem:[%s7790_s2] ss:$4 sm:$0x3] }
 0x4d9   : > { %3910 = vst [vmem:[#allocation1 + $0x21] ss:$4 sm:$0xff] %v3418_v45  ;;  %4050 = vmatpush.msrb.mxu1 %v4007_v22  ;;  %4098 = vmatpush.msrb.mxu3 %v4007_v22  ;;  %v3964_v45 = vperm.slane %v7642_v40, 0  ;;  %v3965_v36 = vperm.slane %v7642_v40, 1 }
 0x4da   : > { %3912 = vst [vmem:[#allocation1 + $0x22] ss:$4 sm:$0xff] %v3426_v60  ;;  %v7508_v31 = vpop.permute.xlu0 %3520  ;;  %4062 = vmatpush.msrb.mxu2 %v7541_v15 }
 0x4db   : > { %3914 = vst [vmem:[#allocation1 + $0x23] ss:$4 sm:$0xff] %v3434_v32  ;;  %4051 = vmatpush.msrb.mxu1 %v4006_v37  ;;  %4099 = vmatpush.msrb.mxu3 %v4006_v37  ;;  %v3928_v13 = vsel %vm3926_vm13, %v3925_v44, %v7508_v31 }
 0x4dc   : > { %v3763_v33 = vpop.permute.xlu1 %3762  ;;  %4063 = vmatpush.msrb.mxu2 %v7565_v19  ;;  %v3612_v49 = vpop.permute.xlu2 %3611 }
 0x4dd   : > { %v3946_v12 = vsel %vm3926_vm13, %v3944_v46, %v3763_v33  ;;  %4052 = vmatpush.msrb.mxu1 %v4005_v30  ;;  %4100 = vmatpush.msrb.mxu3 %v4005_v30 }
 0x4de   : > { %v7492_v0 = vsel %vm3929_vm14, %v3946_v12, %v3794_v14  ;;  %4064 = vmatpush.msrb.mxu2 %v7576_v7 }
 0x4df   : > { %4053 = vmatpush.msrb.mxu1 %v4004_v28  ;;  %4101 = vmatpush.msrb.mxu3 %v4004_v28 }
 0x4e0   : > { %3917 = vrot.lane.b32.xlu0 %v3915_v53, %s4535_s30  ;;  %4065 = vmatpush.msrb.mxu2 %v7586_v29 }
 0x4e1   : > { %4106 = vmatpush.msra.mxu1 %v7499_v61  ;;  %v4023_v61 = vld [vmem:[%s7791_s3 + $0x98] sm:$0xff] }
 0x4e2   : > { %v3916_v10 = vld.sshfl [vmem:[#allocation1 + $0x20] sm:$0xff pattern:$0x73625140]  ;;  %v7524_v17 = vpop.permute.xlu0 %3549  ;;  %4066 = vmatpush.msrb.mxu2 %v7595_v50 }
 0x4e3   : > { %3919 = vrot.lane.b32.xlu1 %v3916_v10, %s4535_s30  ;;  %v3930_v24 = vsel %vm3929_vm14, %v3927_v20, %v7524_v17  ;;  %4107 = vmatpush.msra.mxu1 %v7505_v58  ;;  %v4024_v10 = vld [vmem:[%s7791_s3 + $0xa0] sm:$0xff] }
 0x4e4   : > { %v7522_v38 = vpop.permute.xlu1 %3551  ;;  %4067 = vmatpush.msrb.mxu2 %v4026_v16 }
 0x4e5   : > { %v3931_v1 = vsel %vm3929_vm14, %v3928_v13, %v7522_v38  ;;  %4108 = vmatpush.msra.mxu1 %v7513_v23 }
 0x4e6   : > { %4068 = vmatpush.msrb.mxu2 %v4025_v59  ;;  %v3934_v3 = vsel %vm3932_vm15, %v3931_v1, %v7550_v6 }
 0x4e7   : > { %4109 = vmatpush.msra.mxu1 %v7532_v51 }
 0x4e8   : > { %4069 = vmatpush.msrb.mxu2 %v4024_v10 }
 0x4e9   : > { %4110 = vmatpush.msra.mxu1 %v7541_v15 }
 0x4ea   : > { %v7554_v27 = vpop.permute.xlu0 %3795  ;;  %4070 = vmatpush.msrb.mxu2 %v4023_v61 }
 0x4eb   : > { %4111 = vmatpush.msra.mxu1 %v7565_v19  ;;  %v3949_v42 = vsel %vm3929_vm14, %v7481_v35, %v7554_v27 }
 0x4ec   : > { %v7552_v57 = vpop.permute.xlu1 %3580 }
 0x4ed   : > { %v3933_v41 = vsel %vm3932_vm15, %v3930_v24, %v7552_v57  ;;  %4112 = vmatpush.msra.mxu1 %v7576_v7  ;;  %v4022_v7 = vld [vmem:[%s7791_s3 + $0x90] sm:$0xff] }
 0x4ee   : > { %v3936_v60 = vsel %vm3935_vm0, %v3933_v41, %v3612_v49  ;;  %v4021_v49 = vld [vmem:[%s7791_s3 + $0x88] sm:$0xff]  ;;  %4071 = vmatpush.msrb.mxu2 %v4022_v7 }
 0x4ef   : > { %4113 = vmatpush.msra.mxu1 %v7586_v29 }
 0x4f0   : > { %4072 = vmatpush.msrb.mxu2 %v4021_v49 }
 0x4f1   : > { %4114 = vmatpush.msra.mxu1 %v7595_v50 }
 0x4f2   : > { %4073 = vmatpush.msrb.mxu2 %v4020_v47 }
 0x4f3   : > { %4115 = vmatpush.msra.mxu1 %v4026_v16 }
 0x4f5   : > { %4116 = vmatpush.msra.mxu1 %v4025_v59 }
 0x4f7   : > { %4117 = vmatpush.msra.mxu1 %v4024_v10 }
 0x4f9   : > { %4118 = vmatpush.msra.mxu1 %v4023_v61 }
 0x4fb   : > { %4119 = vmatpush.msra.mxu1 %v4022_v7 }
 0x4fd   : > { %4120 = vmatpush.msra.mxu1 %v4021_v49 }
 0x4ff   : > { %4121 = vmatpush.msra.mxu1 %v4020_v47 }
 0x504   : > { %v7578_v52 = vpop.permute.xlu0 %3824 }
 0x505   : > { %v7607_v5 = vpop.permute.xlu2 %3857  ;;  %v3950_v50 = vsel %vm3932_vm15, %v7492_v0, %v7578_v52 }
 0x50c   : > { %v3614_v2 = vpop.permute.xlu0 %3613 }
 0x50d   : > { %v3937_v32 = vsel %vm3935_vm0, %v3934_v3, %v3614_v2 }
 0x512   : > { %v7570_v62 = vpop.permute.xlu1 %3826 }
 0x513   : > { %v3951_v22 = vsel %vm3932_vm15, %v3949_v42, %v7570_v62 }
 0x514   : > { %v3643_v63 = vpop.permute.xlu0 %3642  ;;  %v3953_v35 = vsel %vm3935_vm0, %v3951_v22, %v7607_v5 }
 0x515   : > { %v3939_v46 = vsel %vm3938_vm1, %v3936_v60, %v3643_v63 }
 0x51a   : > { %v7605_v39 = vpop.permute.xlu1 %3855 }
 0x51b   : > { %v3952_v37 = vsel %vm3935_vm0, %v3950_v50, %v7605_v39 }
 0x522   : > { %v3645_v43 = vpop.permute.xlu1 %3644 }
 0x523   : > { %v3940_v12 = vsel %vm3938_vm1, %v3937_v32, %v3645_v43  ;;  %v4036_v32 = vld [vmem:[%s7792_s4] sm:$0xff] }
 0x524   : > { %v7627_v4 = vpop.permute.xlu2 %3886  ;;  %4159 = vmatpush.msra.mxu2 %v4036_v32 }
 0x525   : > { %v3954_v2 = vsel %vm3938_vm1, %v3952_v37, %v7627_v4 }
 0x52a   : > { %v3674_v33 = vpop.permute.xlu1 %3673 }
 0x52b   : > { %v3942_v14 = vsel %vm3941_vm3, %v3939_v46, %v3674_v33  ;;  %v4037_v46 = vld [vmem:[%s7792_s4 + $0x8] sm:$0xff] }
 0x52c   : > { %v3676_v53 = vpop.permute.xlu2 %3675  ;;  %v7666_v58 = vadd.f32 %v3964_v45, %v3942_v14  ;;  %4179 = vmatpush.msra.mxu3 %v4037_v46 }
 0x52d   : > { %v3943_v31 = vsel %vm3941_vm3, %v3940_v12, %v3676_v53 }
 0x52e   : > { %v7669_v23 = vadd.f32 %v3964_v45, %v3943_v31  ;;  %v3986_v48 = vmul.f32 %v7666_v58, %v7666_v58  ;;  %v4543_v45 = vmov 512.0  }
 0x52f   : > { %4498 = vrcp.f32 %v4543_v45 }
 0x530   : > { %v3972_v18 = vadd.f32 %v7669_v23, %v7666_v58  ;;  %v3988_v38 = vmul.f32 %v7669_v23, %v7669_v23 }
 0x532   : > { %v3973_v17 = vrot.slane %v3972_v18, 4  ;;  %v3990_v21 = vadd.f32 %v3988_v38, %v3986_v48 }
 0x534   : > { %v3974_v51 = vadd.f32 %v3973_v17, %v3972_v18  ;;  %v3991_v55 = vrot.slane %v3990_v21, 4 }
 0x535   : > { %v4499_v3 = vpop.eup %4498 }
 0x536   : > { %v3975_v15 = vrot.slane %v3974_v51, 2  ;;  %v3992_v11 = vadd.f32 %v3991_v55, %v3990_v21  ;;  %v4079_v60 = vmul.f32 512.0, %v4499_v3  ;;  %vm4083_vm5 = vweird.f32 %v4499_v3 }
 0x538   : > { %v3976_v25 = vadd.f32 %v3975_v15, %v3974_v51  ;;  %v3993_v6 = vrot.slane %v3992_v11, 2  ;;  %v4080_v12 = vsub.f32 1.0, %v4079_v60 }
 0x53a   : > { %v3977_v57 = vrot.slane %v3976_v25, 1  ;;  %v3994_v8 = vadd.f32 %v3993_v6, %v3992_v11  ;;  %v4081_v14 = vmul.f32 %v4499_v3, %v4080_v12 }
 0x53c   : > { %v3978_v56 = vadd.f32 %v3977_v57, %v3976_v25  ;;  %v3995_v19 = vrot.slane %v3994_v8, 1  ;;  %v4082_v53 = vadd.f32 %v4499_v3, %v4081_v14 }
 0x53e   : > { %4054 = vmatmul.f32.vlgmr.msrb.gmra.mxu1 %v3978_v56  ;;  %v3996_v9 = vadd.f32 %v3995_v19, %v3994_v8  ;;  %v4084_v38 = vsel %vm4083_vm5, %v4499_v3, %v4082_v53 }
 0x540   : > { %4102 = vmatmul.f32.vlgmr.msrb.gmra.mxu3 %v3996_v9 }
 0x541   : > { %4222 = vmatpush.msrb.mxu3 %v4037_v46 }
 0x54a   : > { %v3889_v29 = vpop.permute.xlu0 %3888 }
 0x54b   : > { %v3955_v0 = vsel %vm3938_vm1, %v3953_v35, %v3889_v29  ;;  %v4459_v29 = vld [vmem:[%s7790_s2 + $0x1] ss:$4 sm:$0x3] }
 0x552   : > { %v3918_v30 = vpop.permute.xlu0 %3917 }
 0x553   : > { %v3956_v28 = vsel %vm3941_vm3, %v3954_v2, %v3918_v30 }
 0x554   : > { %v7706_v27 = vadd.f32 %v3965_v36, %v3956_v28  ;;  %v4460_v28 = vld [vmem:[%s7790_s2 + $0x2] ss:$4 sm:$0x3] }
 0x555   : > { %v3920_v52 = vpop.permute.xlu1 %3919 }
 0x556   : > { %v3957_v16 = vsel %vm3941_vm3, %v3955_v0, %v3920_v52  ;;  %v3987_v39 = vmul.f32 %v7706_v27, %v7706_v27 }
 0x557   : > { %v7710_v62 = vadd.f32 %v3965_v36, %v3957_v16 }
 0x559   : > { %v3989_v59 = vmul.f32 %v7710_v62, %v7710_v62  ;;  %v3979_v54 = vadd.f32 %v7710_v62, %v7706_v27 }
 0x55b   : > { %v3980_v26 = vrot.slane %v3979_v54, 4  ;;  %v3997_v5 = vadd.f32 %v3989_v59, %v3987_v39 }
 0x55d   : > { %v3998_v43 = vrot.slane %v3997_v5, 4  ;;  %v3981_v4 = vadd.f32 %v3980_v26, %v3979_v54 }
 0x55f   : > { %v3999_v34 = vadd.f32 %v3998_v43, %v3997_v5  ;;  %v3982_v44 = vrot.slane %v3981_v4, 2 }
 0x561   : > { %v3983_v20 = vadd.f32 %v3982_v44, %v3981_v4  ;;  %v4000_v13 = vrot.slane %v3999_v34, 2 }
 0x563   : > { %v3984_v24 = vrot.slane %v3983_v20, 1  ;;  %v4001_v40 = vadd.f32 %v4000_v13, %v3999_v34 }
 0x565   : > { %v3985_v1 = vadd.f32 %v3984_v24, %v3983_v20  ;;  %v4002_v41 = vrot.slane %v4001_v40, 1 }
 0x567   : > { %4074 = vmatmul.f32.vlgmr.msrb.gmra.mxu2 %v3985_v1  ;;  %v4003_v63 = vadd.f32 %v4002_v41, %v4001_v40 }
 0x568   : > { %4202 = vmatpush.msrb.mxu2 %v4036_v32 }
 0x569   : > { %4122 = vmatmul.f32.vlgmr.msra.gmra.mxu1 %v4003_v63 }
 0x5bb   : > { %v4055_v33 = vpop.f32.mrf.mxu1 }
 0x5c3   : > { %v4103_v61 = vpop.f32.mrf.mxu3 }
 0x5e6   : > { %v4123_v10 = vpop.f32.mrf.mxu1 }
 0x5e7   : > { %v4124_v48 = vadd.f32 %v4123_v10, %v4103_v61 }
 0x5e9   : > { %v4126_v21 = vmul.f32 %v4124_v48, %v4084_v38 }
 0x5ea   : > { %v4075_v31 = vpop.f32.mrf.mxu2 }
 0x5eb   : > { %v4076_v18 = vadd.f32 %v4075_v31, %v4055_v33 }
 0x5ed   : > { %v4085_v17 = vmul.f32 %v4084_v38, %v4076_v18 }
 0x5ef   : > { %v4127_v51 = vmul.f32 %v4085_v17, %v4085_v17  ;;  %4461 = vmatmul.msk.f32.vlgmr.msra.gmra.mxu2 %vm667_vm2, %v4085_v17  ;;  %4462 = vmatmul.msk.f32.vlgmr.msra.gmra.mxu3 %vm667_vm2, %v4085_v17 }
 0x5f1   : > { %v4128_v55 = vsub.f32 %v4126_v21, %v4127_v51 }
 0x5f3   : > { %v4129_v15 = vmax.f32 %v4128_v55, 0.0 }
 0x5f5   : > { %v4130_v11 = vadd.f32 1e-05, %v4129_v15 }
 0x5f7   : > { %4500 = vrsqrt.f32 %v4130_v11  ;;  %vm4137_vm7 = vweird.f32 %v4130_v11 }
 0x5fd   : > { %v4501_v25 = vpop.eup %4500 }
 0x5fe   : > { %v4132_v6 = vmul.f32 %v4501_v25, %v4130_v11  ;;  %vm4138_vm6 = vweird.f32 %v4501_v25 }
 0x5ff   : > { %vm4139_vm8 = vmor %vm4137_vm7, %vm4138_vm6 }
 0x600   : > { %v4133_v57 = vmul.f32 %v4501_v25, %v4132_v6 }
 0x602   : > { %v4134_v8 = vmul.f32 0.5, %v4133_v57 }
 0x604   : > { %v4135_v56 = vsub.f32 1.5, %v4134_v8 }
 0x606   : > { %v4136_v19 = vmul.f32 %v4501_v25, %v4135_v56 }
 0x608   : > { %v4140_v9 = vsel %vm4139_vm8, %v4501_v25, %v4136_v19 }
 0x609   : > { %4463 = vmatmul.msk.f32.vlgmr.msrb.gmra.mxu2 %vm667_vm2, %v4140_v9  ;;  %4464 = vmatmul.msk.f32.vlgmr.msrb.gmra.mxu3 %vm667_vm2, %v4140_v9 }
 0x672   : > { %v4181_v7 = vpop.f32.mrf.mxu3  ;;  %v4161_v49 = vpop.f32.mrf.mxu2 }
 0x68c   : > { %v4224_v47 = vpop.f32.mrf.mxu3  ;;  %v4204_v50 = vpop.f32.mrf.mxu2 }
 0x68d   : > { %v4229_v42 = vrot.slane %v4224_v47, 7 }
 0x68f   : > { %v4230_v36 = vsel %vm1491_vm4, %v4204_v50, %v4229_v42 }
 0x690   : > { %v4232_v22 = vmul.f32 %v4459_v29, %v4230_v36 }
 0x692   : > { %v4234_v37 = vperm.slane %v4232_v22, 0  ;;  %v4235_v2 = vperm.slane %v4232_v22, 1 }
 0x694   : > { %v4239_v30 = vmul.f32 %v4235_v2, %v4181_v7  ;;  %v4238_v35 = vmul.f32 %v4234_v37, %v4161_v49  ;;  %v4246_v39 = vmul.f32 %v4234_v37, %v7666_v58  ;;  %v4247_v59 = vmul.f32 %v4235_v2, %v7706_v27 }
 0x695   : > { %v4248_v54 = vmul.f32 %v4234_v37, %v7669_v23  ;;  %v4249_v26 = vmul.f32 %v4235_v2, %v7710_v62 }
 0x696   : > { %v4242_v0 = vrot.slane %v4239_v30, 7 }
 0x698   : > { %v4243_v52 = vsel %vm1491_vm4, %v4238_v35, %v4242_v0 }
 0x699   : > { %v4245_v16 = vsub.f32 %v4460_v28, %v4243_v52 }
 0x69b   : > { %v4251_v5 = vperm.slane %v4245_v16, 0  ;;  %v4252_v43 = vperm.slane %v4245_v16, 1 }
 0x69d   : > { %v7740_v4 = vadd.f32 %v4251_v5, %v4246_v39  ;;  %v7742_v34 = vadd.f32 %v4252_v43, %v4247_v59  ;;  %v7744_v44 = vadd.f32 %v4251_v5, %v4248_v54  ;;  %v7746_v20 = vadd.f32 %v4252_v43, %v4249_v26 }
 0x69f   : > { %v4465_v13 = vmul.f32 -1.442695, %v7740_v4  ;;  %v4466_v58 = vmul.f32 -1.442695, %v7742_v34  ;;  %v4467_v27 = vmul.f32 -1.442695, %v7744_v44 }
 0x6a0   : > { %v4468_v23 = vmul.f32 -1.442695, %v7746_v20 }
 0x6a1   : > { %4502 = vpow2.f32 %v4465_v13 }
 0x6a2   : > { %4504 = vpow2.f32 %v4466_v58 }
 0x6a3   : > { %4506 = vpow2.f32 %v4467_v27 }
 0x6a4   : > { %4508 = vpow2.f32 %v4468_v23 }
 0x6a7   : > { %v4503_v62 = vpop.eup %4502 }
 0x6a8   : > { %v4505_v24 = vpop.eup %4504  ;;  %v4271_v40 = vadd.f32 1.0, %v4503_v62 }
 0x6a9   : > { %v4507_v1 = vpop.eup %4506  ;;  %v4272_v41 = vadd.f32 1.0, %v4505_v24 }
 0x6aa   : > { %v4509_v63 = vpop.eup %4508  ;;  %v4273_v45 = vadd.f32 1.0, %v4507_v1  ;;  %4510 = vrcp.f32 %v4271_v40  ;;  %v4284_v60 = vand.u32 2147483647, %v4271_v40  ;;  %v4286_v32 = vand.u32 2147483648, %v4271_v40 }
 0x6ab   : > { %v7752_v3 = vadd.f32 1.0, %v4509_v63  ;;  %4512 = vrcp.f32 %v4272_v41  ;;  %vm4280_vm2 = vweird.f32 %v4271_v40  ;;  %vm4295_vm4 = vweird.f32 %v4272_v41 }
 0x6ac   : > { %4514 = vrcp.f32 %v4273_v45  ;;  %v4299_v10 = vand.u32 2147483647, %v4272_v41  ;;  %v4301_v61 = vand.u32 2147483648, %v4272_v41  ;;  %vm7755_vm9 = vcmp.eq.f32.partialorder %v4284_v60, 8.507059e+37 }
 0x6ad   : > { %4516 = vrcp.f32 %v7752_v3  ;;  %v4287_v18 = vor.u32 1.1754944e-38, %v4286_v32  ;;  %vm4310_vm10 = vweird.f32 %v4273_v45  ;;  %v4314_v51 = vand.u32 2147483647, %v4273_v45 }
 0x6ae   : > { %v4316_v55 = vand.u32 2147483648, %v4273_v45  ;;  %vm7760_vm13 = vcmp.eq.f32.partialorder %v4299_v10, 8.507059e+37  ;;  %v4302_v8 = vor.u32 1.1754944e-38, %v4301_v61  ;;  %vm4325_vm0 = vweird.f32 %v7752_v3 }
 0x6af   : > { %v4329_v49 = vand.u32 2147483647, %v7752_v3  ;;  %v4331_v47 = vand.u32 2147483648, %v7752_v3  ;;  %vm4315_vm6 = vcmp.eq.f32.partialorder %v4314_v51, 8.507059e+37 }
 0x6b0   : > { %v4511_v46 = vpop.eup %4510  ;;  %v4317_v37 = vor.u32 1.1754944e-38, %v4316_v55 }
 0x6b1   : > { %v4513_v33 = vpop.eup %4512  ;;  %v4276_v12 = vmul.f32 %v4511_v46, %v4271_v40  ;;  %vm4281_vm11 = vweird.f32 %v4511_v46  ;;  %v4332_v52 = vor.u32 1.1754944e-38, %v4331_v47  ;;  %vm4330_vm8 = vcmp.eq.f32.partialorder %v4329_v49, 8.507059e+37 }
 0x6b2   : > { %v4515_v14 = vpop.eup %4514  ;;  %v4291_v53 = vmul.f32 %v4513_v33, %v4272_v41  ;;  %vm4296_vm12 = vweird.f32 %v4513_v33  ;;  %vm4282_vm15 = vmor %vm4280_vm2, %vm4281_vm11 }
 0x6b3   : > { %v4277_v31 = vsub.f32 1.0, %v4276_v12  ;;  %v4306_v38 = vmul.f32 %v4515_v14, %v4273_v45  ;;  %v4517_v17 = vpop.eup %4516  ;;  %vm4311_vm14 = vweird.f32 %v4515_v14  ;;  %vm4297_vm1 = vmor %vm4295_vm4, %vm4296_vm12 }
 0x6b4   : > { %v4292_v21 = vsub.f32 1.0, %v4291_v53  ;;  %v4321_v25 = vmul.f32 %v4517_v17, %v7752_v3  ;;  %vm4326_vm3 = vweird.f32 %v4517_v17  ;;  %vm4312_vm5 = vmor %vm4310_vm10, %vm4311_vm14 }
 0x6b5   : > { %v4278_v15 = vmul.f32 %v4511_v46, %v4277_v31  ;;  %v4307_v11 = vsub.f32 1.0, %v4306_v38  ;;  %vm4327_vm7 = vmor %vm4325_vm0, %vm4326_vm3 }
 0x6b6   : > { %v4293_v6 = vmul.f32 %v4513_v33, %v4292_v21  ;;  %v4322_v9 = vsub.f32 1.0, %v4321_v25 }
 0x6b7   : > { %v4279_v56 = vadd.f32 %v4511_v46, %v4278_v15  ;;  %v4308_v19 = vmul.f32 %v4515_v14, %v4307_v11 }
 0x6b8   : > { %v4294_v7 = vadd.f32 %v4513_v33, %v4293_v6  ;;  %v4323_v50 = vmul.f32 %v4517_v17, %v4322_v9 }
 0x6b9   : > { %v4283_v29 = vsel %vm4282_vm15, %v4511_v46, %v4279_v56  ;;  %v4309_v42 = vadd.f32 %v4515_v14, %v4308_v19 }
 0x6ba   : > { %v4288_v36 = vsel %vm7755_vm9, %v4287_v18, %v4283_v29  ;;  %v4298_v22 = vsel %vm4297_vm1, %v4513_v33, %v4294_v7  ;;  %v4324_v28 = vadd.f32 %v4517_v17, %v4323_v50 }
 0x6bb   : > { %v4303_v2 = vsel %vm7760_vm13, %v4302_v8, %v4298_v22  ;;  %v4313_v30 = vsel %vm4312_vm5, %v4515_v14, %v4309_v42  ;;  %v4335_v35 = vmul.f32 %v4288_v36, %v7740_v4 }
 0x6bc   : > { %v4318_v0 = vsel %vm4315_vm6, %v4317_v37, %v4313_v30  ;;  %v4336_v16 = vmul.f32 %v4303_v2, %v7742_v34  ;;  %v4328_v39 = vsel %vm4327_vm7, %v4517_v17, %v4324_v28 }
 0x6bd   : > { %v4337_v59 = vmul.f32 %v4318_v0, %v7744_v44  ;;  %4339 = vst [vmem:[%s224_s21] sm:$0xff] %v4335_v35  ;;  %v4333_v54 = vsel %vm4330_vm8, %v4332_v52, %v4328_v39 }
 0x6be   : > { %4340 = vst [vmem:[%s224_s21 + $0x8] sm:$0xff] %v4336_v16  ;;  %v4338_v26 = vmul.f32 %v4333_v54, %v7746_v20 }
 0x6bf   : > { %4341 = vst [vmem:[%s224_s21 + $0x10] sm:$0xff] %v4337_v59 }
 0x6c0   : > { %4342 = vst [vmem:[%s224_s21 + $0x18] sm:$0xff] %v4338_v26 }
 0x6c1 PF: > { %s15_s18 = sadd.s32 1, %s4531_s18  }
 0x6c2   : > { %p12_p4 = scmp.ge.s32.totalorder %s15_s18, 4  }
 0x6c4   :  { %14 = sbr.rel (!%p12_p4) target bundleno = 1 (0x1), region = 191 }

</bundles_post_ra>
